<compile_context>
chip_gen: v7x
topology: tpu7x:2x2x1
jax: 0.10.0
libtpu: 0.0.40
codegen_flags: <defaults>
</compile_context>

<pallas_src>
import functools

import jax
import jax.numpy as jnp
from jax.experimental import pallas as pl
from jax.experimental.pallas import tpu as pltpu

EPS = 1e-5  # PyTorch LayerNorm default


# ----------------------------- kernel helpers ------------------------------ #
def _linear(x, w_ref, b_ref):
    # x: (L, Din) f32, w: (Din, Dout) bf16, b: (1, Dout) f32 -> (L, Dout) f32
    return jnp.dot(x.astype(jnp.bfloat16), w_ref[...],
                   preferred_element_type=jnp.float32) + b_ref[...]


def _layernorm(x, g_ref, b_ref):
    mu = jnp.mean(x, axis=-1, keepdims=True)
    var = jnp.mean((x - mu) ** 2, axis=-1, keepdims=True)
    return (x - mu) * jax.lax.rsqrt(var + EPS) * g_ref[...] + b_ref[...]


def _softmax(x):
    # f32 stats; normalization via EUP reciprocal instead of a VPU divide.
    m = jnp.max(x, axis=-1, keepdims=True)
    e = jnp.exp(x - m)
    return e * pl.reciprocal(jnp.sum(e, axis=-1, keepdims=True), approx=True)


def _attention(v, k, q, mask_bias, wv, bv, wk, bk, wq, bq, wo, bo,
               heads, head_dim, inv_scale):
    # v, k: (Lk, E) f32;  q: (Lq, E) f32;  mask_bias: (Lq, Lk) f32 additive (0 / -1e20)
    Lq = q.shape[0]
    Lk = k.shape[0]

    V = _linear(v, wv, bv)                          # (Lk, E) f32
    K = _linear(k, wk, bk)                          # (Lk, E) f32
    Q = _linear(q, wq, bq) * inv_scale              # pre-scale Q once (not per head)

    # Batch the heads: (L, E) -> (heads, L, head_dim); two well-shaped MXU einsums.
    Qh = Q.reshape(Lq, heads, head_dim).transpose(1, 0, 2).astype(jnp.bfloat16)
    Kh = K.reshape(Lk, heads, head_dim).transpose(1, 0, 2).astype(jnp.bfloat16)
    Vh = V.reshape(Lk, heads, head_dim).transpose(1, 0, 2).astype(jnp.bfloat16)

    # energy: (heads, Lq, Lk), f32 accumulation
    e = jnp.einsum("hqd,hkd->hqk", Qh, Kh, preferred_element_type=jnp.float32)
    e = e + mask_bias[None, :, :]                   # masked positions -> ~-1e20
    a = _softmax(e)                                 # f32 probs

    # context: (heads, Lq, head_dim)
    ctx = jnp.einsum("hqk,hkd->hqd", a.astype(jnp.bfloat16), Vh,
                     preferred_element_type=jnp.float32)
    concat = ctx.transpose(1, 0, 2).reshape(Lq, heads * head_dim)   # (Lq, E)

    return jnp.dot(concat.astype(jnp.bfloat16), wo[...],
                   preferred_element_type=jnp.float32) + bo[...]


# --------------------------------- kernel ---------------------------------- #
def decoder_block_kernel(x_ref, val_ref, key_ref, sbias_ref, tbias_ref,
                         wv1, bv1, wk1, bk1, wq1, bq1, wo1, bo1,
                         gn, bn,
                         wv2, bv2, wk2, bk2, wq2, bq2, wo2, bo2,
                         g1, b1, g2, b2,
                         wf1, bf1, wf2, bf2,
                         out_ref,
                         *, heads, head_dim, inv_scale):
    x = x_ref[0].astype(jnp.float32)       # (Lq, E)
    val = val_ref[0].astype(jnp.float32)   # (Lk, E)
    key = key_ref[0].astype(jnp.float32)   # (Lk, E)
    sbias = sbias_ref[0]                   # (Lq, Lk) additive bias
    tbias = tbias_ref[0]                   # (Lq, Lq) additive bias

    # --- DecoderBlock: masked self-attention over x ---
    attn1 = _attention(x, x, x, tbias,
                       wv1, bv1, wk1, bk1, wq1, bq1, wo1, bo1,
                       heads, head_dim, inv_scale)
    query = _layernorm(attn1 + x, gn, bn)          # dropout == identity (eval)

    # --- TransformerBlock: cross-attention + FFN ---
    attn2 = _attention(val, key, query, sbias,
                       wv2, bv2, wk2, bk2, wq2, bq2, wo2, bo2,
                       heads, head_dim, inv_scale)
    xin = _layernorm(attn2 + query, g1, b1)        # dropout == identity
    hidden = jnp.maximum(_linear(xin, wf1, bf1), 0.0)   # ReLU (f32)
    ff = _linear(hidden, wf2, bf2)
    out = _layernorm(ff + xin, g2, b2)             # dropout == identity

    out_ref[0] = out.astype(out_ref.dtype)


PARAM_ORDER = [
    "wv1", "bv1", "wk1", "bk1", "wq1", "bq1", "wo1", "bo1",
    "gn", "bn",
    "wv2", "bv2", "wk2", "bk2", "wq2", "bq2", "wo2", "bo2",
    "g1", "b1", "g2", "b2",
    "wf1", "bf1", "wf2", "bf2",
]


# -------------------------------- wrapper ----------------------------------- #
def decoder_block(x, value, key, src_mask, tgt_mask, params, heads):
    N, Lq, E = x.shape
    Lk = key.shape[1]
    head_dim = E // heads
    inv_scale = 1.0 / (E ** 0.5)

    # Convert masks to additive biases once in the wrapper (0 keep / -1e20 masked);
    # the kernel then does a single broadcast add instead of per-head compare+select.
    neg = jnp.float32(-1e20)
    sbias = jnp.where(jnp.broadcast_to(src_mask, (N, Lq, Lk)) == 0,
                      neg, jnp.float32(0.0)).astype(jnp.float32)
    tbias = jnp.where(jnp.broadcast_to(tgt_mask, (N, Lq, Lq)) == 0,
                      neg, jnp.float32(0.0)).astype(jnp.float32)

    # Matmul weights in bf16 (MXU-native, halves DMA/VMEM); biases + LN params f32.
    plist = [params[k].astype(jnp.bfloat16) if k[0] == "w"
             else params[k].astype(jnp.float32)
             for k in PARAM_ORDER]

    data_specs = [
        pl.BlockSpec((1, Lq, E), lambda i: (i, 0, 0)),
        pl.BlockSpec((1, Lk, E), lambda i: (i, 0, 0)),
        pl.BlockSpec((1, Lk, E), lambda i: (i, 0, 0)),
        pl.BlockSpec((1, Lq, Lk), lambda i: (i, 0, 0)),
        pl.BlockSpec((1, Lq, Lq), lambda i: (i, 0, 0)),
    ]
    # Weights / biases never change across the grid: keep them whole-array resident
    # in VMEM (no double-buffering) instead of re-pipelining them every step.
    param_specs = [pl.BlockSpec(memory_space=pltpu.MemorySpace.VMEM) for _ in plist]

    kernel = functools.partial(decoder_block_kernel,
                               heads=heads, head_dim=head_dim,
                               inv_scale=inv_scale)

    return pl.pallas_call(
        kernel,
        out_shape=jax.ShapeDtypeStruct((N, Lq, E), jnp.float32),
        grid_spec=pltpu.PrefetchScalarGridSpec(
            num_scalar_prefetch=0,
            grid=(N,),
            in_specs=data_specs + param_specs,
            out_specs=pl.BlockSpec((1, Lq, E), lambda i: (i, 0, 0)),
        ),
        compiler_params=pltpu.CompilerParams(
            dimension_semantics=("parallel",)),   # batch items are independent
    )(x, value, key, sbias, tbias, *plist)


# --------------------------- pure-JAX reference ----------------------------- #
def _ref_attention(v, k, q, mask, p, heads, E):
    N, Lq, _ = q.shape
    Lk = k.shape[1]
    hd = E // heads
    V = v @ p["wv"] + p["bv"][0]
    K = k @ p["wk"] + p["bk"][0]
    Q = q @ p["wq"] + p["bq"][0]
    V = V.reshape(N, Lk, heads, hd)
    K = K.reshape(N, Lk, heads, hd)
    Q = Q.reshape(N, Lq, heads, hd)
    energy = jnp.einsum("nqhd,nkhd->nhqk", Q, K)
    energy = jnp.where(mask[:, None, :, :] == 0, -1e20, energy)
    attn = jax.nn.softmax(energy / jnp.sqrt(jnp.float32(E)), axis=-1)
    out = jnp.einsum("nhqk,nkhd->nqhd", attn, V).reshape(N, Lq, E)
    return out @ p["wo"] + p["bo"][0]


def _ref_ln(x, g, b):
    mu = jnp.mean(x, axis=-1, keepdims=True)
    var = jnp.mean((x - mu) ** 2, axis=-1, keepdims=True)
    return (x - mu) / jnp.sqrt(var + EPS) * g[0] + b[0]


def decoder_block_ref(x, value, key, src_mask, tgt_mask, p, heads):
    N, Lq, E = x.shape
    Lk = key.shape[1]
    sm = jnp.broadcast_to(src_mask, (N, Lq, Lk))
    tm = jnp.broadcast_to(tgt_mask, (N, Lq, Lq))
    p1 = {"wv": p["wv1"], "bv": p["bv1"], "wk": p["wk1"], "bk": p["bk1"],
          "wq": p["wq1"], "bq": p["bq1"], "wo": p["wo1"], "bo": p["bo1"]}
    p2 = {"wv": p["wv2"], "bv": p["bv2"], "wk": p["wk2"], "bk": p["bk2"],
          "wq": p["wq2"], "bq": p["bq2"], "wo": p["wo2"], "bo": p["bo2"]}
    a1 = _ref_attention(x, x, x, tm, p1, heads, E)
    query = _ref_ln(a1 + x, p["gn"], p["bn"])
    a2 = _ref_attention(value, key, query, sm, p2, heads, E)
    xin = _ref_ln(a2 + query, p["g1"], p["b1"])
    hid = jnp.maximum(xin @ p["wf1"] + p["bf1"][0], 0.0)
    ff = hid @ p["wf2"] + p["bf2"][0]
    return _ref_ln(ff + xin, p["g2"], p["b2"])


# ----------------------------------- main ------------------------------------ #
def init_params(key, E, heads, forward_expansion):
    F = forward_expansion * E
    ks = jax.random.split(key, 32)
    ki = iter(ks)

    def lin(k, din, dout):
        scale = 1.0 / jnp.sqrt(din)
        w = jax.random.uniform(k, (din, dout), jnp.float32, -scale, scale)
        b = jax.random.uniform(next(ki), (1, dout), jnp.float32, -scale, scale)
        return w, b

    p = {}
    for name in ["v1", "k1", "q1", "o1", "v2", "k2", "q2", "o2"]:
        w, b = lin(next(ki), E, E)
        p["w" + name], p["b" + name] = w, b
    p["gn"], p["bn"] = jnp.ones((1, E), jnp.float32), jnp.zeros((1, E), jnp.float32)
    p["g1"], p["b1"] = jnp.ones((1, E), jnp.float32), jnp.zeros((1, E), jnp.float32)
    p["g2"], p["b2"] = jnp.ones((1, E), jnp.float32), jnp.zeros((1, E), jnp.float32)
    p["wf1"], p["bf1"] = lin(next(ki), E, F)
    p["wf2"], p["bf2"] = lin(next(ki), F, E)
    return p


if __name__ == "__main__":
    # Small shapes; E chosen lane-dense (multiple of 128) per TPU layout guidance.
    N, Lq, Lk, E, heads, fexp = 2, 8, 8, 128, 4, 4

    root = jax.random.PRNGKey(0)
    kx, kv, kk, kp = jax.random.split(root, 4)
    x = jax.random.normal(kx, (N, Lq, E), jnp.float32)
    value = jax.random.normal(kv, (N, Lk, E), jnp.float32)
    key = jax.random.normal(kk, (N, Lk, E), jnp.float32)

    # tgt_mask: causal (N, Lq, Lq); src_mask: all-ones except last source pos of batch 1
    tgt_mask = jnp.tril(jnp.ones((Lq, Lq), jnp.float32))[None].repeat(N, axis=0)
    src_mask = jnp.ones((N, Lq, Lk), jnp.float32).at[1, :, Lk - 1].set(0.0)

    params = init_params(kp, E, heads, fexp)

    out = decoder_block(x, value, key, src_mask, tgt_mask, params, heads)
    out = jax.block_until_ready(out)

    ref = decoder_block_ref(x, value, key, src_mask, tgt_mask, params, heads)
    assert out.shape == (N, Lq, E)
    # bf16 matmul operands with f32 accumulation -> slightly looser tolerance vs f32 ref
    assert jnp.allclose(out, ref, atol=5e-2, rtol=5e-2), "mismatch vs reference"

    print("KERNEL_OK")
</pallas_src>

<mosaic_0001>
module attributes {stable_mosaic.version = 11 : i64} {
  func.func @decoder_block_kernel(%arg0: i32, %arg1: memref<1x8x128xf32, #tpu.memory_space<vmem>>, %arg2: memref<1x8x128xf32, #tpu.memory_space<vmem>>, %arg3: memref<1x8x128xf32, #tpu.memory_space<vmem>>, %arg4: memref<1x8x8xf32, #tpu.memory_space<vmem>>, %arg5: memref<1x8x8xf32, #tpu.memory_space<vmem>>, %arg6: memref<128x128xbf16, #tpu.memory_space<vmem>>, %arg7: memref<1x128xf32, #tpu.memory_space<vmem>>, %arg8: memref<128x128xbf16, #tpu.memory_space<vmem>>, %arg9: memref<1x128xf32, #tpu.memory_space<vmem>>, %arg10: memref<128x128xbf16, #tpu.memory_space<vmem>>, %arg11: memref<1x128xf32, #tpu.memory_space<vmem>>, %arg12: memref<128x128xbf16, #tpu.memory_space<vmem>>, %arg13: memref<1x128xf32, #tpu.memory_space<vmem>>, %arg14: memref<1x128xf32, #tpu.memory_space<vmem>>, %arg15: memref<1x128xf32, #tpu.memory_space<vmem>>, %arg16: memref<128x128xbf16, #tpu.memory_space<vmem>>, %arg17: memref<1x128xf32, #tpu.memory_space<vmem>>, %arg18: memref<128x128xbf16, #tpu.memory_space<vmem>>, %arg19: memref<1x128xf32, #tpu.memory_space<vmem>>, %arg20: memref<128x128xbf16, #tpu.memory_space<vmem>>, %arg21: memref<1x128xf32, #tpu.memory_space<vmem>>, %arg22: memref<128x128xbf16, #tpu.memory_space<vmem>>, %arg23: memref<1x128xf32, #tpu.memory_space<vmem>>, %arg24: memref<1x128xf32, #tpu.memory_space<vmem>>, %arg25: memref<1x128xf32, #tpu.memory_space<vmem>>, %arg26: memref<1x128xf32, #tpu.memory_space<vmem>>, %arg27: memref<1x128xf32, #tpu.memory_space<vmem>>, %arg28: memref<128x512xbf16, #tpu.memory_space<vmem>>, %arg29: memref<1x512xf32, #tpu.memory_space<vmem>>, %arg30: memref<512x128xbf16, #tpu.memory_space<vmem>>, %arg31: memref<1x128xf32, #tpu.memory_space<vmem>>, %arg32: memref<1x8x128xf32, #tpu.memory_space<vmem>>) attributes {dimension_semantics = [#tpu.dimension_semantics<parallel>], iteration_bounds = array<i64: 2>, scalar_prefetch = 0 : i64, scratch_operands = 0 : i64, tpu.core_type = #tpu.core_type<tc>, window_params = [{transform_indices = @transform_0, window_bounds = array<i64: 1, 8, 128>}, {transform_indices = @transform_1, window_bounds = array<i64: 1, 8, 128>}, {transform_indices = @transform_2, window_bounds = array<i64: 1, 8, 128>}, {transform_indices = @transform_3, window_bounds = array<i64: 1, 8, 8>}, {transform_indices = @transform_4, window_bounds = array<i64: 1, 8, 8>}, {pipeline_mode = #tpu.pipeline_mode<synchronous>, transform_indices = @transform_5, window_bounds = array<i64: 128, 128>}, {pipeline_mode = #tpu.pipeline_mode<synchronous>, transform_indices = @transform_6, window_bounds = array<i64: 1, 128>}, {pipeline_mode = #tpu.pipeline_mode<synchronous>, transform_indices = @transform_7, window_bounds = array<i64: 128, 128>}, {pipeline_mode = #tpu.pipeline_mode<synchronous>, transform_indices = @transform_8, window_bounds = array<i64: 1, 128>}, {pipeline_mode = #tpu.pipeline_mode<synchronous>, transform_indices = @transform_9, window_bounds = array<i64: 128, 128>}, {pipeline_mode = #tpu.pipeline_mode<synchronous>, transform_indices = @transform_10, window_bounds = array<i64: 1, 128>}, {pipeline_mode = #tpu.pipeline_mode<synchronous>, transform_indices = @transform_11, window_bounds = array<i64: 128, 128>}, {pipeline_mode = #tpu.pipeline_mode<synchronous>, transform_indices = @transform_12, window_bounds = array<i64: 1, 128>}, {pipeline_mode = #tpu.pipeline_mode<synchronous>, transform_indices = @transform_13, window_bounds = array<i64: 1, 128>}, {pipeline_mode = #tpu.pipeline_mode<synchronous>, transform_indices = @transform_14, window_bounds = array<i64: 1, 128>}, {pipeline_mode = #tpu.pipeline_mode<synchronous>, transform_indices = @transform_15, window_bounds = array<i64: 128, 128>}, {pipeline_mode = #tpu.pipeline_mode<synchronous>, transform_indices = @transform_16, window_bounds = array<i64: 1, 128>}, {pipeline_mode = #tpu.pipeline_mode<synchronous>, transform_indices = @transform_17, window_bounds = array<i64: 128, 128>}, {pipeline_mode = #tpu.pipeline_mode<synchronous>, transform_indices = @transform_18, window_bounds = array<i64: 1, 128>}, {pipeline_mode = #tpu.pipeline_mode<synchronous>, transform_indices = @transform_19, window_bounds = array<i64: 128, 128>}, {pipeline_mode = #tpu.pipeline_mode<synchronous>, transform_indices = @transform_20, window_bounds = array<i64: 1, 128>}, {pipeline_mode = #tpu.pipeline_mode<synchronous>, transform_indices = @transform_21, window_bounds = array<i64: 128, 128>}, {pipeline_mode = #tpu.pipeline_mode<synchronous>, transform_indices = @transform_22, window_bounds = array<i64: 1, 128>}, {pipeline_mode = #tpu.pipeline_mode<synchronous>, transform_indices = @transform_23, window_bounds = array<i64: 1, 128>}, {pipeline_mode = #tpu.pipeline_mode<synchronous>, transform_indices = @transform_24, window_bounds = array<i64: 1, 128>}, {pipeline_mode = #tpu.pipeline_mode<synchronous>, transform_indices = @transform_25, window_bounds = array<i64: 1, 128>}, {pipeline_mode = #tpu.pipeline_mode<synchronous>, transform_indices = @transform_26, window_bounds = array<i64: 1, 128>}, {pipeline_mode = #tpu.pipeline_mode<synchronous>, transform_indices = @transform_27, window_bounds = array<i64: 128, 512>}, {pipeline_mode = #tpu.pipeline_mode<synchronous>, transform_indices = @transform_28, window_bounds = array<i64: 1, 512>}, {pipeline_mode = #tpu.pipeline_mode<synchronous>, transform_indices = @transform_29, window_bounds = array<i64: 512, 128>}, {pipeline_mode = #tpu.pipeline_mode<synchronous>, transform_indices = @transform_30, window_bounds = array<i64: 1, 128>}, {transform_indices = @transform_31, window_bounds = array<i64: 1, 8, 128>}]} {
    %c0 = arith.constant 0 : index
    %c0_0 = arith.constant 0 : index
    %c0_1 = arith.constant 0 : index
    %0 = vector.load %arg1[%c0, %c0_0, %c0_1] : memref<1x8x128xf32, #tpu.memory_space<vmem>>, vector<1x8x128xf32>
    %1 = vector.shape_cast %0 : vector<1x8x128xf32> to vector<8x128xf32>
    %c0_2 = arith.constant 0 : index
    %c0_3 = arith.constant 0 : index
    %c0_4 = arith.constant 0 : index
    %2 = vector.load %arg2[%c0_2, %c0_3, %c0_4] : memref<1x8x128xf32, #tpu.memory_space<vmem>>, vector<1x8x128xf32>
    %3 = vector.shape_cast %2 : vector<1x8x128xf32> to vector<8x128xf32>
    %c0_5 = arith.constant 0 : index
    %c0_6 = arith.constant 0 : index
    %c0_7 = arith.constant 0 : index
    %4 = vector.load %arg3[%c0_5, %c0_6, %c0_7] : memref<1x8x128xf32, #tpu.memory_space<vmem>>, vector<1x8x128xf32>
    %5 = vector.shape_cast %4 : vector<1x8x128xf32> to vector<8x128xf32>
    %c0_8 = arith.constant 0 : index
    %c0_9 = arith.constant 0 : index
    %c0_10 = arith.constant 0 : index
    %6 = vector.load %arg4[%c0_8, %c0_9, %c0_10] : memref<1x8x8xf32, #tpu.memory_space<vmem>>, vector<1x8x8xf32>
    %7 = vector.shape_cast %6 : vector<1x8x8xf32> to vector<8x8xf32>
    %c0_11 = arith.constant 0 : index
    %c0_12 = arith.constant 0 : index
    %c0_13 = arith.constant 0 : index
    %8 = vector.load %arg5[%c0_11, %c0_12, %c0_13] : memref<1x8x8xf32, #tpu.memory_space<vmem>>, vector<1x8x8xf32>
    %9 = vector.shape_cast %8 : vector<1x8x8xf32> to vector<8x8xf32>
    %10 = arith.truncf %1 : vector<8x128xf32> to vector<8x128xbf16>
    %c0_14 = arith.constant 0 : index
    %c0_15 = arith.constant 0 : index
    %11 = vector.load %arg6[%c0_14, %c0_15] : memref<128x128xbf16, #tpu.memory_space<vmem>>, vector<128x128xbf16>
    %cst = arith.constant dense<0.000000e+00> : vector<8x128xf32>
    %12 = tpu.matmul %10, %11, %cst {dimension_numbers = #tpu.dot_dimension_numbers<[1], [0], [0], [1], [0, 0, 1, 1], [], []>} : vector<8x128xbf16>, vector<128x128xbf16>, vector<8x128xf32> -> vector<8x128xf32>
    %c0_16 = arith.constant 0 : index
    %c0_17 = arith.constant 0 : index
    %13 = vector.load %arg7[%c0_16, %c0_17] : memref<1x128xf32, #tpu.memory_space<vmem>>, vector<1x128xf32>
    %14 = vector.broadcast %13 : vector<1x128xf32> to vector<8x128xf32>
    %15 = arith.addf %12, %14 : vector<8x128xf32>
    %16 = arith.truncf %1 : vector<8x128xf32> to vector<8x128xbf16>
    %c0_18 = arith.constant 0 : index
    %c0_19 = arith.constant 0 : index
    %17 = vector.load %arg8[%c0_18, %c0_19] : memref<128x128xbf16, #tpu.memory_space<vmem>>, vector<128x128xbf16>
    %cst_20 = arith.constant dense<0.000000e+00> : vector<8x128xf32>
    %18 = tpu.matmul %16, %17, %cst_20 {dimension_numbers = #tpu.dot_dimension_numbers<[1], [0], [0], [1], [0, 0, 1, 1], [], []>} : vector<8x128xbf16>, vector<128x128xbf16>, vector<8x128xf32> -> vector<8x128xf32>
    %c0_21 = arith.constant 0 : index
    %c0_22 = arith.constant 0 : index
    %19 = vector.load %arg9[%c0_21, %c0_22] : memref<1x128xf32, #tpu.memory_space<vmem>>, vector<1x128xf32>
    %20 = vector.broadcast %19 : vector<1x128xf32> to vector<8x128xf32>
    %21 = arith.addf %18, %20 : vector<8x128xf32>
    %22 = arith.truncf %1 : vector<8x128xf32> to vector<8x128xbf16>
    %c0_23 = arith.constant 0 : index
    %c0_24 = arith.constant 0 : index
    %23 = vector.load %arg10[%c0_23, %c0_24] : memref<128x128xbf16, #tpu.memory_space<vmem>>, vector<128x128xbf16>
    %cst_25 = arith.constant dense<0.000000e+00> : vector<8x128xf32>
    %24 = tpu.matmul %22, %23, %cst_25 {dimension_numbers = #tpu.dot_dimension_numbers<[1], [0], [0], [1], [0, 0, 1, 1], [], []>} : vector<8x128xbf16>, vector<128x128xbf16>, vector<8x128xf32> -> vector<8x128xf32>
    %c0_26 = arith.constant 0 : index
    %c0_27 = arith.constant 0 : index
    %25 = vector.load %arg11[%c0_26, %c0_27] : memref<1x128xf32, #tpu.memory_space<vmem>>, vector<1x128xf32>
    %26 = vector.broadcast %25 : vector<1x128xf32> to vector<8x128xf32>
    %27 = arith.addf %24, %26 : vector<8x128xf32>
    %cst_28 = arith.constant 0.0883883461 : f32
    %28 = vector.broadcast %cst_28 : f32 to vector<8x128xf32>
    %29 = arith.mulf %27, %28 : vector<8x128xf32>
    %30 = vector.shape_cast %29 : vector<8x128xf32> to vector<8x4x32xf32>
    %31 = tpu.transpose %30, [1, 0, 2] : vector<8x4x32xf32> -> vector<4x8x32xf32>
    %32 = arith.truncf %31 : vector<4x8x32xf32> to vector<4x8x32xbf16>
    %33 = vector.shape_cast %21 : vector<8x128xf32> to vector<8x4x32xf32>
    %34 = tpu.transpose %33, [1, 0, 2] : vector<8x4x32xf32> -> vector<4x8x32xf32>
    %35 = arith.truncf %34 : vector<4x8x32xf32> to vector<4x8x32xbf16>
    %36 = vector.shape_cast %15 : vector<8x128xf32> to vector<8x4x32xf32>
    %37 = tpu.transpose %36, [1, 0, 2] : vector<8x4x32xf32> -> vector<4x8x32xf32>
    %38 = arith.truncf %37 : vector<4x8x32xf32> to vector<4x8x32xbf16>
    "tpu.trace_start"() <{level = 10 : i32, message = "hqd,hkd->hqk"}> : () -> ()
    %cst_29 = arith.constant dense<0.000000e+00> : vector<4x8x8xf32>
    %39 = tpu.matmul %32, %35, %cst_29 {dimension_numbers = #tpu.dot_dimension_numbers<[2], [2], [1], [1], [0, 0, 0, 1, 1, 1], [0], [0]>} : vector<4x8x32xbf16>, vector<4x8x32xbf16>, vector<4x8x8xf32> -> vector<4x8x8xf32>
    "tpu.trace_stop"() : () -> ()
    %40 = vector.shape_cast %9 : vector<8x8xf32> to vector<1x8x8xf32>
    %41 = vector.broadcast %40 : vector<1x8x8xf32> to vector<4x8x8xf32>
    %42 = arith.addf %39, %41 : vector<4x8x8xf32>
    %cst_30 = arith.constant dense<0xFF800000> : vector<4x8xf32>
    %43 = vector.multi_reduction <maximumf>, %42, %cst_30 [2] : vector<4x8x8xf32> to vector<4x8xf32>
    %44 = vector.shape_cast %43 : vector<4x8xf32> to vector<4x8x1xf32>
    %45 = vector.broadcast %44 : vector<4x8x1xf32> to vector<4x8x8xf32>
    %46 = arith.subf %42, %45 : vector<4x8x8xf32>
    %47 = math.exp %46 : vector<4x8x8xf32>
    %cst_31 = arith.constant dense<0.000000e+00> : vector<4x8xf32>
    %48 = vector.multi_reduction <add>, %47, %cst_31 [2] : vector<4x8x8xf32> to vector<4x8xf32>
    %49 = vector.shape_cast %48 : vector<4x8xf32> to vector<4x8x1xf32>
    %50 = tpu.reciprocal %49 {approx = true} : vector<4x8x1xf32> -> vector<4x8x1xf32>
    %51 = vector.broadcast %50 : vector<4x8x1xf32> to vector<4x8x8xf32>
    %52 = arith.mulf %47, %51 : vector<4x8x8xf32>
    %53 = arith.truncf %52 : vector<4x8x8xf32> to vector<4x8x8xbf16>
    "tpu.trace_start"() <{level = 10 : i32, message = "hqk,hkd->hqd"}> : () -> ()
    %cst_32 = arith.constant dense<0.000000e+00> : vector<4x8x32xf32>
    %54 = tpu.matmul %53, %38, %cst_32 {dimension_numbers = #tpu.dot_dimension_numbers<[2], [1], [1], [2], [0, 0, 0, 1, 1, 2], [0], [0]>} : vector<4x8x8xbf16>, vector<4x8x32xbf16>, vector<4x8x32xf32> -> vector<4x8x32xf32>
    "tpu.trace_stop"() : () -> ()
    %55 = tpu.transpose %54, [1, 0, 2] : vector<4x8x32xf32> -> vector<8x4x32xf32>
    %56 = vector.shape_cast %55 : vector<8x4x32xf32> to vector<8x128xf32>
    %57 = arith.truncf %56 : vector<8x128xf32> to vector<8x128xbf16>
    %c0_33 = arith.constant 0 : index
    %c0_34 = arith.constant 0 : index
    %58 = vector.load %arg12[%c0_33, %c0_34] : memref<128x128xbf16, #tpu.memory_space<vmem>>, vector<128x128xbf16>
    %cst_35 = arith.constant dense<0.000000e+00> : vector<8x128xf32>
    %59 = tpu.matmul %57, %58, %cst_35 {dimension_numbers = #tpu.dot_dimension_numbers<[1], [0], [0], [1], [0, 0, 1, 1], [], []>} : vector<8x128xbf16>, vector<128x128xbf16>, vector<8x128xf32> -> vector<8x128xf32>
    %c0_36 = arith.constant 0 : index
    %c0_37 = arith.constant 0 : index
    %60 = vector.load %arg13[%c0_36, %c0_37] : memref<1x128xf32, #tpu.memory_space<vmem>>, vector<1x128xf32>
    %61 = vector.broadcast %60 : vector<1x128xf32> to vector<8x128xf32>
    %62 = arith.addf %59, %61 : vector<8x128xf32>
    %63 = arith.addf %62, %1 : vector<8x128xf32>
    %cst_38 = arith.constant dense<0.000000e+00> : vector<8xf32>
    %64 = vector.multi_reduction <add>, %63, %cst_38 [1] : vector<8x128xf32> to vector<8xf32>
    %65 = vector.shape_cast %64 : vector<8xf32> to vector<8x1xf32>
    %cst_39 = arith.constant 1.280000e+02 : f32
    %66 = vector.broadcast %cst_39 : f32 to vector<8x1xf32>
    %67 = arith.divf %65, %66 : vector<8x1xf32>
    %68 = vector.broadcast %67 : vector<8x1xf32> to vector<8x128xf32>
    %69 = arith.subf %63, %68 : vector<8x128xf32>
    %70 = arith.mulf %69, %69 : vector<8x128xf32>
    %cst_40 = arith.constant dense<0.000000e+00> : vector<8xf32>
    %71 = vector.multi_reduction <add>, %70, %cst_40 [1] : vector<8x128xf32> to vector<8xf32>
    %72 = vector.shape_cast %71 : vector<8xf32> to vector<8x1xf32>
    %cst_41 = arith.constant 1.280000e+02 : f32
    %73 = vector.broadcast %cst_41 : f32 to vector<8x1xf32>
    %74 = arith.divf %72, %73 : vector<8x1xf32>
    %75 = vector.broadcast %67 : vector<8x1xf32> to vector<8x128xf32>
    %76 = arith.subf %63, %75 : vector<8x128xf32>
    %cst_42 = arith.constant 9.99999974E-6 : f32
    %77 = vector.broadcast %cst_42 : f32 to vector<8x1xf32>
    %78 = arith.addf %74, %77 : vector<8x1xf32>
    %79 = math.rsqrt %78 : vector<8x1xf32>
    %80 = vector.broadcast %79 : vector<8x1xf32> to vector<8x128xf32>
    %81 = arith.mulf %76, %80 : vector<8x128xf32>
    %c0_43 = arith.constant 0 : index
    %c0_44 = arith.constant 0 : index
    %82 = vector.load %arg14[%c0_43, %c0_44] : memref<1x128xf32, #tpu.memory_space<vmem>>, vector<1x128xf32>
    %83 = vector.broadcast %82 : vector<1x128xf32> to vector<8x128xf32>
    %84 = arith.mulf %81, %83 : vector<8x128xf32>
    %c0_45 = arith.constant 0 : index
    %c0_46 = arith.constant 0 : index
    %85 = vector.load %arg15[%c0_45, %c0_46] : memref<1x128xf32, #tpu.memory_space<vmem>>, vector<1x128xf32>
    %86 = vector.broadcast %85 : vector<1x128xf32> to vector<8x128xf32>
    %87 = arith.addf %84, %86 : vector<8x128xf32>
    %88 = arith.truncf %3 : vector<8x128xf32> to vector<8x128xbf16>
    %c0_47 = arith.constant 0 : index
    %c0_48 = arith.constant 0 : index
    %89 = vector.load %arg16[%c0_47, %c0_48] : memref<128x128xbf16, #tpu.memory_space<vmem>>, vector<128x128xbf16>
    %cst_49 = arith.constant dense<0.000000e+00> : vector<8x128xf32>
    %90 = tpu.matmul %88, %89, %cst_49 {dimension_numbers = #tpu.dot_dimension_numbers<[1], [0], [0], [1], [0, 0, 1, 1], [], []>} : vector<8x128xbf16>, vector<128x128xbf16>, vector<8x128xf32> -> vector<8x128xf32>
    %c0_50 = arith.constant 0 : index
    %c0_51 = arith.constant 0 : index
    %91 = vector.load %arg17[%c0_50, %c0_51] : memref<1x128xf32, #tpu.memory_space<vmem>>, vector<1x128xf32>
    %92 = vector.broadcast %91 : vector<1x128xf32> to vector<8x128xf32>
    %93 = arith.addf %90, %92 : vector<8x128xf32>
    %94 = arith.truncf %5 : vector<8x128xf32> to vector<8x128xbf16>
    %c0_52 = arith.constant 0 : index
    %c0_53 = arith.constant 0 : index
    %95 = vector.load %arg18[%c0_52, %c0_53] : memref<128x128xbf16, #tpu.memory_space<vmem>>, vector<128x128xbf16>
    %cst_54 = arith.constant dense<0.000000e+00> : vector<8x128xf32>
    %96 = tpu.matmul %94, %95, %cst_54 {dimension_numbers = #tpu.dot_dimension_numbers<[1], [0], [0], [1], [0, 0, 1, 1], [], []>} : vector<8x128xbf16>, vector<128x128xbf16>, vector<8x128xf32> -> vector<8x128xf32>
    %c0_55 = arith.constant 0 : index
    %c0_56 = arith.constant 0 : index
    %97 = vector.load %arg19[%c0_55, %c0_56] : memref<1x128xf32, #tpu.memory_space<vmem>>, vector<1x128xf32>
    %98 = vector.broadcast %97 : vector<1x128xf32> to vector<8x128xf32>
    %99 = arith.addf %96, %98 : vector<8x128xf32>
    %100 = arith.truncf %87 : vector<8x128xf32> to vector<8x128xbf16>
    %c0_57 = arith.constant 0 : index
    %c0_58 = arith.constant 0 : index
    %101 = vector.load %arg20[%c0_57, %c0_58] : memref<128x128xbf16, #tpu.memory_space<vmem>>, vector<128x128xbf16>
    %cst_59 = arith.constant dense<0.000000e+00> : vector<8x128xf32>
    %102 = tpu.matmul %100, %101, %cst_59 {dimension_numbers = #tpu.dot_dimension_numbers<[1], [0], [0], [1], [0, 0, 1, 1], [], []>} : vector<8x128xbf16>, vector<128x128xbf16>, vector<8x128xf32> -> vector<8x128xf32>
    %c0_60 = arith.constant 0 : index
    %c0_61 = arith.constant 0 : index
    %103 = vector.load %arg21[%c0_60, %c0_61] : memref<1x128xf32, #tpu.memory_space<vmem>>, vector<1x128xf32>
    %104 = vector.broadcast %103 : vector<1x128xf32> to vector<8x128xf32>
    %105 = arith.addf %102, %104 : vector<8x128xf32>
    %cst_62 = arith.constant 0.0883883461 : f32
    %106 = vector.broadcast %cst_62 : f32 to vector<8x128xf32>
    %107 = arith.mulf %105, %106 : vector<8x128xf32>
    %108 = vector.shape_cast %107 : vector<8x128xf32> to vector<8x4x32xf32>
    %109 = tpu.transpose %108, [1, 0, 2] : vector<8x4x32xf32> -> vector<4x8x32xf32>
    %110 = arith.truncf %109 : vector<4x8x32xf32> to vector<4x8x32xbf16>
    %111 = vector.shape_cast %99 : vector<8x128xf32> to vector<8x4x32xf32>
    %112 = tpu.transpose %111, [1, 0, 2] : vector<8x4x32xf32> -> vector<4x8x32xf32>
    %113 = arith.truncf %112 : vector<4x8x32xf32> to vector<4x8x32xbf16>
    %114 = vector.shape_cast %93 : vector<8x128xf32> to vector<8x4x32xf32>
    %115 = tpu.transpose %114, [1, 0, 2] : vector<8x4x32xf32> -> vector<4x8x32xf32>
    %116 = arith.truncf %115 : vector<4x8x32xf32> to vector<4x8x32xbf16>
    "tpu.trace_start"() <{level = 10 : i32, message = "hqd,hkd->hqk"}> : () -> ()
    %cst_63 = arith.constant dense<0.000000e+00> : vector<4x8x8xf32>
    %117 = tpu.matmul %110, %113, %cst_63 {dimension_numbers = #tpu.dot_dimension_numbers<[2], [2], [1], [1], [0, 0, 0, 1, 1, 1], [0], [0]>} : vector<4x8x32xbf16>, vector<4x8x32xbf16>, vector<4x8x8xf32> -> vector<4x8x8xf32>
    "tpu.trace_stop"() : () -> ()
    %118 = vector.shape_cast %7 : vector<8x8xf32> to vector<1x8x8xf32>
    %119 = vector.broadcast %118 : vector<1x8x8xf32> to vector<4x8x8xf32>
    %120 = arith.addf %117, %119 : vector<4x8x8xf32>
    %cst_64 = arith.constant dense<0xFF800000> : vector<4x8xf32>
    %121 = vector.multi_reduction <maximumf>, %120, %cst_64 [2] : vector<4x8x8xf32> to vector<4x8xf32>
    %122 = vector.shape_cast %121 : vector<4x8xf32> to vector<4x8x1xf32>
    %123 = vector.broadcast %122 : vector<4x8x1xf32> to vector<4x8x8xf32>
    %124 = arith.subf %120, %123 : vector<4x8x8xf32>
    %125 = math.exp %124 : vector<4x8x8xf32>
    %cst_65 = arith.constant dense<0.000000e+00> : vector<4x8xf32>
    %126 = vector.multi_reduction <add>, %125, %cst_65 [2] : vector<4x8x8xf32> to vector<4x8xf32>
    %127 = vector.shape_cast %126 : vector<4x8xf32> to vector<4x8x1xf32>
    %128 = tpu.reciprocal %127 {approx = true} : vector<4x8x1xf32> -> vector<4x8x1xf32>
    %129 = vector.broadcast %128 : vector<4x8x1xf32> to vector<4x8x8xf32>
    %130 = arith.mulf %125, %129 : vector<4x8x8xf32>
    %131 = arith.truncf %130 : vector<4x8x8xf32> to vector<4x8x8xbf16>
    "tpu.trace_start"() <{level = 10 : i32, message = "hqk,hkd->hqd"}> : () -> ()
    %cst_66 = arith.constant dense<0.000000e+00> : vector<4x8x32xf32>
    %132 = tpu.matmul %131, %116, %cst_66 {dimension_numbers = #tpu.dot_dimension_numbers<[2], [1], [1], [2], [0, 0, 0, 1, 1, 2], [0], [0]>} : vector<4x8x8xbf16>, vector<4x8x32xbf16>, vector<4x8x32xf32> -> vector<4x8x32xf32>
    "tpu.trace_stop"() : () -> ()
    %133 = tpu.transpose %132, [1, 0, 2] : vector<4x8x32xf32> -> vector<8x4x32xf32>
    %134 = vector.shape_cast %133 : vector<8x4x32xf32> to vector<8x128xf32>
    %135 = arith.truncf %134 : vector<8x128xf32> to vector<8x128xbf16>
    %c0_67 = arith.constant 0 : index
    %c0_68 = arith.constant 0 : index
    %136 = vector.load %arg22[%c0_67, %c0_68] : memref<128x128xbf16, #tpu.memory_space<vmem>>, vector<128x128xbf16>
    %cst_69 = arith.constant dense<0.000000e+00> : vector<8x128xf32>
    %137 = tpu.matmul %135, %136, %cst_69 {dimension_numbers = #tpu.dot_dimension_numbers<[1], [0], [0], [1], [0, 0, 1, 1], [], []>} : vector<8x128xbf16>, vector<128x128xbf16>, vector<8x128xf32> -> vector<8x128xf32>
    %c0_70 = arith.constant 0 : index
    %c0_71 = arith.constant 0 : index
    %138 = vector.load %arg23[%c0_70, %c0_71] : memref<1x128xf32, #tpu.memory_space<vmem>>, vector<1x128xf32>
    %139 = vector.broadcast %138 : vector<1x128xf32> to vector<8x128xf32>
    %140 = arith.addf %137, %139 : vector<8x128xf32>
    %141 = arith.addf %140, %87 : vector<8x128xf32>
    %cst_72 = arith.constant dense<0.000000e+00> : vector<8xf32>
    %142 = vector.multi_reduction <add>, %141, %cst_72 [1] : vector<8x128xf32> to vector<8xf32>
    %143 = vector.shape_cast %142 : vector<8xf32> to vector<8x1xf32>
    %cst_73 = arith.constant 1.280000e+02 : f32
    %144 = vector.broadcast %cst_73 : f32 to vector<8x1xf32>
    %145 = arith.divf %143, %144 : vector<8x1xf32>
    %146 = vector.broadcast %145 : vector<8x1xf32> to vector<8x128xf32>
    %147 = arith.subf %141, %146 : vector<8x128xf32>
    %148 = arith.mulf %147, %147 : vector<8x128xf32>
    %cst_74 = arith.constant dense<0.000000e+00> : vector<8xf32>
    %149 = vector.multi_reduction <add>, %148, %cst_74 [1] : vector<8x128xf32> to vector<8xf32>
    %150 = vector.shape_cast %149 : vector<8xf32> to vector<8x1xf32>
    %cst_75 = arith.constant 1.280000e+02 : f32
    %151 = vector.broadcast %cst_75 : f32 to vector<8x1xf32>
    %152 = arith.divf %150, %151 : vector<8x1xf32>
    %153 = vector.broadcast %145 : vector<8x1xf32> to vector<8x128xf32>
    %154 = arith.subf %141, %153 : vector<8x128xf32>
    %cst_76 = arith.constant 9.99999974E-6 : f32
    %155 = vector.broadcast %cst_76 : f32 to vector<8x1xf32>
    %156 = arith.addf %152, %155 : vector<8x1xf32>
    %157 = math.rsqrt %156 : vector<8x1xf32>
    %158 = vector.broadcast %157 : vector<8x1xf32> to vector<8x128xf32>
    %159 = arith.mulf %154, %158 : vector<8x128xf32>
    %c0_77 = arith.constant 0 : index
    %c0_78 = arith.constant 0 : index
    %160 = vector.load %arg24[%c0_77, %c0_78] : memref<1x128xf32, #tpu.memory_space<vmem>>, vector<1x128xf32>
    %161 = vector.broadcast %160 : vector<1x128xf32> to vector<8x128xf32>
    %162 = arith.mulf %159, %161 : vector<8x128xf32>
    %c0_79 = arith.constant 0 : index
    %c0_80 = arith.constant 0 : index
    %163 = vector.load %arg25[%c0_79, %c0_80] : memref<1x128xf32, #tpu.memory_space<vmem>>, vector<1x128xf32>
    %164 = vector.broadcast %163 : vector<1x128xf32> to vector<8x128xf32>
    %165 = arith.addf %162, %164 : vector<8x128xf32>
    %166 = arith.truncf %165 : vector<8x128xf32> to vector<8x128xbf16>
    %c0_81 = arith.constant 0 : index
    %c0_82 = arith.constant 0 : index
    %167 = vector.load %arg28[%c0_81, %c0_82] : memref<128x512xbf16, #tpu.memory_space<vmem>>, vector<128x512xbf16>
    %cst_83 = arith.constant dense<0.000000e+00> : vector<8x512xf32>
    %168 = tpu.matmul %166, %167, %cst_83 {dimension_numbers = #tpu.dot_dimension_numbers<[1], [0], [0], [1], [0, 0, 1, 1], [], []>} : vector<8x128xbf16>, vector<128x512xbf16>, vector<8x512xf32> -> vector<8x512xf32>
    %c0_84 = arith.constant 0 : index
    %c0_85 = arith.constant 0 : index
    %169 = vector.load %arg29[%c0_84, %c0_85] : memref<1x512xf32, #tpu.memory_space<vmem>>, vector<1x512xf32>
    %170 = vector.broadcast %169 : vector<1x512xf32> to vector<8x512xf32>
    %171 = arith.addf %168, %170 : vector<8x512xf32>
    %cst_86 = arith.constant 0.000000e+00 : f32
    %172 = vector.broadcast %cst_86 : f32 to vector<8x512xf32>
    %173 = arith.maximumf %171, %172 : vector<8x512xf32>
    %174 = arith.truncf %173 : vector<8x512xf32> to vector<8x512xbf16>
    %c0_87 = arith.constant 0 : index
    %c0_88 = arith.constant 0 : index
    %175 = vector.load %arg30[%c0_87, %c0_88] : memref<512x128xbf16, #tpu.memory_space<vmem>>, vector<512x128xbf16>
    %cst_89 = arith.constant dense<0.000000e+00> : vector<8x128xf32>
    %176 = tpu.matmul %174, %175, %cst_89 {dimension_numbers = #tpu.dot_dimension_numbers<[1], [0], [0], [1], [0, 0, 1, 1], [], []>} : vector<8x512xbf16>, vector<512x128xbf16>, vector<8x128xf32> -> vector<8x128xf32>
    %c0_90 = arith.constant 0 : index
    %c0_91 = arith.constant 0 : index
    %177 = vector.load %arg31[%c0_90, %c0_91] : memref<1x128xf32, #tpu.memory_space<vmem>>, vector<1x128xf32>
    %178 = vector.broadcast %177 : vector<1x128xf32> to vector<8x128xf32>
    %179 = arith.addf %176, %178 : vector<8x128xf32>
    %180 = arith.addf %179, %165 : vector<8x128xf32>
    %cst_92 = arith.constant dense<0.000000e+00> : vector<8xf32>
    %181 = vector.multi_reduction <add>, %180, %cst_92 [1] : vector<8x128xf32> to vector<8xf32>
    %182 = vector.shape_cast %181 : vector<8xf32> to vector<8x1xf32>
    %cst_93 = arith.constant 1.280000e+02 : f32
    %183 = vector.broadcast %cst_93 : f32 to vector<8x1xf32>
    %184 = arith.divf %182, %183 : vector<8x1xf32>
    %185 = vector.broadcast %184 : vector<8x1xf32> to vector<8x128xf32>
    %186 = arith.subf %180, %185 : vector<8x128xf32>
    %187 = arith.mulf %186, %186 : vector<8x128xf32>
    %cst_94 = arith.constant dense<0.000000e+00> : vector<8xf32>
    %188 = vector.multi_reduction <add>, %187, %cst_94 [1] : vector<8x128xf32> to vector<8xf32>
    %189 = vector.shape_cast %188 : vector<8xf32> to vector<8x1xf32>
    %cst_95 = arith.constant 1.280000e+02 : f32
    %190 = vector.broadcast %cst_95 : f32 to vector<8x1xf32>
    %191 = arith.divf %189, %190 : vector<8x1xf32>
    %192 = vector.broadcast %184 : vector<8x1xf32> to vector<8x128xf32>
    %193 = arith.subf %180, %192 : vector<8x128xf32>
    %cst_96 = arith.constant 9.99999974E-6 : f32
    %194 = vector.broadcast %cst_96 : f32 to vector<8x1xf32>
    %195 = arith.addf %191, %194 : vector<8x1xf32>
    %196 = math.rsqrt %195 : vector<8x1xf32>
    %197 = vector.broadcast %196 : vector<8x1xf32> to vector<8x128xf32>
    %198 = arith.mulf %193, %197 : vector<8x128xf32>
    %c0_97 = arith.constant 0 : index
    %c0_98 = arith.constant 0 : index
    %199 = vector.load %arg26[%c0_97, %c0_98] : memref<1x128xf32, #tpu.memory_space<vmem>>, vector<1x128xf32>
    %200 = vector.broadcast %199 : vector<1x128xf32> to vector<8x128xf32>
    %201 = arith.mulf %198, %200 : vector<8x128xf32>
    %c0_99 = arith.constant 0 : index
    %c0_100 = arith.constant 0 : index
    %202 = vector.load %arg27[%c0_99, %c0_100] : memref<1x128xf32, #tpu.memory_space<vmem>>, vector<1x128xf32>
    %203 = vector.broadcast %202 : vector<1x128xf32> to vector<8x128xf32>
    %204 = arith.addf %201, %203 : vector<8x128xf32>
    %c0_101 = arith.constant 0 : index
    %c0_102 = arith.constant 0 : index
    %c0_103 = arith.constant 0 : index
    %205 = vector.load %arg32[%c0_101, %c0_102, %c0_103] : memref<1x8x128xf32, #tpu.memory_space<vmem>>, vector<1x8x128xf32>
    %206 = vector.shape_cast %205 : vector<1x8x128xf32> to vector<8x128xf32>
    %207 = vector.shape_cast %204 : vector<8x128xf32> to vector<1x8x128xf32>
    tpu.vector_store %arg32[%c0_101, %c0_102, %c0_103], %207 {strides = array<i32>} : memref<1x8x128xf32, #tpu.memory_space<vmem>>, vector<1x8x128xf32>,
    return
  }
  func.func @transform_0(%arg0: i32) -> (i32, i32, i32) {
    %c0_i32 = arith.constant 0 : i32
    %c0_i32_0 = arith.constant 0 : i32
    %c0_i32_1 = arith.constant 0 : i32
    return %arg0, %c0_i32, %c0_i32_0 : i32, i32, i32
  }
  func.func @transform_1(%arg0: i32) -> (i32, i32, i32) {
    %c0_i32 = arith.constant 0 : i32
    %c0_i32_0 = arith.constant 0 : i32
    %c0_i32_1 = arith.constant 0 : i32
    return %arg0, %c0_i32, %c0_i32_0 : i32, i32, i32
  }
  func.func @transform_2(%arg0: i32) -> (i32, i32, i32) {
    %c0_i32 = arith.constant 0 : i32
    %c0_i32_0 = arith.constant 0 : i32
    %c0_i32_1 = arith.constant 0 : i32
    return %arg0, %c0_i32, %c0_i32_0 : i32, i32, i32
  }
  func.func @transform_3(%arg0: i32) -> (i32, i32, i32) {
    %c0_i32 = arith.constant 0 : i32
    %c0_i32_0 = arith.constant 0 : i32
    %c0_i32_1 = arith.constant 0 : i32
    return %arg0, %c0_i32, %c0_i32_0 : i32, i32, i32
  }
  func.func @transform_4(%arg0: i32) -> (i32, i32, i32) {
    %c0_i32 = arith.constant 0 : i32
    %c0_i32_0 = arith.constant 0 : i32
    %c0_i32_1 = arith.constant 0 : i32
    return %arg0, %c0_i32, %c0_i32_0 : i32, i32, i32
  }
  func.func @transform_5(%arg0: i32) -> (i32, i32) {
    %c0_i32 = arith.constant 0 : i32
    %c0_i32_0 = arith.constant 0 : i32
    %c0_i32_1 = arith.constant 0 : i32
    return %c0_i32, %c0_i32_0 : i32, i32
  }
  func.func @transform_6(%arg0: i32) -> (i32, i32) {
    %c0_i32 = arith.constant 0 : i32
    %c0_i32_0 = arith.constant 0 : i32
    %c0_i32_1 = arith.constant 0 : i32
    return %c0_i32, %c0_i32_0 : i32, i32
  }
  func.func @transform_7(%arg0: i32) -> (i32, i32) {
    %c0_i32 = arith.constant 0 : i32
    %c0_i32_0 = arith.constant 0 : i32
    %c0_i32_1 = arith.constant 0 : i32
    return %c0_i32, %c0_i32_0 : i32, i32
  }
  func.func @transform_8(%arg0: i32) -> (i32, i32) {
    %c0_i32 = arith.constant 0 : i32
    %c0_i32_0 = arith.constant 0 : i32
    %c0_i32_1 = arith.constant 0 : i32
    return %c0_i32, %c0_i32_0 : i32, i32
  }
  func.func @transform_9(%arg0: i32) -> (i32, i32) {
    %c0_i32 = arith.constant 0 : i32
    %c0_i32_0 = arith.constant 0 : i32
    %c0_i32_1 = arith.constant 0 : i32
    return %c0_i32, %c0_i32_0 : i32, i32
  }
  func.func @transform_10(%arg0: i32) -> (i32, i32) {
    %c0_i32 = arith.constant 0 : i32
    %c0_i32_0 = arith.constant 0 : i32
    %c0_i32_1 = arith.constant 0 : i32
    return %c0_i32, %c0_i32_0 : i32, i32
  }
  func.func @transform_11(%arg0: i32) -> (i32, i32) {
    %c0_i32 = arith.constant 0 : i32
    %c0_i32_0 = arith.constant 0 : i32
    %c0_i32_1 = arith.constant 0 : i32
    return %c0_i32, %c0_i32_0 : i32, i32
  }
  func.func @transform_12(%arg0: i32) -> (i32, i32) {
    %c0_i32 = arith.constant 0 : i32
    %c0_i32_0 = arith.constant 0 : i32
    %c0_i32_1 = arith.constant 0 : i32
    return %c0_i32, %c0_i32_0 : i32, i32
  }
  func.func @transform_13(%arg0: i32) -> (i32, i32) {
    %c0_i32 = arith.constant 0 : i32
    %c0_i32_0 = arith.constant 0 : i32
    %c0_i32_1 = arith.constant 0 : i32
    return %c0_i32, %c0_i32_0 : i32, i32
  }
  func.func @transform_14(%arg0: i32) -> (i32, i32) {
    %c0_i32 = arith.constant 0 : i32
    %c0_i32_0 = arith.constant 0 : i32
    %c0_i32_1 = arith.constant 0 : i32
    return %c0_i32, %c0_i32_0 : i32, i32
  }
  func.func @transform_15(%arg0: i32) -> (i32, i32) {
    %c0_i32 = arith.constant 0 : i32
    %c0_i32_0 = arith.constant 0 : i32
    %c0_i32_1 = arith.constant 0 : i32
    return %c0_i32, %c0_i32_0 : i32, i32
  }
  func.func @transform_16(%arg0: i32) -> (i32, i32) {
    %c0_i32 = arith.constant 0 : i32
    %c0_i32_0 = arith.constant 0 : i32
    %c0_i32_1 = arith.constant 0 : i32
    return %c0_i32, %c0_i32_0 : i32, i32
  }
  func.func @transform_17(%arg0: i32) -> (i32, i32) {
    %c0_i32 = arith.constant 0 : i32
    %c0_i32_0 = arith.constant 0 : i32
    %c0_i32_1 = arith.constant 0 : i32
    return %c0_i32, %c0_i32_0 : i32, i32
  }
  func.func @transform_18(%arg0: i32) -> (i32, i32) {
    %c0_i32 = arith.constant 0 : i32
    %c0_i32_0 = arith.constant 0 : i32
    %c0_i32_1 = arith.constant 0 : i32
    return %c0_i32, %c0_i32_0 : i32, i32
  }
  func.func @transform_19(%arg0: i32) -> (i32, i32) {
    %c0_i32 = arith.constant 0 : i32
    %c0_i32_0 = arith.constant 0 : i32
    %c0_i32_1 = arith.constant 0 : i32
    return %c0_i32, %c0_i32_0 : i32, i32
  }
  func.func @transform_20(%arg0: i32) -> (i32, i32) {
    %c0_i32 = arith.constant 0 : i32
    %c0_i32_0 = arith.constant 0 : i32
    %c0_i32_1 = arith.constant 0 : i32
    return %c0_i32, %c0_i32_0 : i32, i32
  }
  func.func @transform_21(%arg0: i32) -> (i32, i32) {
    %c0_i32 = arith.constant 0 : i32
    %c0_i32_0 = arith.constant 0 : i32
    %c0_i32_1 = arith.constant 0 : i32
    return %c0_i32, %c0_i32_0 : i32, i32
  }
  func.func @transform_22(%arg0: i32) -> (i32, i32) {
    %c0_i32 = arith.constant 0 : i32
    %c0_i32_0 = arith.constant 0 : i32
    %c0_i32_1 = arith.constant 0 : i32
    return %c0_i32, %c0_i32_0 : i32, i32
  }
  func.func @transform_23(%arg0: i32) -> (i32, i32) {
    %c0_i32 = arith.constant 0 : i32
    %c0_i32_0 = arith.constant 0 : i32
    %c0_i32_1 = arith.constant 0 : i32
    return %c0_i32, %c0_i32_0 : i32, i32
  }
  func.func @transform_24(%arg0: i32) -> (i32, i32) {
    %c0_i32 = arith.constant 0 : i32
    %c0_i32_0 = arith.constant 0 : i32
    %c0_i32_1 = arith.constant 0 : i32
    return %c0_i32, %c0_i32_0 : i32, i32
  }
  func.func @transform_25(%arg0: i32) -> (i32, i32) {
    %c0_i32 = arith.constant 0 : i32
    %c0_i32_0 = arith.constant 0 : i32
    %c0_i32_1 = arith.constant 0 : i32
    return %c0_i32, %c0_i32_0 : i32, i32
  }
  func.func @transform_26(%arg0: i32) -> (i32, i32) {
    %c0_i32 = arith.constant 0 : i32
    %c0_i32_0 = arith.constant 0 : i32
    %c0_i32_1 = arith.constant 0 : i32
    return %c0_i32, %c0_i32_0 : i32, i32
  }
  func.func @transform_27(%arg0: i32) -> (i32, i32) {
    %c0_i32 = arith.constant 0 : i32
    %c0_i32_0 = arith.constant 0 : i32
    %c0_i32_1 = arith.constant 0 : i32
    return %c0_i32, %c0_i32_0 : i32, i32
  }
  func.func @transform_28(%arg0: i32) -> (i32, i32) {
    %c0_i32 = arith.constant 0 : i32
    %c0_i32_0 = arith.constant 0 : i32
    %c0_i32_1 = arith.constant 0 : i32
    return %c0_i32, %c0_i32_0 : i32, i32
  }
  func.func @transform_29(%arg0: i32) -> (i32, i32) {
    %c0_i32 = arith.constant 0 : i32
    %c0_i32_0 = arith.constant 0 : i32
    %c0_i32_1 = arith.constant 0 : i32
    return %c0_i32, %c0_i32_0 : i32, i32
  }
  func.func @transform_30(%arg0: i32) -> (i32, i32) {
    %c0_i32 = arith.constant 0 : i32
    %c0_i32_0 = arith.constant 0 : i32
    %c0_i32_1 = arith.constant 0 : i32
    return %c0_i32, %c0_i32_0 : i32, i32
  }
  func.func @transform_31(%arg0: i32) -> (i32, i32, i32) {
    %c0_i32 = arith.constant 0 : i32
    %c0_i32_0 = arith.constant 0 : i32
    %c0_i32_1 = arith.constant 0 : i32
    return %arg0, %c0_i32, %c0_i32_0 : i32, i32, i32
  }
}

</mosaic_0001>

<bundles_post_ra>
// kernel: tpu_custom_call.1
= control target key start
LH: loop header
LB: loop body
LE: loop exit
PB: predicated region body
PF: predicated region fallthrough
CT: control target
= control target key end

     0   :  { %s7223_s6 = smov 1   ;;  %s7224_s10 = smov 2   ;;  %s8410_s0 = inlined_call_operand.smem [shape: u32[32], index: -1, kind: input, shape index: {}] }
   0x1   :  { %s7297_s5 = sld [smem:[%s8410_s0]]   ;;  %s7225_s14 = smov 3  }
   0x2   :  { %s7302_s9 = sld [smem:[%s8410_s0 + %s7223_s6]]   ;;  %s7226_s18 = smov 4  }
   0x3   :  { %s7307_s13 = sld [smem:[%s8410_s0 + %s7224_s10]]   ;;  %s7227_s22 = smov 5  }
   0x4   :  { %s7312_s17 = sld [smem:[%s8410_s0 + %s7225_s14]]   ;;  %s7228_s26 = smov 6  }
   0x5   :  { %s7317_s21 = sld [smem:[%s8410_s0 + %s7226_s18]]   ;;  %s7229_s30 = smov 7  }
   0x6   :  { %s7322_s25 = sld [smem:[%s8410_s0 + %s7227_s22]]   ;;  %s7230_s4 = smov 8  }
   0x7   :  { %8455 = sst [smem:[#allocation51_spill]] %s7297_s5  ;;  %s7231_s10 = smov 9  }
   0x8   :  { %8456 = sst [smem:[#allocation52_spill]] %s7302_s9  ;;  %s7232_s15 = smov 10  }
   0x9   :  { %8457 = sst [smem:[#allocation53_spill]] %s7307_s13  ;;  %s7233_s20 = smov 11  }
   0xa   :  { %8458 = sst [smem:[#allocation54_spill]] %s7312_s17  ;;  %s7235_s1 = smov 13  }
   0xb   :  { %8459 = sst [smem:[#allocation55_spill]] %s7317_s21  ;;  %s7236_s7 = smov 14  }
   0xc   :  { %8460 = sst [smem:[#allocation56_spill]] %s7322_s25  ;;  %s7238_s22 = smov 16  }
   0xd   :  { %s7327_s29 = sld [smem:[%s8410_s0 + %s7228_s26]]   ;;  %s7234_s26 = smov 12  }
   0xe   :  { %s7332_s3 = sld [smem:[%s8410_s0 + %s7229_s30]]   ;;  %s7239_s28 = smov 17  }
   0xf   :  { %s7337_s8 = sld [smem:[%s8410_s0 + %s7230_s4]]  }
  0x10   :  { %s7342_s14 = sld [smem:[%s8410_s0 + %s7231_s10]]  }
  0x11   :  { %s7347_s19 = sld [smem:[%s8410_s0 + %s7232_s15]]   ;;  %s7237_s15 = smov 15  }
  0x12   :  { %s7352_s24 = sld [smem:[%s8410_s0 + %s7233_s20]]  }
  0x13   :  { %s7357_s30 = sld [smem:[%s8410_s0 + %s7234_s26]]  }
  0x14   :  { %8461 = sst [smem:[#allocation57_spill]] %s7332_s3 }
  0x15   :  { %8462 = sst [smem:[#allocation58_spill]] %s7337_s8 }
  0x16   :  { %8463 = sst [smem:[#allocation59_spill]] %s7342_s14 }
  0x17   :  { %s7362_s6 = sld [smem:[%s8410_s0 + %s7235_s1]]  }
  0x18   :  { %8464 = sst [smem:[#allocation60_spill]] %s7352_s24 }
  0x19   :  { %s7367_s12 = sld [smem:[%s8410_s0 + %s7236_s7]]   ;;  %s7240_s7 = smov 18  }
  0x1a   :  { %s7372_s20 = sld [smem:[%s8410_s0 + %s7237_s15]]   ;;  %s7241_s15 = smov 19  }
  0x1b   :  { %s7377_s27 = sld [smem:[%s8410_s0 + %s7238_s22]]   ;;  %s7242_s22 = smov 20  }
  0x1c   :  { %s7382_s4 = sld [smem:[%s8410_s0 + %s7239_s28]]   ;;  %s7243_s28 = smov 21  }
  0x1d   :  { %8465 = sst [smem:[#allocation61_spill]] %s7362_s6 }
  0x1e   :  { %s7387_s21 = sld [smem:[%s8410_s0 + %s7240_s7]]   ;;  %s7244_s7 = smov 22  }
  0x1f   :  { %8466 = sst [smem:[#allocation62_spill]] %s7367_s12 }
  0x20   :  { %8467 = sst [smem:[#allocation63_spill]] %s7372_s20 }
  0x21   :  { %8468 = sst [smem:[#allocation64_spill]] %s7377_s27 }
  0x22   :  { %8469 = sst [smem:[#allocation65_spill]] %s7382_s4 }
  0x23   :  { %s7392_s13 = sld [smem:[%s8410_s0 + %s7241_s15]]   ;;  %s7245_s15 = smov 23  }
  0x24   :  { %8470 = sst [smem:[#allocation66_spill]] %s7387_s21 }
  0x25   :  { %s7397_s5 = sld [smem:[%s8410_s0 + %s7242_s22]]   ;;  %s7246_s22 = smov 24  }
  0x26   :  { %s7402_s4 = sld [smem:[%s8410_s0 + %s7243_s28]]   ;;  %s7247_s28 = smov 25  }
  0x27   :  { %s7407_s27 = sld [smem:[%s8410_s0 + %s7244_s7]]   ;;  %s7248_s7 = smov 26  }
  0x28   :  { %s7422_s12 = sld [smem:[%s8410_s0 + %s7247_s28]]   ;;  %s7251_s28 = smov 29  }
  0x29   :  { %8471 = sst [smem:[#allocation67_spill]] %s7392_s13 }
  0x2a   :  { %s7412_s13 = sld [smem:[%s8410_s0 + %s7245_s15]]   ;;  %s7249_s15 = smov 27  }
  0x2b   :  { %8472 = sst [smem:[#allocation68_spill]] %s7397_s5 }
  0x2c   :  { %8473 = sst [smem:[#allocation69_spill]] %s7402_s4 }
  0x2d   :  { %8474 = sst [smem:[#allocation70_spill]] %s7407_s27 }
  0x2e   :  { %s7417_s5 = sld [smem:[%s8410_s0 + %s7246_s22]]   ;;  %s7250_s22 = smov 28  }
  0x2f   :  { %8477 = sst [smem:[#allocation73_spill]] %s7422_s12 }
  0x30   :  { %8475 = sst [smem:[#allocation71_spill]] %s7412_s13 }
  0x31   :  { %s7427_s27 = sld [smem:[%s8410_s0 + %s7248_s7]]   ;;  %s7252_s7 = smov 30  }
  0x32   :  { %s7432_s13 = sld [smem:[%s8410_s0 + %s7249_s15]]   ;;  %s7253_s15 = smov 31  }
  0x33   :  { %s7442_s12 = sld [smem:[%s8410_s0 + %s7251_s28]]  }
  0x34   :  { %8476 = sst [smem:[#allocation72_spill]] %s7417_s5 }
  0x35   :  { %s7437_s5 = sld [smem:[%s8410_s0 + %s7250_s22]]  }
  0x37   :  { %8478 = sst [smem:[#allocation74_spill]] %s7427_s27 }
  0x38   :  { %8479 = sst [smem:[#allocation75_spill]] %s7432_s13 }
  0x39   :  { %s7447_s27 = sld [smem:[%s8410_s0 + %s7252_s7]]  }
  0x3a   :  { %s7452_s13 = sld [smem:[%s8410_s0 + %s7253_s15]]  }
  0x3f   :  { %8480 = sst [smem:[#allocation76_spill]] %s7447_s27 }
  0x40   :  { %8481 = sst [smem:[#allocation77_spill]] %s7452_s13 }
  0x41   :  { %68 = vsyncpa [#allocation3], 0 }
  0x42   :  { %70 = vsyncpa [#allocation3 + $0x1], 0 }
  0x43   :  { %71 = vsyncpa [#allocation6], 0 }
  0x44   :  { %73 = vsyncpa [#allocation6 + $0x1], 0 }
  0x45   :  { %74 = vsyncpa [#allocation9], 0 }
  0x46   :  { %76 = vsyncpa [#allocation9 + $0x1], 0 }
  0x47   :  { %77 = vsyncpa [#allocation12], 0 }
  0x48   :  { %78 = vsyncpa [#allocation15], 0 }
  0x49   :  { %79 = vsyncpa [#allocation18], 0 }
  0x4a   :  { %80 = vsyncpa [#allocation21], 0 }
  0x4b   :  { %81 = vsyncpa [#allocation24], 0 }
  0x4c   :  { %82 = vsyncpa [#allocation27], 0 }
  0x4d   :  { %83 = vsyncpa [#allocation30], 0 }
  0x4e   :  { %84 = vsyncpa [#allocation33], 0 }
  0x4f   :  { %85 = vsyncpa [#allocation36], 0 }
  0x50   :  { %86 = vsyncpa [#allocation4], 0 }
  0x51   :  { %88 = vsyncpa [#allocation4 + $0x1], 0  ;;  %s7454_s22 = smov 0   ;;  %s7456_s0 = smov 0  }
  0x52   :  { %s7458_s23 = smov 0   ;;  %s7460_s26 = smov 0  }
  0x53 LB: > { %s8482_s8 = sld [smem:[#allocation58_spill]]  ;;  %s8483_s17 = sld [smem:[#allocation54_spill]]  ;;  %s7217_s23 = sphi %s7458_s23, %s8566_s23   ;;  %s7213_s0 = sphi %s7456_s0, %s8565_s0   ;;  %s7209_s22 = sphi %s7454_s22, %s8564_s22   ;;  %s7221_s26 = sphi %s7460_s26, %s8562_s26  }
  0x54   : > { %s8484_s9 = sld [smem:[#allocation52_spill]]  ;;  %s8486_s21 = sld [smem:[#allocation66_spill]] }
  0x55   : > { %s8485_s24 = sld [smem:[#allocation60_spill]]  ;;  %s8487_s20 = sld [smem:[#allocation63_spill]] }
  0x56   : > { %s8488_s14 = sld [smem:[#allocation59_spill]]  ;;  %s8489_s6 = sld [smem:[#allocation61_spill]] }
  0x57   : > { %s8490_s4 = sld [smem:[#allocation69_spill]]  ;;  %s8491_s25 = sld [smem:[#allocation56_spill]] }
  0x58   : > { %s8492_s3 = sld [smem:[#allocation57_spill]]  ;;  %8493 = sst [smem:[#allocation78_spill]] %s7209_s22 }
  0x59   : > { %8494 = sst [smem:[#allocation79_spill]] %s7221_s26  ;;  %s7254_s28 = smov [#allocation11]  }
  0x5a   : > { %s813_s1 = sshll.u32 %s7254_s28, 4  ;;  %s7475_s2 = sadd.s32 4294967295, %s7221_s26   ;;  %s7480_s1 = int_to_ptr.vmem [resolvable:$true] %s813_s1 }
  0x5b   : > { %p5386_p0 = scmp.ge.s32.totalorder %s7221_s26, 1  ;;  %p8420_p1 = scmp.eq.s32.totalorder %s7475_s2, 0 }
  0x5c   : > { %p801_p2 = scmp.lt.s32.totalorder %s7221_s26, 3  ;;  %s7255_s10 = smov [#allocation14]  }
  0x5d   : > { %s837_s11 = sshll.u32 %s7255_s10, 4  ;;  %s7256_s16 = smov [#allocation17]   ;;  %s7495_s11 = int_to_ptr.vmem [resolvable:$true] %s837_s11 }
  0x5e   : > { %p7482_p3 = pnand %p5386_p0, %p801_p2  ;;  %s861_s18 = sshll.u32 %s7256_s16, 4  ;;  %s7497_s18 = int_to_ptr.vmem [resolvable:$true] %s861_s18 }
  0x5f   : > { %s6485_s28 = scalar_lea.hbm %s8491_s25, 1024 }
  0x60   : > { %s8495_s7 = scalar_select %p7482_p3, 1, 0 }
  0x61   : > { %p6102_p5 = pneg %p7482_p3  ;;  %p6486_p7 = scmp.ne.s32.totalorder %s8491_s25, %s6485_s28 }
  0x62   : > { %p6492_p11 = scmp.lt.u32.totalorder %s6485_s28, %s8491_s25 }
  0x63   : > { %p7491_p6 = pnand %p6102_p5, %p8420_p1 }
  0x65   : > { %s8496_s15 = scalar_select %p7491_p6, 1, 0 }
  0x66   : > { %p7503_p8 = pneg %p7491_p6 }
  0x68   : > { %s8497_s13 = scalar_select %p7503_p8, 1, 0 }
  0x69   : > { %p6488_p9 = pnand %p7503_p8, %p6486_p7 }
  0x6b   : > { %p6489_p10 = pneg %p6488_p9 }
  0x6d   : > { %p6494_p12 = pnand %p6492_p11, %p6489_p10 }
  0x6f   : > { %6497 = shalt.err (!%p6494_p12)
}
  0x70   : > { %s6498_s10 = scalar_lea.vmem %s7480_s1, 1024  ;;  %p6506_p5 = scmp.lt.s32.totalorder %s7480_s1, %s7480_s1 }
  0x71   : > { %p6499_p13 = scmp.ne.s32.totalorder %s7480_s1, %s6498_s10  ;;  %p6507_p4 = scmp.lt.s32.totalorder %s6498_s10, %s6498_s10 }
  0x73   : > { %p6501_p0 = pnand %p6499_p13, %p7503_p8  ;;  %p6508_p1 = por %p6507_p4, %p6506_p5 }
  0x75   : > { %p6502_p2 = pneg %p6501_p0 }
  0x77   : > { %p6509_p3 = pnand %p6508_p1, %p6502_p2 }
  0x79   : > { %6512 = shalt.err (!%p6509_p3)
}
  0x7a   : > { %s8424_s16 = smov 64   ;;  %s8426_s28 = smov 4  }
  0x7b   : > { %6105 = dma.hbm_to_vmem [thread:$0]  (!%p7491_p6), %s8491_s25, 1024, %s7480_s1, [#allocation12], %s8424_s16, %s8424_s16, %s8426_s28  }
  0x7c   : > { %s6513_s27 = scalar_lea.hbm %s8492_s3, 1024 }
  0x7d   : > { %p6514_p7 = scmp.ne.s32.totalorder %s8492_s3, %s6513_s27  ;;  %p6520_p3 = scmp.lt.u32.totalorder %s6513_s27, %s8492_s3 }
  0x7f   : > { %p6516_p4 = pnand %p6514_p7, %p7503_p8 }
  0x81   : > { %p6517_p1 = pneg %p6516_p4 }
  0x83   : > { %p6522_p9 = pnand %p6520_p3, %p6517_p1 }
  0x85   : > { %6525 = shalt.err (!%p6522_p9)
}
  0x86   : > { %s6526_s10 = scalar_lea.vmem %s7495_s11, 1024  ;;  %p6534_p13 = scmp.lt.s32.totalorder %s7495_s11, %s7495_s11 }
  0x87   : > { %p6527_p10 = scmp.ne.s32.totalorder %s7495_s11, %s6526_s10  ;;  %p6535_p0 = scmp.lt.s32.totalorder %s6526_s10, %s6526_s10 }
  0x89   : > { %p6529_p11 = pnand %p6527_p10, %p7503_p8  ;;  %p6536_p2 = por %p6535_p0, %p6534_p13 }
  0x8b   : > { %p6530_p12 = pneg %p6529_p11 }
  0x8d   : > { %p6537_p5 = pnand %p6536_p2, %p6530_p12 }
  0x8f   : > { %6540 = shalt.err (!%p6537_p5)
}
  0x90   : > { %6111 = dma.hbm_to_vmem [thread:$0]  (!%p7491_p6), %s8492_s3, 1024, %s7495_s11, [#allocation15], %s8424_s16, %s8424_s16, %s8426_s28  }
  0x91   : > { %s6541_s27 = scalar_lea.hbm %s8488_s14, 1024 }
  0x92   : > { %p6542_p7 = scmp.ne.s32.totalorder %s8488_s14, %s6541_s27  ;;  %p6548_p3 = scmp.lt.u32.totalorder %s6541_s27, %s8488_s14 }
  0x94   : > { %p6544_p4 = pnand %p6542_p7, %p7503_p8 }
  0x96   : > { %p6545_p1 = pneg %p6544_p4 }
  0x98   : > { %p6550_p9 = pnand %p6548_p3, %p6545_p1 }
  0x9a   : > { %6553 = shalt.err (!%p6550_p9)
}
  0x9b   : > { %s6554_s1 = scalar_lea.vmem %s7497_s18, 1024  ;;  %p6562_p13 = scmp.lt.s32.totalorder %s7497_s18, %s7497_s18 }
  0x9c   : > { %p6555_p10 = scmp.ne.s32.totalorder %s7497_s18, %s6554_s1  ;;  %p6563_p0 = scmp.lt.s32.totalorder %s6554_s1, %s6554_s1 }
  0x9e   : > { %p6557_p11 = pnand %p6555_p10, %p7503_p8  ;;  %p6564_p2 = por %p6563_p0, %p6562_p13 }
  0xa0   : > { %p6558_p12 = pneg %p6557_p11 }
  0xa2   : > { %p6565_p5 = pnand %p6564_p2, %p6558_p12 }
  0xa4   : > { %6568 = shalt.err (!%p6565_p5)
}
  0xa5   : > { %6117 = dma.hbm_to_vmem [thread:$0]  (!%p7491_p6), %s8488_s14, 1024, %s7497_s18, [#allocation18], %s8424_s16, %s8424_s16, %s8426_s28  }
  0xa6   : > { %s7259_s11 = smov [#allocation20]   ;;  %s7260_s27 = smov [#allocation23]  }
  0xa7   : > { %s885_s10 = sshll.u32 %s7259_s11, 4  ;;  %s910_s1 = sshll.u32 %s7260_s27, 4  ;;  %s886_s10 = int_to_ptr.vmem [resolvable:$true] %s885_s10  ;;  %s911_s1 = int_to_ptr.vmem [resolvable:$true] %s910_s1 }
  0xa8   : > { %s6569_s3 = scalar_lea.hbm %s8485_s24, 1024 }
  0xa9   : > { %p6570_p7 = scmp.ne.s32.totalorder %s8485_s24, %s6569_s3  ;;  %p6576_p3 = scmp.lt.u32.totalorder %s6569_s3, %s8485_s24 }
  0xab   : > { %p6572_p4 = pnand %p6570_p7, %p7503_p8 }
  0xad   : > { %p6573_p1 = pneg %p6572_p4 }
  0xaf   : > { %p6578_p9 = pnand %p6576_p3, %p6573_p1 }
  0xb1   : > { %6581 = shalt.err (!%p6578_p9)
}
  0xb2   : > { %s6582_s25 = scalar_lea.vmem %s886_s10, 1024  ;;  %p6590_p13 = scmp.lt.s32.totalorder %s886_s10, %s886_s10 }
  0xb3   : > { %p6583_p10 = scmp.ne.s32.totalorder %s886_s10, %s6582_s25  ;;  %p6591_p0 = scmp.lt.s32.totalorder %s6582_s25, %s6582_s25 }
  0xb5   : > { %p6585_p11 = pnand %p6583_p10, %p7503_p8  ;;  %p6592_p2 = por %p6591_p0, %p6590_p13 }
  0xb7   : > { %p6586_p12 = pneg %p6585_p11 }
  0xb9   : > { %p6593_p5 = pnand %p6592_p2, %p6586_p12 }
  0xbb   : > { %6596 = shalt.err (!%p6593_p5)
}
  0xbc   : > { %6123 = dma.hbm_to_vmem [thread:$0]  (!%p7491_p6), %s8485_s24, 1024, %s886_s10, [#allocation21], %s8424_s16, %s8424_s16, %s8426_s28  }
  0xbd   : > { %s6597_s3 = scalar_lea.hbm %s8489_s6, 16 }
  0xbe   : > { %p6598_p7 = scmp.ne.s32.totalorder %s8489_s6, %s6597_s3  ;;  %p6604_p3 = scmp.lt.u32.totalorder %s6597_s3, %s8489_s6 }
  0xc0   : > { %p6600_p4 = pnand %p6598_p7, %p7503_p8 }
  0xc2   : > { %p6601_p1 = pneg %p6600_p4 }
  0xc4   : > { %p6606_p9 = pnand %p6604_p3, %p6601_p1 }
  0xc6   : > { %6609 = shalt.err (!%p6606_p9)
}
  0xc7   : > { %s6610_s25 = scalar_lea.vmem %s911_s1, 16  ;;  %s6617_s18 = scalar_lea.vmem %s911_s1, 32 }
  0xc8   : > { %p6611_p10 = scmp.ne.s32.totalorder %s911_s1, %s6610_s25  ;;  %p6618_p13 = scmp.lt.s32.totalorder %s911_s1, %s911_s1 }
  0xc9   : > { %p6619_p0 = scmp.lt.s32.totalorder %s6617_s18, %s6610_s25 }
  0xca   : > { %p6613_p11 = pnand %p6611_p10, %p7503_p8 }
  0xcb   : > { %p6620_p2 = por %p6619_p0, %p6618_p13 }
  0xcc   : > { %p6614_p12 = pneg %p6613_p11 }
  0xce   : > { %p6621_p5 = pnand %p6620_p2, %p6614_p12 }
  0xd0   : > { %6624 = shalt.err (!%p6621_p5)
}
  0xd1   : > { %6129 = dma.hbm_to_vmem [thread:$0]  (!%p7491_p6), %s8489_s6, 16, %s911_s1, [#allocation24]  }
  0xd2   : > { %s7261_s11 = smov [#allocation26]   ;;  %s7262_s27 = smov [#allocation29]  }
  0xd3   : > { %s931_s10 = sshll.u32 %s7261_s11, 4  ;;  %s959_s3 = sshll.u32 %s7262_s27, 4  ;;  %s932_s10 = int_to_ptr.vmem [resolvable:$true] %s931_s10  ;;  %s960_s3 = int_to_ptr.vmem [resolvable:$true] %s959_s3 }
  0xd4   : > { %s6625_s16 = scalar_lea.hbm %s8487_s20, 1024 }
  0xd5   : > { %p6626_p7 = scmp.ne.s32.totalorder %s8487_s20, %s6625_s16  ;;  %p6632_p3 = scmp.lt.u32.totalorder %s6625_s16, %s8487_s20 }
  0xd7   : > { %p6628_p4 = pnand %p6626_p7, %p7503_p8 }
  0xd9   : > { %p6629_p1 = pneg %p6628_p4 }
  0xdb   : > { %p6634_p9 = pnand %p6632_p3, %p6629_p1 }
  0xdd   : > { %6637 = shalt.err (!%p6634_p9)
}
  0xde   : > { %s6638_s25 = scalar_lea.vmem %s932_s10, 1024  ;;  %p6646_p13 = scmp.lt.s32.totalorder %s932_s10, %s932_s10 }
  0xdf   : > { %p6639_p10 = scmp.ne.s32.totalorder %s932_s10, %s6638_s25  ;;  %p6647_p0 = scmp.lt.s32.totalorder %s6638_s25, %s6638_s25 }
  0xe1   : > { %p6641_p11 = pnand %p6639_p10, %p7503_p8  ;;  %p6648_p2 = por %p6647_p0, %p6646_p13 }
  0xe3   : > { %p6642_p12 = pneg %p6641_p11 }
  0xe5   : > { %p6649_p5 = pnand %p6648_p2, %p6642_p12 }
  0xe7   : > { %6652 = shalt.err (!%p6649_p5)
}
  0xe8   : > { %s8498_s1 = smov 64   ;;  %s6653_s16 = scalar_lea.hbm %s8486_s21, 16 }
  0xe9   : > { %6135 = dma.hbm_to_vmem [thread:$0]  (!%p7491_p6), %s8487_s20, 1024, %s932_s10, [#allocation27], %s8498_s1, %s8498_s1, %s8426_s28  }
  0xea   : > { %p6654_p7 = scmp.ne.s32.totalorder %s8486_s21, %s6653_s16  ;;  %p6660_p3 = scmp.lt.u32.totalorder %s6653_s16, %s8486_s21 }
  0xec   : > { %p6656_p4 = pnand %p6654_p7, %p7503_p8 }
  0xee   : > { %p6657_p1 = pneg %p6656_p4 }
  0xf0   : > { %p6662_p9 = pnand %p6660_p3, %p6657_p1 }
  0xf2   : > { %6665 = shalt.err (!%p6662_p9)
}
  0xf3   : > { %s6666_s18 = scalar_lea.vmem %s960_s3, 16  ;;  %s6673_s11 = scalar_lea.vmem %s960_s3, 32 }
  0xf4   : > { %p6667_p10 = scmp.ne.s32.totalorder %s960_s3, %s6666_s18  ;;  %p6674_p13 = scmp.lt.s32.totalorder %s960_s3, %s960_s3 }
  0xf5   : > { %p6675_p0 = scmp.lt.s32.totalorder %s6673_s11, %s6666_s18 }
  0xf6   : > { %p6669_p11 = pnand %p6667_p10, %p7503_p8 }
  0xf7   : > { %p6676_p2 = por %p6675_p0, %p6674_p13 }
  0xf8   : > { %p6670_p12 = pneg %p6669_p11 }
  0xfa   : > { %p6677_p5 = pnand %p6676_p2, %p6670_p12 }
  0xfc   : > { %6680 = shalt.err (!%p6677_p5)
}
  0xfd   : > { %6141 = dma.hbm_to_vmem [thread:$0]  (!%p7491_p6), %s8486_s21, 16, %s960_s3, [#allocation30]  }
  0xfe   : > { %s7263_s10 = smov [#allocation32]   ;;  %s6681_s25 = scalar_lea.hbm %s8490_s4, 1024 }
  0xff   : > { %s985_s27 = sshll.u32 %s7263_s10, 4  ;;  %p6682_p7 = scmp.ne.s32.totalorder %s8490_s4, %s6681_s25  ;;  %s986_s27 = int_to_ptr.vmem [resolvable:$true] %s985_s27 }
 0x100   : > { %p6688_p3 = scmp.lt.u32.totalorder %s6681_s25, %s8490_s4 }
 0x101   : > { %p6684_p4 = pnand %p6682_p7, %p7503_p8 }
 0x103   : > { %p6685_p1 = pneg %p6684_p4 }
 0x105   : > { %p6690_p9 = pnand %p6688_p3, %p6685_p1 }
 0x107   : > { %6693 = shalt.err (!%p6690_p9)
}
 0x108   : > { %s6694_s16 = scalar_lea.vmem %s986_s27, 1024  ;;  %p6702_p13 = scmp.lt.s32.totalorder %s986_s27, %s986_s27 }
 0x109   : > { %p6695_p10 = scmp.ne.s32.totalorder %s986_s27, %s6694_s16  ;;  %p6703_p0 = scmp.lt.s32.totalorder %s6694_s16, %s6694_s16 }
 0x10b   : > { %p6697_p11 = pnand %p6695_p10, %p7503_p8  ;;  %p6704_p2 = por %p6703_p0, %p6702_p13 }
 0x10d   : > { %p6698_p12 = pneg %p6697_p11 }
 0x10f   : > { %p6705_p5 = pnand %p6704_p2, %p6698_p12 }
 0x111   : > { %6708 = shalt.err (!%p6705_p5)
}
 0x112   : > { %6147 = dma.hbm_to_vmem [thread:$0]  (!%p7491_p6), %s8490_s4, 1024, %s986_s27, [#allocation33], %s8498_s1, %s8498_s1, %s8426_s28  }
 0x113   : > { %s5385_s3 = sadd.s32 4294967294, %s7221_s26   ;;  %s7620_s18 = sadd.s32 1, %s7221_s26  }
 0x114   : > { %8499 = sst [smem:[#allocation80_spill]] %s7620_s18  ;;  %s98_s11 = ssub.s32 %s7221_s26, %s7620_s18 }
 0x115   : > { %s101_s10 = sadd.s32 1, %s7217_s23  ;;  %p99_p7 = scmp.eq.s32.totalorder %s98_s11, 0 }
 0x116   : > { %p108_p4 = scmp.ne.s32.totalorder %s7217_s23, %s7213_s0  ;;  %p109_p1 = scmp.eq.s32.totalorder %s7221_s26, 0 }
 0x117   : > { %p114_p3 = scmp.ne.s32.totalorder %s7213_s0, %s7209_s22  ;;  %p8501_p10 = scmp.eq.s32.totalorder %s7475_s2, 0 }
 0x118   : > { %s7631_s25 = scalar_select %p99_p7, %s7217_s23, %s101_s10  }
 0x119   : > { %p110_p9 = por %p109_p1, %p108_p4  ;;  %p7635_p11 = por %p8501_p10, %p114_p3 }
 0x11a   : > { %8500 = sst [smem:[#allocation81_spill]] %s7631_s25  ;;  %p788_p12 = scmp.eq.s32.totalorder %s7475_s2, 1 }
 0x11b   : > { %s8502_s27 = scalar_select %p7635_p11, 1, 0 }
 0x11c   : > { %p794_p13 = scmp.eq.s32.totalorder %s5385_s3, 1  ;;  %p6191_p0 = scmp.lt.s32.totalorder %s7221_s26, 2 }
 0x11d   : > { %s8433_s16 = sand.u32 1, %s7217_s23   ;;  %p7642_p2 = por %p788_p12, %p108_p4 }
 0x11e   : > { %p7646_p5 = por %p794_p13, %p114_p3  ;;  %s7652_s10 = sshll.u32 %s8433_s16, 3 }
 0x11f   : > { %s8503_s11 = scalar_select %p7642_p2, 1, 0 }
 0x120   : > { %s8504_s28 = scalar_select %p7646_p5, 1, 0 }
 0x121   : > { %s7655_s4 = sshll.u32 %s7221_s26, 7  ;;  %p7657_p7 = pnand %p6191_p0, %p110_p9 }
 0x122   : > { %8505 = sst [smem:[#allocation82_spill]] %s8504_s28  ;;  %s8443_s6 = sand.u32 1, %s7221_s26  }
 0x123   : > { %s8506_s3 = scalar_select %p7657_p7, 1, 0 }
 0x124   : > { %s7664_s14 = scalar_lea.hbm %s8484_s9, %s7655_s4  ;;  %s1068_s20 = scalar_lea.vmem [#allocation5], %s7652_s10 }
 0x125   : > { %s1075_s21 = sshll.u32 %s1068_s20, 4  ;;  %s7671_s16 = scalar_lea.sflag [#allocation6], %s8443_s6  ;;  %s7667_s21 = int_to_ptr.vmem [resolvable:$true] %s1075_s21 }
 0x126   : > { %s6709_s24 = scalar_lea.hbm %s7664_s14, 128  ;;  %p7677_p1 = pneg %p7657_p7 }
 0x127   : > { %p6710_p4 = scmp.ne.s32.totalorder %s7664_s14, %s6709_s24  ;;  %s6714_s18 = scalar_lea.hbm %s8484_s9, 256 }
 0x128   : > { %s8507_s25 = scalar_select %p7677_p1, 1, 0 }
 0x129   : > { %p6712_p3 = pnand %p7677_p1, %p6710_p4  ;;  %p6715_p10 = scmp.lt.u32.totalorder %s7664_s14, %s8484_s9 }
 0x12a   : > { %p6716_p12 = scmp.lt.u32.totalorder %s6714_s18, %s6709_s24  ;;  %p6718_p0 = scmp.lt.u32.totalorder %s6709_s24, %s7664_s14 }
 0x12b   : > { %p6713_p9 = pneg %p6712_p3 }
 0x12c   : > { %p6717_p13 = por %p6716_p12, %p6715_p10 }
 0x12e   : > { %p6719_p5 = por %p6718_p0, %p6717_p13 }
 0x130   : > { %p6720_p2 = pnand %p6719_p5, %p6713_p9 }
 0x132   : > { %6723 = shalt.err (!%p6720_p2)
}
 0x133   : > { %s6724_s20 = scalar_lea.vmem %s7667_s21, 128  ;;  %s7264_s6 = smov [#allocation5]  }
 0x134   : > { %p6725_p11 = scmp.ne.s32.totalorder %s7667_s21, %s6724_s20  ;;  %s6729_s28 = sshll.u32 %s7264_s6, 4  ;;  %s6730_s28 = int_to_ptr.vmem [resolvable:$false] %s6729_s28 }
 0x135   : > { %s6731_s22 = scalar_lea.vmem %s6730_s28, 256  ;;  %p6732_p4 = scmp.lt.s32.totalorder %s7667_s21, %s6730_s28 }
 0x136   : > { %p6727_p6 = pnand %p6725_p11, %p7677_p1  ;;  %p6733_p3 = scmp.lt.s32.totalorder %s6731_s22, %s6724_s20 }
 0x138   : > { %p6728_p8 = pneg %p6727_p6  ;;  %p6734_p10 = por %p6733_p3, %p6732_p4 }
 0x13a   : > { %p6735_p12 = pnand %p6734_p10, %p6728_p8 }
 0x13c   : > { %6738 = shalt.err (!%p6735_p12)
}
 0x13d   : > { %6160 = dma.hbm_to_vmem [thread:$0]  (!%p7657_p7), %s7664_s14, 128, %s7667_s21, %s7671_s16  }
 0x13e   : > { %s7699_s24 = scalar_lea.hbm %s8483_s17, %s7655_s4  ;;  %s1104_s6 = scalar_lea.vmem [#allocation8], %s7652_s10 }
 0x13f   : > { %s1111_s22 = sshll.u32 %s1104_s6, 4  ;;  %s8508_s28 = sand.u32 1, %s7221_s26   ;;  %s1112_s22 = int_to_ptr.vmem [resolvable:$true] %s1111_s22 }
 0x140   : > { %s7704_s18 = scalar_lea.sflag [#allocation9], %s8508_s28  ;;  %s6739_s20 = scalar_lea.hbm %s7699_s24, 128 }
 0x141   : > { %p6740_p6 = scmp.ne.s32.totalorder %s7699_s24, %s6739_s20  ;;  %s6744_s9 = scalar_lea.hbm %s8483_s17, 256 }
 0x142   : > { %p6745_p2 = scmp.lt.u32.totalorder %s7699_s24, %s8483_s17  ;;  %p6746_p5 = scmp.lt.u32.totalorder %s6744_s9, %s6739_s20 }
 0x143   : > { %p6742_p8 = pnand %p6740_p6, %p7677_p1  ;;  %p6748_p13 = scmp.lt.u32.totalorder %s6739_s20, %s7699_s24 }
 0x144   : > { %p6747_p9 = por %p6746_p5, %p6745_p2 }
 0x145   : > { %p6743_p11 = pneg %p6742_p8 }
 0x146   : > { %p6749_p0 = por %p6748_p13, %p6747_p9 }
 0x148   : > { %p6750_p4 = pnand %p6749_p0, %p6743_p11 }
 0x14a   : > { %6753 = shalt.err (!%p6750_p4)
}
 0x14b   : > { %s6754_s21 = scalar_lea.vmem %s1112_s22, 128  ;;  %s7265_s14 = smov [#allocation8]  }
 0x14c   : > { %p6755_p3 = scmp.ne.s32.totalorder %s1112_s22, %s6754_s21  ;;  %s6759_s6 = sshll.u32 %s7265_s14, 4  ;;  %s6760_s6 = int_to_ptr.vmem [resolvable:$false] %s6759_s6 }
 0x14d   : > { %s6761_s28 = scalar_lea.vmem %s6760_s6, 256  ;;  %p6762_p6 = scmp.lt.s32.totalorder %s1112_s22, %s6760_s6 }
 0x14e   : > { %p6757_p10 = pnand %p6755_p3, %p7677_p1  ;;  %p6763_p8 = scmp.lt.s32.totalorder %s6761_s28, %s6754_s21 }
 0x150   : > { %p6758_p12 = pneg %p6757_p10  ;;  %p6764_p7 = por %p6763_p8, %p6762_p6 }
 0x152   : > { %p6765_p2 = pnand %p6764_p7, %p6758_p12 }
 0x154   : > { %6768 = shalt.err (!%p6765_p2)
}
 0x155   : > { %p8509_p5 = scmp.ne.s32.totalorder %s8506_s3, 0  ;;  %s7266_s9 = smov [#allocation13]  }
 0x156   : > { %s827_s20 = sshll.u32 %s7266_s9, 4  ;;  %s7267_s14 = smov [#allocation16]   ;;  %s828_s20 = int_to_ptr.vmem [resolvable:$true] %s827_s20 }
 0x157   : > { %6166 = dma.hbm_to_vmem [thread:$0]  (!%p8509_p5), %s7699_s24, 128, %s1112_s22, %s7704_s18  }
 0x158   : > { %s851_s17 = sshll.u32 %s7267_s14, 4  ;;  %s6769_s26 = scalar_lea.hbm %s7327_s29, 16  ;;  %s852_s17 = int_to_ptr.vmem [resolvable:$true] %s851_s17 }
 0x159   : > { %p6770_p11 = scmp.ne.s32.totalorder %s7327_s29, %s6769_s26  ;;  %p8510_p9 = scmp.ne.s32.totalorder %s8497_s13, 0 }
 0x15a   : > { %p6776_p0 = scmp.lt.u32.totalorder %s6769_s26, %s7327_s29 }
 0x15b   : > { %p6772_p13 = pnand %p6770_p11, %p8510_p9 }
 0x15d   : > { %p6773_p7 = pneg %p6772_p13 }
 0x15f   : > { %p6778_p4 = pnand %p6776_p0, %p6773_p7 }
 0x161   : > { %6781 = shalt.err (!%p6778_p4)
}
 0x162   : > { %s6782_s21 = scalar_lea.vmem %s828_s20, 16  ;;  %s6789_s24 = scalar_lea.vmem %s828_s20, 32 }
 0x163   : > { %p6783_p3 = scmp.ne.s32.totalorder %s828_s20, %s6782_s21  ;;  %p6790_p6 = scmp.lt.s32.totalorder %s828_s20, %s828_s20 }
 0x164   : > { %p6791_p8 = scmp.lt.s32.totalorder %s6789_s24, %s6782_s21 }
 0x165   : > { %p6785_p10 = pnand %p6783_p3, %p8510_p9 }
 0x166   : > { %p6792_p2 = por %p6791_p8, %p6790_p6 }
 0x167   : > { %p6786_p12 = pneg %p6785_p10 }
 0x169   : > { %p6793_p5 = pnand %p6792_p2, %p6786_p12 }
 0x16b   : > { %6796 = shalt.err (!%p6793_p5)
}
 0x16c   : > { %p8511_p1 = scmp.ne.s32.totalorder %s8496_s15, 0  ;;  %s6797_s26 = scalar_lea.hbm %s8482_s8, 16 }
 0x16d   : > { %p6798_p11 = scmp.ne.s32.totalorder %s8482_s8, %s6797_s26  ;;  %p6804_p0 = scmp.lt.u32.totalorder %s6797_s26, %s8482_s8 }
 0x16e   : > { %6108 = dma.hbm_to_vmem [thread:$0]  (!%p8511_p1), %s7327_s29, 16, %s828_s20, [#allocation12]  }
 0x16f   : > { %p6800_p13 = pnand %p6798_p11, %p8510_p9 }
 0x171   : > { %p6801_p7 = pneg %p6800_p13 }
 0x173   : > { %p6806_p4 = pnand %p6804_p0, %p6801_p7 }
 0x175   : > { %6809 = shalt.err (!%p6806_p4)
}
 0x176   : > { %s6810_s22 = scalar_lea.vmem %s852_s17, 16  ;;  %s6817_s6 = scalar_lea.vmem %s852_s17, 32 }
 0x177   : > { %p6811_p5 = scmp.ne.s32.totalorder %s852_s17, %s6810_s22  ;;  %p6818_p12 = scmp.lt.s32.totalorder %s852_s17, %s852_s17 }
 0x178   : > { %p6819_p6 = scmp.lt.s32.totalorder %s6817_s6, %s6810_s22 }
 0x179   : > { %p6813_p3 = pnand %p6811_p5, %p8510_p9 }
 0x17a   : > { %p6820_p8 = por %p6819_p6, %p6818_p12 }
 0x17b   : > { %p6814_p10 = pneg %p6813_p3 }
 0x17d   : > { %p6821_p2 = pnand %p6820_p8, %p6814_p10 }
 0x17f   : > { %6824 = shalt.err (!%p6821_p2)
}
 0x180   : > { %6114 = dma.hbm_to_vmem [thread:$0]  (!%p8511_p1), %s8482_s8, 16, %s852_s17, [#allocation15]  }
 0x181   : > { %s7268_s28 = smov [#allocation19]   ;;  %s7269_s20 = smov [#allocation22]  }
 0x182   : > { %s875_s9 = sshll.u32 %s7268_s28, 4  ;;  %s899_s14 = sshll.u32 %s7269_s20, 4  ;;  %s876_s9 = int_to_ptr.vmem [resolvable:$true] %s875_s9  ;;  %s900_s14 = int_to_ptr.vmem [resolvable:$true] %s899_s14 }
 0x183   : > { %s6825_s21 = scalar_lea.hbm %s7347_s19, 16 }
 0x184   : > { %p6826_p11 = scmp.ne.s32.totalorder %s7347_s19, %s6825_s21  ;;  %p6832_p0 = scmp.lt.u32.totalorder %s6825_s21, %s7347_s19 }
 0x186   : > { %p6828_p13 = pnand %p6826_p11, %p8510_p9 }
 0x188   : > { %p6829_p7 = pneg %p6828_p13 }
 0x18a   : > { %p6834_p4 = pnand %p6832_p0, %p6829_p7 }
 0x18c   : > { %6837 = shalt.err (!%p6834_p4)
}
 0x18d   : > { %s6838_s24 = scalar_lea.vmem %s876_s9, 16  ;;  %s6845_s17 = scalar_lea.vmem %s876_s9, 32 }
 0x18e   : > { %p6839_p5 = scmp.ne.s32.totalorder %s876_s9, %s6838_s24  ;;  %p6846_p12 = scmp.lt.s32.totalorder %s876_s9, %s876_s9 }
 0x18f   : > { %p6847_p6 = scmp.lt.s32.totalorder %s6845_s17, %s6838_s24 }
 0x190   : > { %p6841_p3 = pnand %p6839_p5, %p8510_p9 }
 0x191   : > { %p6848_p8 = por %p6847_p6, %p6846_p12 }
 0x192   : > { %p6842_p10 = pneg %p6841_p3 }
 0x194   : > { %p6849_p2 = pnand %p6848_p8, %p6842_p10 }
 0x196   : > { %6852 = shalt.err (!%p6849_p2)
}
 0x197   : > { %6120 = dma.hbm_to_vmem [thread:$0]  (!%p8511_p1), %s7347_s19, 16, %s876_s9, [#allocation18]  }
 0x198   : > { %s6853_s26 = scalar_lea.hbm %s7357_s30, 16 }
 0x199   : > { %p6854_p11 = scmp.ne.s32.totalorder %s7357_s30, %s6853_s26  ;;  %p6860_p0 = scmp.lt.u32.totalorder %s6853_s26, %s7357_s30 }
 0x19b   : > { %p6856_p13 = pnand %p6854_p11, %p8510_p9 }
 0x19d   : > { %p6857_p7 = pneg %p6856_p13 }
 0x19f   : > { %p6862_p4 = pnand %p6860_p0, %p6857_p7 }
 0x1a1   : > { %6865 = shalt.err (!%p6862_p4)
}
 0x1a2   : > { %s6866_s22 = scalar_lea.vmem %s900_s14, 16  ;;  %s6873_s6 = scalar_lea.vmem %s900_s14, 32 }
 0x1a3   : > { %p6867_p5 = scmp.ne.s32.totalorder %s900_s14, %s6866_s22  ;;  %p6874_p12 = scmp.lt.s32.totalorder %s900_s14, %s900_s14 }
 0x1a4   : > { %p6875_p6 = scmp.lt.s32.totalorder %s6873_s6, %s6866_s22 }
 0x1a5   : > { %p6869_p3 = pnand %p6867_p5, %p8510_p9 }
 0x1a6   : > { %p6876_p8 = por %p6875_p6, %p6874_p12 }
 0x1a7   : > { %p6870_p10 = pneg %p6869_p3 }
 0x1a9   : > { %p6877_p2 = pnand %p6876_p8, %p6870_p10 }
 0x1ab   : > { %6880 = shalt.err (!%p6877_p2)
}
 0x1ac   : > { %s8512_s28 = sld [smem:[#allocation62_spill]]  ;;  %s7270_s9 = smov [#allocation25]  }
 0x1ad   : > { %6126 = dma.hbm_to_vmem [thread:$0]  (!%p8511_p1), %s7357_s30, 16, %s900_s14, [#allocation21]  }
 0x1ae   : > { %s921_s20 = sshll.u32 %s7270_s9, 4  ;;  %s7271_s21 = smov [#allocation28]   ;;  %s922_s20 = int_to_ptr.vmem [resolvable:$true] %s921_s20 }
 0x1af   : > { %s945_s24 = sshll.u32 %s7271_s21, 4  ;;  %s946_s24 = int_to_ptr.vmem [resolvable:$true] %s945_s24 }
 0x1b2   : > { %s6881_s17 = scalar_lea.hbm %s8512_s28, 16 }
 0x1b3   : > { %p6882_p11 = scmp.ne.s32.totalorder %s8512_s28, %s6881_s17  ;;  %p6888_p0 = scmp.lt.u32.totalorder %s6881_s17, %s8512_s28 }
 0x1b5   : > { %p6884_p13 = pnand %p6882_p11, %p8510_p9 }
 0x1b7   : > { %p6885_p7 = pneg %p6884_p13 }
 0x1b9   : > { %p6890_p4 = pnand %p6888_p0, %p6885_p7 }
 0x1bb   : > { %6893 = shalt.err (!%p6890_p4)
}
 0x1bc   : > { %s6894_s26 = scalar_lea.vmem %s922_s20, 16  ;;  %s6901_s14 = scalar_lea.vmem %s922_s20, 32 }
 0x1bd   : > { %p6895_p5 = scmp.ne.s32.totalorder %s922_s20, %s6894_s26  ;;  %p6902_p12 = scmp.lt.s32.totalorder %s922_s20, %s922_s20 }
 0x1be   : > { %p6903_p6 = scmp.lt.s32.totalorder %s6901_s14, %s6894_s26 }
 0x1bf   : > { %p6897_p3 = pnand %p6895_p5, %p8510_p9 }
 0x1c0   : > { %p6904_p8 = por %p6903_p6, %p6902_p12 }
 0x1c1   : > { %p6898_p10 = pneg %p6897_p3 }
 0x1c3   : > { %p6905_p2 = pnand %p6904_p8, %p6898_p10 }
 0x1c5   : > { %6908 = shalt.err (!%p6905_p2)
}
 0x1c6   : > { %s8513_s22 = sld [smem:[#allocation64_spill]] }
 0x1c7   : > { %6132 = dma.hbm_to_vmem [thread:$0]  (!%p8511_p1), %s8512_s28, 16, %s922_s20, [#allocation24]  }
 0x1cc   : > { %s8514_s6 = smov %s8513_s22  ;;  %s6909_s9 = scalar_lea.hbm %s8513_s22, 16 }
 0x1cd   : > { %p6910_p11 = scmp.ne.s32.totalorder %s8514_s6, %s6909_s9  ;;  %p6916_p0 = scmp.lt.u32.totalorder %s6909_s9, %s8514_s6 }
 0x1cf   : > { %p6912_p13 = pnand %p6910_p11, %p8510_p9 }
 0x1d1   : > { %p6913_p7 = pneg %p6912_p13 }
 0x1d3   : > { %p6918_p4 = pnand %p6916_p0, %p6913_p7 }
 0x1d5   : > { %6921 = shalt.err (!%p6918_p4)
}
 0x1d6   : > { %s6922_s21 = scalar_lea.vmem %s946_s24, 16  ;;  %s6929_s17 = scalar_lea.vmem %s946_s24, 32 }
 0x1d7   : > { %p6923_p5 = scmp.ne.s32.totalorder %s946_s24, %s6922_s21  ;;  %p6930_p12 = scmp.lt.s32.totalorder %s946_s24, %s946_s24 }
 0x1d8   : > { %p6931_p6 = scmp.lt.s32.totalorder %s6929_s17, %s6922_s21 }
 0x1d9   : > { %p6925_p3 = pnand %p6923_p5, %p8510_p9 }
 0x1da   : > { %p6932_p8 = por %p6931_p6, %p6930_p12 }
 0x1db   : > { %p6926_p10 = pneg %p6925_p3 }
 0x1dd   : > { %p6933_p2 = pnand %p6932_p8, %p6926_p10 }
 0x1df   : > { %6936 = shalt.err (!%p6933_p2)
}
 0x1e0   : > { %s8515_s20 = sld [smem:[#allocation67_spill]]  ;;  %s7272_s26 = smov [#allocation31]  }
 0x1e1   : > { %6138 = dma.hbm_to_vmem [thread:$0]  (!%p8511_p1), %s8514_s6, 16, %s946_s24, [#allocation27]  }
 0x1e2   : > { %s969_s14 = sshll.u32 %s7272_s26, 4  ;;  %s7273_s22 = smov [#allocation34]   ;;  %s970_s14 = int_to_ptr.vmem [resolvable:$true] %s969_s14 }
 0x1e3   : > { %s1013_s9 = sshll.u32 %s7273_s22, 4  ;;  %s1014_s9 = int_to_ptr.vmem [resolvable:$true] %s1013_s9 }
 0x1e6   : > { %s6937_s8 = scalar_lea.hbm %s8515_s20, 1024 }
 0x1e7   : > { %p6938_p11 = scmp.ne.s32.totalorder %s8515_s20, %s6937_s8  ;;  %p6944_p0 = scmp.lt.u32.totalorder %s6937_s8, %s8515_s20 }
 0x1e9   : > { %p6940_p13 = pnand %p6938_p11, %p8510_p9 }
 0x1eb   : > { %p6941_p7 = pneg %p6940_p13 }
 0x1ed   : > { %p6946_p4 = pnand %p6944_p0, %p6941_p7 }
 0x1ef   : > { %6949 = shalt.err (!%p6946_p4)
}
 0x1f0   : > { %s6950_s21 = scalar_lea.vmem %s970_s14, 1024  ;;  %p6958_p12 = scmp.lt.s32.totalorder %s970_s14, %s970_s14 }
 0x1f1   : > { %p6951_p5 = scmp.ne.s32.totalorder %s970_s14, %s6950_s21  ;;  %p6959_p6 = scmp.lt.s32.totalorder %s6950_s21, %s6950_s21 }
 0x1f3   : > { %p6953_p3 = pnand %p6951_p5, %p8510_p9  ;;  %p6960_p8 = por %p6959_p6, %p6958_p12 }
 0x1f5   : > { %p6954_p10 = pneg %p6953_p3 }
 0x1f7   : > { %p6961_p2 = pnand %p6960_p8, %p6954_p10 }
 0x1f9   : > { %6964 = shalt.err (!%p6961_p2)
}
 0x1fa   : > { %s8516_s24 = smov 4   ;;  %s8517_s8 = sld [smem:[#allocation75_spill]] }
 0x1fb   : > { %6144 = dma.hbm_to_vmem [thread:$0]  (!%p8511_p1), %s8515_s20, 1024, %s970_s14, [#allocation30], %s8498_s1, %s8498_s1, %s8516_s24  }
 0x200   : > { %s6965_s17 = scalar_lea.hbm %s8517_s8, 4096 }
 0x201   : > { %p6966_p11 = scmp.ne.s32.totalorder %s8517_s8, %s6965_s17  ;;  %p6972_p0 = scmp.lt.u32.totalorder %s6965_s17, %s8517_s8 }
 0x203   : > { %p6968_p13 = pnand %p6966_p11, %p8510_p9 }
 0x205   : > { %p6969_p7 = pneg %p6968_p13 }
 0x207   : > { %p6974_p4 = pnand %p6972_p0, %p6969_p7 }
 0x209   : > { %6977 = shalt.err (!%p6974_p4)
}
 0x20a   : > { %s6978_s26 = scalar_lea.vmem %s1014_s9, 4096  ;;  %p6986_p12 = scmp.lt.s32.totalorder %s1014_s9, %s1014_s9 }
 0x20b   : > { %p6979_p5 = scmp.ne.s32.totalorder %s1014_s9, %s6978_s26  ;;  %p6987_p6 = scmp.lt.s32.totalorder %s6978_s26, %s6978_s26 }
 0x20d   : > { %p6981_p3 = pnand %p6979_p5, %p8510_p9  ;;  %p6988_p8 = por %p6987_p6, %p6986_p12 }
 0x20f   : > { %p6982_p10 = pneg %p6981_p3 }
 0x211   : > { %p6989_p2 = pnand %p6988_p8, %p6982_p10 }
 0x213   : > { %6992 = shalt.err (!%p6989_p2)
}
 0x214   : > { %s7274_s14 = smov 256   ;;  %s7275_s22 = smov 16  }
 0x215   : > { %6150 = dma.hbm_to_vmem [thread:$0]  (!%p8511_p1), %s8517_s8, 4096, %s1014_s9, [#allocation33], %s7274_s14, %s7274_s14, %s7275_s22  }
 0x216   : > { %s7276_s21 = smov [#allocation35]   ;;  %s6993_s6 = scalar_lea.hbm %s7442_s12, 4096 }
 0x217   : > { %s1029_s17 = sshll.u32 %s7276_s21, 4  ;;  %p6994_p11 = scmp.ne.s32.totalorder %s7442_s12, %s6993_s6  ;;  %s1030_s17 = int_to_ptr.vmem [resolvable:$true] %s1029_s17 }
 0x218   : > { %p7000_p0 = scmp.lt.u32.totalorder %s6993_s6, %s7442_s12 }
 0x219   : > { %p6996_p13 = pnand %p6994_p11, %p8510_p9 }
 0x21b   : > { %p6997_p7 = pneg %p6996_p13 }
 0x21d   : > { %p7002_p4 = pnand %p7000_p0, %p6997_p7 }
 0x21f   : > { %7005 = shalt.err (!%p7002_p4)
}
 0x220   : > { %s7006_s26 = scalar_lea.vmem %s1030_s17, 4096  ;;  %p7014_p12 = scmp.lt.s32.totalorder %s1030_s17, %s1030_s17 }
 0x221   : > { %p7007_p5 = scmp.ne.s32.totalorder %s1030_s17, %s7006_s26  ;;  %p7015_p6 = scmp.lt.s32.totalorder %s7006_s26, %s7006_s26 }
 0x223   : > { %p7009_p3 = pnand %p7007_p5, %p8510_p9  ;;  %p7016_p8 = por %p7015_p6, %p7014_p12 }
 0x225   : > { %p7010_p10 = pneg %p7009_p3 }
 0x227   : > { %p7017_p2 = pnand %p7016_p8, %p7010_p10 }
 0x229   : > { %7020 = shalt.err (!%p7017_p2)
}
 0x22a   : > { %s8518_s6 = sld [smem:[#allocation51_spill]]  ;;  %s1050_s9 = scalar_lea.vmem [#allocation2], %s7652_s10 }
 0x22b   : > { %6153 = dma.hbm_to_vmem [thread:$0]  (!%p8511_p1), %s7442_s12, 4096, %s1030_s17, [#allocation36], %s8498_s1, %s8498_s1, %s8516_s24  }
 0x22c   : > { %s1057_s15 = sshll.u32 %s1050_s9, 4  ;;  %s8519_s14 = sand.u32 1, %s7217_s23   ;;  %s1058_s15 = int_to_ptr.vmem [resolvable:$true] %s1057_s15 }
 0x22d   : > { %s1047_s22 = scalar_lea.sflag [#allocation3], %s8519_s14  ;;  %p8520_p11 = scmp.ne.s32.totalorder %s8507_s25, 0 }
 0x230   : > { %s7818_s13 = scalar_lea.hbm %s8518_s6, %s7655_s4  ;;  %s7026_s26 = scalar_lea.hbm %s8518_s6, 256 }
 0x231   : > { %s7021_s21 = scalar_lea.hbm %s7818_s13, 128  ;;  %p7027_p0 = scmp.lt.u32.totalorder %s7818_s13, %s8518_s6 }
 0x232   : > { %p7022_p9 = scmp.ne.s32.totalorder %s7818_s13, %s7021_s21  ;;  %p7028_p4 = scmp.lt.u32.totalorder %s7026_s26, %s7021_s21 }
 0x233   : > { %p7030_p5 = scmp.lt.u32.totalorder %s7021_s21, %s7818_s13 }
 0x234   : > { %p7024_p13 = pnand %p7022_p9, %p8520_p11  ;;  %p7029_p1 = por %p7028_p4, %p7027_p0 }
 0x236   : > { %p7025_p7 = pneg %p7024_p13  ;;  %p7031_p3 = por %p7030_p5, %p7029_p1 }
 0x238   : > { %p7032_p10 = pnand %p7031_p3, %p7025_p7 }
 0x23a   : > { %7035 = shalt.err (!%p7032_p10)
}
 0x23b   : > { %s7036_s1 = scalar_lea.vmem %s1058_s15, 128  ;;  %s7277_s24 = smov [#allocation2]  }
 0x23c   : > { %p7037_p12 = scmp.ne.s32.totalorder %s1058_s15, %s7036_s1  ;;  %s7041_s17 = sshll.u32 %s7277_s24, 4  ;;  %s7042_s17 = int_to_ptr.vmem [resolvable:$false] %s7041_s17 }
 0x23d   : > { %s7043_s9 = scalar_lea.vmem %s7042_s17, 256  ;;  %p7044_p2 = scmp.lt.s32.totalorder %s1058_s15, %s7042_s17 }
 0x23e   : > { %p7039_p6 = pnand %p7037_p12, %p8520_p11  ;;  %p7045_p9 = scmp.lt.s32.totalorder %s7043_s9, %s7036_s1 }
 0x240   : > { %p7040_p8 = pneg %p7039_p6  ;;  %p7046_p13 = por %p7045_p9, %p7044_p2 }
 0x242   : > { %p7047_p0 = pnand %p7046_p13, %p7040_p8 }
 0x244   : > { %7050 = shalt.err (!%p7047_p0)
}
 0x245   : > { %p8521_p4 = scmp.ne.s32.totalorder %s8506_s3, 0  ;;  %s8522_s14 = sld [smem:[#allocation53_spill]] }
 0x246   : > { %s1086_s26 = scalar_lea.vmem [#allocation7], %s7652_s10 }
 0x247   : > { %6157 = dma.hbm_to_vmem [thread:$0]  (!%p8521_p4), %s7818_s13, 128, %s1058_s15, %s1047_s22  }
 0x248   : > { %s1093_s1 = sshll.u32 %s1086_s26, 4  ;;  %s1094_s1 = int_to_ptr.vmem [resolvable:$true] %s1093_s1 }
 0x24b   : > { %s7838_s21 = scalar_lea.hbm %s8522_s14, %s7655_s4  ;;  %s7056_s17 = scalar_lea.hbm %s8522_s14, 256 }
 0x24c   : > { %s7051_s24 = scalar_lea.hbm %s7838_s21, 128  ;;  %p7057_p3 = scmp.lt.u32.totalorder %s7838_s21, %s8522_s14 }
 0x24d   : > { %p7052_p7 = scmp.ne.s32.totalorder %s7838_s21, %s7051_s24  ;;  %p7058_p10 = scmp.lt.u32.totalorder %s7056_s17, %s7051_s24 }
 0x24e   : > { %p7060_p6 = scmp.lt.u32.totalorder %s7051_s24, %s7838_s21 }
 0x24f   : > { %p7054_p1 = pnand %p7052_p7, %p8520_p11  ;;  %p7059_p12 = por %p7058_p10, %p7057_p3 }
 0x251   : > { %p7055_p5 = pneg %p7054_p1  ;;  %p7061_p8 = por %p7060_p6, %p7059_p12 }
 0x253   : > { %p7062_p2 = pnand %p7061_p8, %p7055_p5 }
 0x255   : > { %7065 = shalt.err (!%p7062_p2)
}
 0x256   : > { %s7066_s13 = scalar_lea.vmem %s1094_s1, 128  ;;  %s7278_s15 = smov [#allocation7]  }
 0x257   : > { %p7067_p9 = scmp.ne.s32.totalorder %s1094_s1, %s7066_s13  ;;  %s7071_s22 = sshll.u32 %s7278_s15, 4  ;;  %s7072_s22 = int_to_ptr.vmem [resolvable:$false] %s7071_s22 }
 0x258   : > { %s7073_s9 = scalar_lea.vmem %s7072_s22, 256  ;;  %p7074_p7 = scmp.lt.s32.totalorder %s1094_s1, %s7072_s22 }
 0x259   : > { %p7069_p13 = pnand %p7067_p9, %p8520_p11  ;;  %p7075_p1 = scmp.lt.s32.totalorder %s7073_s9, %s7066_s13 }
 0x25b   : > { %p7070_p0 = pneg %p7069_p13  ;;  %p7076_p4 = por %p7075_p1, %p7074_p7 }
 0x25d   : > { %p7077_p3 = pnand %p7076_p4, %p7070_p0 }
 0x25f   : > { %7080 = shalt.err (!%p7077_p3)
}
 0x260   : > { %p8523_p10 = scmp.ne.s32.totalorder %s8506_s3, 0  ;;  %s8524_s26 = sld [smem:[#allocation55_spill]] }
 0x261   : > { %s1122_s13 = scalar_lea.vmem [#allocation10], %s7652_s10 }
 0x262   : > { %6163 = dma.hbm_to_vmem [thread:$0]  (!%p8523_p10), %s7838_s21, 128, %s1094_s1, %s7671_s16  }
 0x263   : > { %s1129_s15 = sshll.u32 %s1122_s13, 4  ;;  %s1130_s15 = int_to_ptr.vmem [resolvable:$true] %s1129_s15 }
 0x266   : > { %s8525_s24 = smov %s8524_s26  ;;  %s7857_s17 = scalar_lea.hbm %s8524_s26, %s7655_s4 }
 0x267   : > { %s7081_s22 = scalar_lea.hbm %s7857_s17, 128  ;;  %s7086_s9 = scalar_lea.hbm %s8525_s24, 256 }
 0x268   : > { %p7082_p4 = scmp.ne.s32.totalorder %s7857_s17, %s7081_s22  ;;  %p7087_p6 = scmp.lt.u32.totalorder %s7857_s17, %s8525_s24 }
 0x269   : > { %p7088_p8 = scmp.lt.u32.totalorder %s7086_s9, %s7081_s22  ;;  %p7090_p9 = scmp.lt.u32.totalorder %s7081_s22, %s7857_s17 }
 0x26a   : > { %p7084_p5 = pnand %p7082_p4, %p8520_p11 }
 0x26b   : > { %p7089_p2 = por %p7088_p8, %p7087_p6 }
 0x26c   : > { %p7085_p12 = pneg %p7084_p5 }
 0x26d   : > { %p7091_p13 = por %p7090_p9, %p7089_p2 }
 0x26f   : > { %p7092_p0 = pnand %p7091_p13, %p7085_p12 }
 0x271   : > { %7095 = shalt.err (!%p7092_p0)
}
 0x272   : > { %s7096_s4 = scalar_lea.vmem %s1130_s15, 128  ;;  %s7279_s16 = smov [#allocation10]  }
 0x273   : > { %p7097_p7 = scmp.ne.s32.totalorder %s1130_s15, %s7096_s4  ;;  %s7101_s10 = sshll.u32 %s7279_s16, 4  ;;  %s7102_s10 = int_to_ptr.vmem [resolvable:$false] %s7101_s10 }
 0x274   : > { %s7103_s21 = scalar_lea.vmem %s7102_s10, 256  ;;  %p7104_p4 = scmp.lt.s32.totalorder %s1130_s15, %s7102_s10 }
 0x275   : > { %p7099_p1 = pnand %p7097_p7, %p8520_p11  ;;  %p7105_p5 = scmp.lt.s32.totalorder %s7103_s21, %s7096_s4 }
 0x277   : > { %p7100_p3 = pneg %p7099_p1  ;;  %p7106_p10 = por %p7105_p5, %p7104_p4 }
 0x279   : > { %p7107_p6 = pnand %p7106_p10, %p7100_p3 }
 0x27b   : > { %7110 = shalt.err (!%p7107_p6)
}
 0x27c   : > { %p8526_p8 = scmp.ne.s32.totalorder %s8506_s3, 0  ;;  %p8527_p12 = scmp.ne.s32.totalorder %s8495_s7, 0 }
 0x27d   : > { %s7877_s25 = sand.u32 (!%p8527_p12), 1, %s7213_s0   ;;  %p8528_p11 = scmp.ne.s32.totalorder (!%p8527_p12), %s8502_s27, 0 }
 0x27e   : > { %6169 = dma.hbm_to_vmem [thread:$0]  (!%p8526_p8), %s7857_s17, 128, %s1130_s15, %s7704_s18  }
 0x27f   : > { %1138 = sbr.rel (%p8527_p12) target bundleno = 5160 (0x1428), region = 144  ;;  %s7880_s1 = sshll.u32 (!%p8527_p12), %s7877_s25, 3 }
 0x280   : > { %s1141_s26 = scalar_lea.sflag (!%p8527_p12), [#allocation3], %s7877_s25  ;;  %s1144_s13 = scalar_lea.vmem (!%p8527_p12), [#allocation2], %s7880_s1 }
 0x286   : > { %7156 = dma.done.wait (%p8528_p11), %s1141_s26, 128  }
 0x287   : > { %7158 = vsyncadd (%p8528_p11), %s1141_s26, 4294967168  ;;  %s1149_s7 = sand.u32 1, %s7475_s2   ;;  %s1153_s18 = scalar_lea.vmem [#allocation5], %s7880_s1 }
 0x288   : > { %s1150_s3 = scalar_lea.sflag [#allocation6], %s1149_s7 }
 0x289   : > { %7160 = dma.done.wait (%p8528_p11), %s1150_s3, 256  }
 0x28a   : > { %7162 = vsyncadd (%p8528_p11), %s1150_s3, 4294967040  ;;  %s1162_s17 = scalar_lea.vmem [#allocation7], %s7880_s1  ;;  %s1168_s15 = scalar_lea.sflag [#allocation9], %s1149_s7 }
 0x28b   : > { %s1171_s22 = scalar_lea.vmem [#allocation8], %s7880_s1 }
 0x28c   : > { %7164 = dma.done.wait (%p8528_p11), %s1168_s15, 256  }
 0x28d   : > { %7166 = vsyncadd (%p8528_p11), %s1168_s15, 4294967040  ;;  %s1180_s9 = scalar_lea.vmem [#allocation10], %s7880_s1  ;;  %p8529_p10 = scmp.eq.s32.totalorder %s7475_s2, 0 }
 0x28f   : > { %7168 = dma.done.wait (%p8529_p10), [#allocation12], 1040   ;;  %p8530_p2 = pmov %p8529_p10 }
 0x291   : > { %7170 = vsyncadd (%p8530_p2), [#allocation12], 4294966256  ;;  %p8531_p9 = pmov %p8530_p2 }
 0x292   : > { %p8532_p13 = pmov %p8530_p2 }
 0x293   : > { %7172 = dma.done.wait (%p8531_p9), [#allocation15], 1040  }
 0x294   : > { %7174 = vsyncadd (%p8532_p13), [#allocation15], 4294966256  ;;  %p8533_p0 = pmov %p8530_p2 }
 0x296   : > { %7176 = dma.done.wait (%p8533_p0), [#allocation18], 1040   ;;  %p8534_p7 = pmov %p8533_p0 }
 0x297   : > { %p8535_p1 = pmov %p8533_p0 }
 0x298   : > { %7178 = vsyncadd (%p8534_p7), [#allocation18], 4294966256 }
 0x299   : > { %7180 = dma.done.wait (%p8535_p1), [#allocation21], 1040   ;;  %p8536_p3 = pmov %p8533_p0 }
 0x29a   : > { %p8537_p4 = pmov %p8533_p0 }
 0x29b   : > { %7182 = vsyncadd (%p8536_p3), [#allocation21], 4294966256 }
 0x29c   : > { %7184 = dma.done.wait (%p8537_p4), [#allocation24], 32   ;;  %p8538_p5 = pmov %p8533_p0 }
 0x29d   : > { %p8539_p6 = pmov %p8533_p0 }
 0x29e   : > { %7186 = vsyncadd (%p8538_p5), [#allocation24], 4294967264 }
 0x29f   : > { %7188 = dma.done.wait (%p8539_p6), [#allocation27], 1040   ;;  %p8540_p8 = pmov %p8533_p0 }
 0x2a0   : > { %p8541_p12 = pmov %p8533_p0 }
 0x2a1   : > { %7190 = vsyncadd (%p8540_p8), [#allocation27], 4294966256 }
 0x2a2   : > { %7192 = dma.done.wait (%p8541_p12), [#allocation30], 1040   ;;  %p8542_p11 = pmov %p8533_p0 }
 0x2a3   : > { %p8543_p10 = pmov %p8533_p0 }
 0x2a4   : > { %7194 = vsyncadd (%p8542_p11), [#allocation30], 4294966256 }
 0x2a5   : > { %7196 = dma.done.wait (%p8543_p10), [#allocation33], 5120   ;;  %p8544_p2 = pmov %p8533_p0 }
 0x2a6   : > { %p8545_p9 = pmov %p8533_p0 }
 0x2a7   : > { %7198 = vsyncadd (%p8544_p2), [#allocation33], 4294962176 }
 0x2a8   : > { %7200 = dma.done.wait (%p8545_p9), [#allocation36], 4096   ;;  %p8546_p13 = pmov %p8533_p0 }
 0x2a9   : > { %v7280_v0 = vmov 0.0   ;;  %vm7281_vm0 = vmmov 0   ;;  %v6302_v1 = vld [vmem:[#allocation11] sm:$0xff]   ;;  %v6304_v3 = vld [vmem:[#allocation11 + $0x8] sm:$0xff]   ;;  %v6306_v5 = vld [vmem:[#allocation11 + $0x10] sm:$0xff]   ;;  %s7282_s27 = smov 96   ;;  %v1703_v46 = vlaneseq }
 0x2aa   : > { %7202 = vsyncadd (%p8546_p13), [#allocation36], 4294963200  ;;  %5766 = vmatprep.subr.bf16.mxu0 %v7280_v0  ;;  %5786 = vmatprep.subr.bf16.mxu1 %v7280_v0  ;;  %v6303_v2 = vld [vmem:[#allocation14] sm:$0xff]   ;;  %v6305_v4 = vld [vmem:[#allocation14 + $0x8] sm:$0xff]   ;;  %s7283_s4 = smov 32   ;;  %s7284_s16 = smov 64  }
 0x2ab   : > { %5782 = vmatprep.mubr.msk.bf16.mxu0 %vm7281_vm0, %v7280_v0  ;;  %5802 = vmatprep.mubr.msk.bf16.mxu1 %vm7281_vm0, %v7280_v0  ;;  %v6307_v6 = vld [vmem:[#allocation14 + $0x10] sm:$0xff]   ;;  %v6309_v8 = vld [vmem:[#allocation14 + $0x18] sm:$0xff]   ;;  %v6311_v10 = vld [vmem:[#allocation14 + $0x20] sm:$0xff]   ;;  %v7285_v44 = vmov 1983009808   ;;  %v7983_v48 = vshrl.u32 %v1703_v46, 7 }
 0x2ac   : > { %5767 = vmatpush3.bf16.msra.mxu0 %v6302_v1  ;;  %5787 = vmatpush3.bf16.msra.mxu1 %v6303_v2  ;;  %v6308_v7 = vld [vmem:[#allocation11 + $0x18] sm:$0xff]   ;;  %v6310_v9 = vld [vmem:[#allocation11 + $0x20] sm:$0xff]   ;;  %v6312_v11 = vld [vmem:[#allocation11 + $0x28] sm:$0xff]   ;;  %v1701_v45 = vunpack.c.l.s4 %v7285_v44  ;;  %v7286_v49 = vmov 1934713408   ;;  %vm2138_vm1 = vcmask 261120  }
 0x2ad   : > { %5768 = vmatprep.subr.bf16.mxu0 %v7280_v0  ;;  %5788 = vmatprep.subr.bf16.mxu1 %v7280_v0  ;;  %v6313_v12 = vld [vmem:[#allocation14 + $0x28] sm:$0xff]   ;;  %v6315_v14 = vld [vmem:[#allocation14 + $0x30] sm:$0xff]   ;;  %v6317_v17 = vld [vmem:[#allocation14 + $0x38] sm:$0xff]   ;;  %v1733_v50 = vunpack.c.l.s4 %v7286_v49  ;;  %vm2323_vm2 = vcmask 64512   ;;  %vm2375_vm3 = vcmask 1043456   ;;  %vm2706_vm4 = vcmask 523264  }
 0x2ae   : > { %v6314_v13 = vld [vmem:[#allocation11 + $0x30] sm:$0xff]   ;;  %v6316_v15 = vld [vmem:[#allocation11 + $0x38] sm:$0xff]   ;;  %v6318_v18 = vld [vmem:[#allocation17] sm:$0xff]   ;;  %v1702_v47 = vunpack.c.0.s8 %v1701_v45  ;;  %vm2708_vm5 = vcmask 785408   ;;  %s8547_s10 = sld [smem:[#allocation65_spill]]  ;;  %s8548_s21 = sld [smem:[#allocation68_spill]] }
 0x2af   : > { %v1348_v16 = vld [vmem:[%s1144_s13] sm:$0xff]  ;;  %v6322_v23 = vld [vmem:[#allocation17 + $0x20] sm:$0xff]   ;;  %v5448_v27 = vld [vmem:[#allocation16] ss:$0 sm:$0xff]  ;;  %v1734_v56 = vunpack.c.0.s8 %v1733_v50  ;;  %s8549_s26 = sld [smem:[#allocation70_spill]]  ;;  %s8551_s7 = sld [smem:[#allocation72_spill]] }
 0x2b0   : > { %5769 = vmatpush3.bf16.msra.mxu0 %v6304_v3  ;;  %5789 = vmatpush3.bf16.msra.mxu1 %v6305_v4  ;;  %v1353_v19 = vpack.c.bf16 %v1348_v16, %v1348_v16  ;;  %v6319_v20 = vld [vmem:[#allocation17 + $0x8] sm:$0xff]   ;;  %v6320_v21 = vld [vmem:[#allocation17 + $0x10] sm:$0xff]   ;;  %v6321_v22 = vld [vmem:[#allocation17 + $0x18] sm:$0xff]   ;;  %v7986_v53 = vsub.s32 %v1702_v47, %v7983_v48  ;;  %s8552_s3 = sld [smem:[#allocation76_spill]]  ;;  %s8555_s15 = sld [smem:[#allocation77_spill]] }
 0x2b1   : > { %5770 = vmatprep.subr.bf16.mxu0 %v7280_v0  ;;  %5790 = vmatprep.subr.bf16.mxu1 %v7280_v0  ;;  %v6323_v24 = vld [vmem:[#allocation17 + $0x28] sm:$0xff]   ;;  %v6324_v25 = vld [vmem:[#allocation17 + $0x30] sm:$0xff]   ;;  %v6325_v26 = vld [vmem:[#allocation17 + $0x38] sm:$0xff]   ;;  %v7991_v62 = vsub.s32 %v1734_v56, %v7983_v48  ;;  %p8556_p7 = scmp.ne.s32.totalorder %s8503_s11, 0 }
 0x2b2   : > { %v5457_v37 = vld [vmem:[#allocation19] ss:$0 sm:$0xff] }
 0x2b4   : > { %5771 = vmatpush3.bf16.msra.mxu0 %v6306_v5  ;;  %5791 = vmatpush3.bf16.msra.mxu1 %v6307_v6 }
 0x2b5   : > { %5772 = vmatprep.subr.bf16.mxu0 %v7280_v0  ;;  %5792 = vmatprep.subr.bf16.mxu1 %v7280_v0 }
 0x2b8   : > { %5773 = vmatpush3.bf16.msra.mxu0 %v6308_v7  ;;  %5793 = vmatpush3.bf16.msra.mxu1 %v6309_v8 }
 0x2b9   : > { %5774 = vmatprep.subr.bf16.mxu0 %v7280_v0  ;;  %5794 = vmatprep.subr.bf16.mxu1 %v7280_v0 }
 0x2bc   : > { %5775 = vmatpush3.bf16.msra.mxu0 %v6310_v9  ;;  %5795 = vmatpush3.bf16.msra.mxu1 %v6311_v10 }
 0x2bd   : > { %5776 = vmatprep.subr.bf16.mxu0 %v7280_v0  ;;  %5796 = vmatprep.subr.bf16.mxu1 %v7280_v0 }
 0x2c0   : > { %5777 = vmatpush3.bf16.msra.mxu0 %v6312_v11  ;;  %5797 = vmatpush3.bf16.msra.mxu1 %v6313_v12 }
 0x2c1   : > { %5778 = vmatprep.subr.bf16.mxu0 %v7280_v0  ;;  %5798 = vmatprep.subr.bf16.mxu1 %v7280_v0 }
 0x2c4   : > { %5779 = vmatpush3.bf16.msra.mxu0 %v6314_v13  ;;  %5799 = vmatpush3.bf16.msra.mxu1 %v6315_v14 }
 0x2c5   : > { %5780 = vmatprep.subr.bf16.mxu0 %v7280_v0  ;;  %5800 = vmatprep.subr.bf16.mxu1 %v7280_v0 }
 0x2c8   : > { %5781 = vmatpush3.bf16.msra.mxu0 %v6316_v15  ;;  %5801 = vmatpush3.bf16.msra.mxu1 %v6317_v17 }
 0x2c9   : > { %5806 = vmatprep.subr.bf16.mxu0 %v7280_v0  ;;  %5826 = vmatprep.subr.bf16.mxu1 %v7280_v0 }
 0x2cb   : > { %5783 = vmatmul.mubr.bf16.vlgmr.msra.gmra.mrb[0].mxu0 %v1353_v19  ;;  %5803 = vmatmul.mubr.bf16.vlgmr.msra.gmra.mrb[0].mxu1 %v1353_v19 }
 0x2cc   : > { %5807 = vmatpush3.bf16.msra.mxu0 %v6318_v18  ;;  %5822 = vmatprep.mubr.msk.bf16.mxu0 %vm7281_vm0, %v7280_v0 }
 0x2cd   : > { %5808 = vmatprep.subr.bf16.mxu0 %v7280_v0  ;;  %5828 = vmatprep.mubr.msk.bf16.mxu1 %vm7281_vm0, %v7280_v0 }
 0x2d0   : > { %5809 = vmatpush3.bf16.msra.mxu0 %v6319_v20 }
 0x2d1   : > { %5810 = vmatprep.subr.bf16.mxu0 %v7280_v0 }
 0x2d4   : > { %5811 = vmatpush3.bf16.msra.mxu0 %v6320_v21 }
 0x2d5   : > { %5812 = vmatprep.subr.bf16.mxu0 %v7280_v0 }
 0x2d8   : > { %5813 = vmatpush3.bf16.msra.mxu0 %v6321_v22 }
 0x2d9   : > { %5814 = vmatprep.subr.bf16.mxu0 %v7280_v0 }
 0x2dc   : > { %5815 = vmatpush3.bf16.msra.mxu0 %v6322_v23 }
 0x2dd   : > { %5816 = vmatprep.subr.bf16.mxu0 %v7280_v0 }
 0x2e0   : > { %5817 = vmatpush3.bf16.msra.mxu0 %v6323_v24 }
 0x2e1   : > { %5818 = vmatprep.subr.bf16.mxu0 %v7280_v0 }
 0x2e4   : > { %5819 = vmatpush3.bf16.msra.mxu0 %v6324_v25 }
 0x2e5   : > { %5820 = vmatprep.subr.bf16.mxu0 %v7280_v0 }
 0x2e8   : > { %5821 = vmatpush3.bf16.msra.mxu0 %v6325_v26 }
 0x2e9   : > { %5874 = vmatprep.subr.bf16.mxu0 %v7280_v0 }
 0x2eb   : > { %5823 = vmatmul.mubr.bf16.vlgmr.msra.gmra.mrb[4].mxu0 %v1353_v19 }
 0x2ec   : > { %5890 = vmatprep.mubr.msk.bf16.mxu0 %vm7281_vm0, %v7280_v0 }
 0x39e   : > { %v7975_v28 = vpop.f32.mrb[0].mxu0  ;;  %v1570_v29 = vpop.f32.mrb[0].mxu1 }
 0x39f   : > { %v5784_v30 = vpop.f32.mrb[1].mxu0  ;;  %v1571_v31 = vadd.f32 %v5448_v27, %v1570_v29  ;;  %v5804_v33 = vpop.f32.mrb[1].mxu1 }
 0x3a0   : > { %v1462_v32 = vpop.f32.mrb[2].mxu0  ;;  %v1573_v35 = vpop.f32.mrb[2].mxu1 }
 0x3a1   : > { %v5785_v34 = vpop.f32.mrb[3].mxu0  ;;  %1839 = vrot.lane.b32.xlu0 %v1571_v31, %s7282_s27  ;;  %1845 = vrot.lane.b32.xlu1 %v1571_v31, %s7283_s4  ;;  %v5805_v36 = vpop.f32.mrb[3].mxu1 }
 0x3a5   : > { %1842 = vrot.lane.b32.xlu0 %v1571_v31, %s7284_s16 }
 0x3be   : > { %v1681_v38 = vpop.f32.mrb[4].mxu0 }
 0x3bf   : > { %v1682_v39 = vadd.f32 %v5457_v37, %v1681_v38  ;;  %v5824_v40 = vpop.f32.mrb[5].mxu0 }
 0x3c0   : > { %v1684_v41 = vpop.f32.mrb[6].mxu0 }
 0x3c1   : > { %v1687_v42 = vmul.f32 0.088388346, %v1682_v39  ;;  %v5825_v43 = vpop.f32.mrb[7].mxu0 }
 0x3c3   : > { %1692 = vrot.lane.b32.xlu0 %v1687_v42, %s7284_s16  ;;  %1689 = vrot.lane.b32.xlu1 %v1687_v42, %s7282_s27 }
 0x3c7   : > { %1695 = vrot.lane.b32.xlu1 %v1687_v42, %s7283_s4 }
 0x413   : > { %v1840_v51 = vpop.permute.xlu0 %1839  ;;  %v1846_v52 = vpop.permute.xlu1 %1845 }
 0x414   : > { %v1864_v54 = vcombine.low %v1840_v51, %v1846_v52  ;;  %v1865_v55 = vcombine.high %v1840_v51, %v1846_v52 }
 0x416   : > { %v1872_v58 = vrot.slane %v1864_v54, %v7986_v53  ;;  %v1879_v59 = vrot.slane %v1865_v55, %v7986_v53 }
 0x417   : > { %v1843_v57 = vpop.permute.xlu0 %1842 }
 0x418   : > { %v1848_v60 = vcombine.low %v1571_v31, %v1843_v57  ;;  %v1849_v61 = vcombine.high %v1571_v31, %v1843_v57 }
 0x41a   : > { %v1856_v63 = vrot.slane %v1848_v60, %v7986_v53  ;;  %v1863_v1 = vrot.slane %v1849_v61, %v7986_v53 }
 0x41c   : > { %v1880_v2 = vcombine.low %v1856_v63, %v1872_v58  ;;  %v1881_v3 = vcombine.high %v1856_v63, %v1872_v58  ;;  %v1896_v4 = vcombine.low %v1863_v1, %v1879_v59  ;;  %v1897_v5 = vcombine.high %v1863_v1, %v1879_v59 }
 0x41e   : > { %v1888_v6 = vrot.slane %v1880_v2, %v7991_v62  ;;  %v1895_v7 = vrot.slane %v1881_v3, %v7991_v62  ;;  %v1904_v8 = vrot.slane %v1896_v4, %v7991_v62  ;;  %v1911_v9 = vrot.slane %v1897_v5, %v7991_v62 }
 0x420   : > { %v1916_v10 = vcombine.low %v1888_v6, %v1895_v7  ;;  %v5468_v11 = vcombine.high %v1888_v6, %v1895_v7  ;;  %v1932_v12 = vcombine.low %v1904_v8, %v1911_v9  ;;  %v5469_v13 = vcombine.high %v1904_v8, %v1911_v9 }
 0x422   : > { %v1923_v14 = vrot.slane %v1916_v10, %v7986_v53  ;;  %v1931_v15 = vrot.slane %v5468_v11, %v7986_v53  ;;  %v1939_v16 = vrot.slane %v1932_v12, %v7986_v53  ;;  %v1947_v17 = vrot.slane %v5469_v13, %v7986_v53 }
 0x424   : > { %v1948_v18 = vcombine.low %v1923_v14, %v1931_v15  ;;  %v1964_v19 = vcombine.low %v1939_v16, %v1947_v17  ;;  %v1949_v55 = vcombine.high %v1923_v14, %v1931_v15  ;;  %v1965_v59 = vcombine.high %v1939_v16, %v1947_v17 }
 0x426   : > { %v1956_v20 = vrot.slane %v1948_v18, %v7991_v62  ;;  %v1972_v21 = vrot.slane %v1964_v19, %v7991_v62  ;;  %v1963_v2 = vrot.slane %v1949_v55, %v7991_v62  ;;  %v1979_v3 = vrot.slane %v1965_v59, %v7991_v62 }
 0x428   : > { %v1980_v22 = vcombine.low %v1956_v20, %v1972_v21  ;;  %v1981_v58 = vcombine.high %v1956_v20, %v1972_v21  ;;  %v1982_v6 = vcombine.low %v1963_v2, %v1979_v3  ;;  %v1983_v15 = vcombine.high %v1963_v2, %v1979_v3 }
 0x42a   : > { %v1984_v23 = vpack.c.bf16 %v1980_v22, %v1980_v22  ;;  %v1985_v1 = vpack.c.bf16 %v1981_v58, %v1981_v58  ;;  %v1986_v10 = vpack.c.bf16 %v1982_v6, %v1982_v6  ;;  %v1987_v17 = vpack.c.bf16 %v1983_v15, %v1983_v15  ;;  %v1352_v22 = vld [vmem:[%s1180_s9] sm:$0xff]  ;;  %s1346_s9 = scalar_lea.vmem [#allocation37], %s7880_s1 }
 0x42c   : > { %v2143_v24 = vsel %vm2138_vm1, %v1984_v23, 0  ;;  %v2189_v5 = vsel %vm2138_vm1, %v1985_v1, 0  ;;  %v2235_v14 = vsel %vm2138_vm1, %v1986_v10, 0  ;;  %v2281_v19 = vsel %vm2138_vm1, %v1987_v17, 0 }
 0x42d   : > { %5827 = vmatpush3.bf16.xpose.msra.mxu1 %v2143_v24 }
 0x42e   : > { %5832 = vmatprep.subr.bf16.mxu1 %v7280_v0 }
 0x435   : > { %v1693_v25 = vpop.permute.xlu0 %1692  ;;  %v1690_v26 = vpop.permute.xlu1 %1689 }
 0x436   : > { %v1698_v27 = vcombine.low %v1687_v42, %v1693_v25  ;;  %v1699_v29 = vcombine.high %v1687_v42, %v1693_v25 }
 0x438   : > { %v1706_v33 = vrot.slane %v1698_v27, %v7986_v53  ;;  %v1713_v34 = vrot.slane %v1699_v29, %v7986_v53 }
 0x439   : > { %v1696_v30 = vpop.permute.xlu1 %1695 }
 0x43a   : > { %v1714_v31 = vcombine.low %v1690_v26, %v1696_v30  ;;  %v1715_v32 = vcombine.high %v1690_v26, %v1696_v30 }
 0x43c   : > { %v1722_v35 = vrot.slane %v1714_v31, %v7986_v53  ;;  %v1729_v36 = vrot.slane %v1715_v32, %v7986_v53 }
 0x43e   : > { %v1730_v37 = vcombine.low %v1706_v33, %v1722_v35  ;;  %v1731_v38 = vcombine.high %v1706_v33, %v1722_v35  ;;  %v1746_v39 = vcombine.low %v1713_v34, %v1729_v36  ;;  %v1747_v40 = vcombine.high %v1713_v34, %v1729_v36 }
 0x440   : > { %v1738_v41 = vrot.slane %v1730_v37, %v7991_v62  ;;  %v1745_v43 = vrot.slane %v1731_v38, %v7991_v62  ;;  %v1754_v42 = vrot.slane %v1746_v39, %v7991_v62  ;;  %v1761_v44 = vrot.slane %v1747_v40, %v7991_v62 }
 0x442   : > { %v1766_v45 = vcombine.low %v1738_v41, %v1745_v43  ;;  %v5466_v46 = vcombine.high %v1738_v41, %v1745_v43  ;;  %v1782_v47 = vcombine.low %v1754_v42, %v1761_v44  ;;  %v5467_v49 = vcombine.high %v1754_v42, %v1761_v44  ;;  %v5439_v43 = vld [vmem:[#allocation13] ss:$0 sm:$0xff] }
 0x444   : > { %v1773_v50 = vrot.slane %v1766_v45, %v7986_v53  ;;  %v1781_v51 = vrot.slane %v5466_v46, %v7986_v53  ;;  %v1789_v52 = vrot.slane %v1782_v47, %v7986_v53  ;;  %v1797_v54 = vrot.slane %v5467_v49, %v7986_v53 }
 0x445   : > { %v1460_v47 = vadd.f32 %v5439_v43, %v7975_v28 }
 0x446   : > { %v1798_v56 = vcombine.low %v1773_v50, %v1781_v51  ;;  %v1814_v57 = vcombine.low %v1789_v52, %v1797_v54  ;;  %v1799_v7 = vcombine.high %v1773_v50, %v1781_v51  ;;  %v1815_v8 = vcombine.high %v1789_v52, %v1797_v54 }
 0x448   : > { %v1806_v60 = vrot.slane %v1798_v56, %v7991_v62  ;;  %v1822_v61 = vrot.slane %v1814_v57, %v7991_v62  ;;  %v1813_v12 = vrot.slane %v1799_v7, %v7991_v62  ;;  %v1829_v13 = vrot.slane %v1815_v8, %v7991_v62 }
 0x44a   : > { %v1830_v63 = vcombine.low %v1806_v60, %v1822_v61  ;;  %v1831_v9 = vcombine.high %v1806_v60, %v1822_v61  ;;  %v1832_v16 = vcombine.low %v1813_v12, %v1829_v13  ;;  %v1833_v20 = vcombine.high %v1813_v12, %v1829_v13 }
 0x44c   : > { %v1834_v4 = vpack.c.bf16 %v1830_v63, %v1830_v63  ;;  %v1835_v11 = vpack.c.bf16 %v1831_v9, %v1831_v9  ;;  %v1836_v18 = vpack.c.bf16 %v1832_v16, %v1832_v16  ;;  %v1837_v21 = vpack.c.bf16 %v1833_v20, %v1833_v20 }
 0x44e   : > { %5829 = vmatmul.mubr.msk.bf16.vlgmr.msra.gmra.mrb[4].mxu1 %vm2138_vm1, %v1834_v4 }
 0x44f   : > { %5833 = vmatpush3.bf16.xpose.msra.mxu1 %v2189_v5  ;;  %5834 = vmatprep.mubr.msk.bf16.mxu1 %vm7281_vm0, %v7280_v0 }
 0x450   : > { %5838 = vmatprep.subr.bf16.mxu1 %v7280_v0 }
 0x456   : > { %5835 = vmatmul.mubr.msk.bf16.vlgmr.msra.gmra.mrb[8].mxu1 %vm2138_vm1, %v1835_v11 }
 0x457   : > { %5839 = vmatpush3.bf16.xpose.msra.mxu1 %v2235_v14  ;;  %5840 = vmatprep.mubr.msk.bf16.mxu1 %vm7281_vm0, %v7280_v0 }
 0x458   : > { %5844 = vmatprep.subr.bf16.mxu1 %v7280_v0 }
 0x45e   : > { %5841 = vmatmul.mubr.msk.bf16.vlgmr.msra.gmra.mrb[12].mxu1 %vm2138_vm1, %v1836_v18 }
 0x45f   : > { %5845 = vmatpush3.bf16.xpose.msra.mxu1 %v2281_v19  ;;  %5846 = vmatprep.mubr.msk.bf16.mxu1 %vm7281_vm0, %v7280_v0 }
 0x460   : > { %5850 = vmatprep.subr.bf16.mxu1 %v7280_v0 }
 0x466   : > { %5847 = vmatmul.mubr.msk.bf16.vlgmr.msra.gmra.mrb[16].mxu1 %vm2138_vm1, %v1837_v21 }
 0x467   : > { %5852 = vmatprep.mubr.msk.bf16.mxu1 %vm7281_vm0, %v7280_v0 }
 0x521   : > { %v2179_v23 = vpop.f32.mrb[4].mxu1 }
 0x522   : > { %v2180_v24 = vadd.f32 %v2179_v23, %v1352_v22  ;;  %v5830_v25 = vpop.f32.mrb[5].mxu1 }
 0x523   : > { %v2182_v26 = vpop.f32.mrb[6].mxu1 }
 0x524   : > { %v5831_v27 = vpop.f32.mrb[7].mxu1  ;;  %v2324_v29 = vsel %vm2323_vm2, %v2180_v24, -inf }
 0x525   : > { %2325 = vmax.xlane.f32.xlu0 %v2324_v29 }
 0x529   : > { %v2225_v30 = vpop.f32.mrb[8].mxu1 }
 0x52a   : > { %v2226_v31 = vadd.f32 %v2225_v30, %v1352_v22  ;;  %v5836_v32 = vpop.f32.mrb[9].mxu1 }
 0x52b   : > { %v2228_v33 = vpop.f32.mrb[10].mxu1 }
 0x52c   : > { %v5837_v34 = vpop.f32.mrb[11].mxu1  ;;  %v2327_v35 = vsel %vm2323_vm2, %v2226_v31, -inf }
 0x52d   : > { %2328 = vmax.xlane.f32.xlu1 %v2327_v35 }
 0x531   : > { %v2271_v36 = vpop.f32.mrb[12].mxu1 }
 0x532   : > { %v2272_v37 = vadd.f32 %v2271_v36, %v1352_v22  ;;  %v5842_v38 = vpop.f32.mrb[13].mxu1 }
 0x533   : > { %v2274_v39 = vpop.f32.mrb[14].mxu1 }
 0x534   : > { %v5843_v40 = vpop.f32.mrb[15].mxu1  ;;  %v2330_v41 = vsel %vm2323_vm2, %v2272_v37, -inf }
 0x535   : > { %2331 = vmax.xlane.f32.xlu0 %v2330_v41 }
 0x539   : > { %v2317_v42 = vpop.f32.mrb[16].mxu1 }
 0x53a   : > { %v2318_v44 = vadd.f32 %v2317_v42, %v1352_v22  ;;  %v5848_v45 = vpop.f32.mrb[17].mxu1 }
 0x53b   : > { %v2320_v46 = vpop.f32.mrb[18].mxu1 }
 0x53c   : > { %v5849_v49 = vpop.f32.mrb[19].mxu1  ;;  %v2333_v50 = vsel %vm2323_vm2, %v2318_v44, -inf }
 0x53d   : > { %2334 = vmax.xlane.f32.xlu0 %v2333_v50 }
 0x53e   : > { %1992 = vrot.lane.b32.xlu1 %v1460_v47, %s7284_s16 }
 0x553   : > { %1989 = vrot.lane.b32.xlu0 %v1460_v47, %s7282_s27 }
 0x5b2   : > { %v2326_v51 = vpop.xlane.xlu0 %2325 }
 0x5b3   : > { %v2336_v52 = vsub.f32 %v2180_v24, %v2326_v51 }
 0x5b5   : > { %v2340_v54 = vmul.f32 1.442695, %v2336_v52 }
 0x5b7   : > { %6446 = vpow2.f32 %v2340_v54 }
 0x5ba   : > { %v2329_v55 = vpop.xlane.xlu1 %2328 }
 0x5bb   : > { %v2337_v56 = vsub.f32 %v2226_v31, %v2329_v55 }
 0x5bd   : > { %v2342_v57 = vmul.f32 1.442695, %v2337_v56 }
 0x5be   : > { %v1993_v9 = vpop.permute.xlu1 %1992 }
 0x5bf   : > { %6448 = vpow2.f32 %v2342_v57  ;;  %v1998_v11 = vcombine.low %v1460_v47, %v1993_v9  ;;  %v1999_v12 = vcombine.high %v1460_v47, %v1993_v9 }
 0x5c1   : > { %v6447_v58 = vpop.eup %6446  ;;  %v2006_v17 = vrot.slane %v1998_v11, %v7986_v53  ;;  %v2013_v18 = vrot.slane %v1999_v12, %v7986_v53 }
 0x5c2   : > { %v2348_v59 = vsel %vm2323_vm2, %v6447_v58, 0.0  ;;  %v2332_v28 = vpop.xlane.xlu0 %2331 }
 0x5c3   : > { %2349 = vadd.xlane.f32.xlu1 %v2348_v59  ;;  %v2338_v5 = vsub.f32 %v2272_v37, %v2332_v28 }
 0x5c5   : > { %v2344_v6 = vmul.f32 1.442695, %v2338_v5 }
 0x5c9   : > { %v8053_v60 = vpop.eup %6448 }
 0x5ca   : > { %v2335_v61 = vpop.xlane.xlu0 %2334  ;;  %v2351_v63 = vsel %vm2323_vm2, %v8053_v60, 0.0 }
 0x5cb   : > { %v2339_v1 = vsub.f32 %v2318_v44, %v2335_v61  ;;  %2352 = vadd.xlane.f32.xlu0 %v2351_v63 }
 0x5cd   : > { %v2346_v2 = vmul.f32 1.442695, %v2339_v1 }
 0x5ce   : > { %v1990_v13 = vpop.permute.xlu0 %1989 }
 0x5cf   : > { %6450 = vpow2.f32 %v2346_v2 }
 0x5d0   : > { %6452 = vpow2.f32 %v2344_v6 }
 0x5d4   : > { %1995 = vrot.lane.b32.xlu1 %v1460_v47, %s7283_s4 }
 0x5d9   : > { %v8058_v3 = vpop.eup %6450 }
 0x5da   : > { %v2357_v4 = vsel %vm2323_vm2, %v8058_v3, 0.0  ;;  %v8062_v7 = vpop.eup %6452 }
 0x5db   : > { %2358 = vadd.xlane.f32.xlu0 %v2357_v4  ;;  %v2354_v8 = vsel %vm2323_vm2, %v8062_v7, 0.0 }
 0x5f8   : > { %2355 = vadd.xlane.f32.xlu1 %v2354_v8 }
 0x650   : > { %v2350_v10 = vpop.xlane.xlu1 %2349 }
 0x651   : > { %6454 = vrcp.f32 %v2350_v10 }
 0x654   : > { %v1996_v14 = vpop.permute.xlu1 %1995 }
 0x655   : > { %v2014_v15 = vcombine.low %v1990_v13, %v1996_v14  ;;  %v2015_v16 = vcombine.high %v1990_v13, %v1996_v14  ;;  %v6327_v14 = vld [vmem:[#allocation20 + $0x8] sm:$0xff]  }
 0x657   : > { %v2022_v19 = vrot.slane %v2014_v15, %v7986_v53  ;;  %v2029_v20 = vrot.slane %v2015_v16, %v7986_v53  ;;  %v6328_v15 = vld [vmem:[#allocation20 + $0x10] sm:$0xff]   ;;  %v6329_v16 = vld [vmem:[#allocation20 + $0x18] sm:$0xff]  }
 0x658   : > { %v2353_v38 = vpop.xlane.xlu0 %2352 }
 0x659   : > { %v2030_v21 = vcombine.low %v2006_v17, %v2022_v19  ;;  %v2031_v22 = vcombine.high %v2006_v17, %v2022_v19  ;;  %v2046_v23 = vcombine.low %v2013_v18, %v2029_v20  ;;  %v2047_v24 = vcombine.high %v2013_v18, %v2029_v20  ;;  %v6331_v17 = vld [vmem:[#allocation20 + $0x28] sm:$0xff]  }
 0x65a   : > { %6456 = vrcp.f32 %v2353_v38 }
 0x65b   : > { %v2038_v25 = vrot.slane %v2030_v21, %v7991_v62  ;;  %v2045_v26 = vrot.slane %v2031_v22, %v7991_v62  ;;  %v2054_v27 = vrot.slane %v2046_v23, %v7991_v62  ;;  %v2061_v29 = vrot.slane %v2047_v24, %v7991_v62  ;;  %v6455_v42 = vpop.eup %6454 }
 0x65c   : > { %v2364_v49 = vmul.f32 %v6455_v42, %v6447_v58 }
 0x65d   : > { %v2066_v30 = vcombine.low %v2038_v25, %v2045_v26  ;;  %v5470_v31 = vcombine.high %v2038_v25, %v2045_v26  ;;  %v2082_v32 = vcombine.low %v2054_v27, %v2061_v29  ;;  %v5471_v33 = vcombine.high %v2054_v27, %v2061_v29 }
 0x65e   : > { %v2368_v56 = vpack.c.bf16 %v2364_v49, %v2364_v49 }
 0x65f   : > { %v2073_v34 = vrot.slane %v2066_v30, %v7986_v53  ;;  %v2081_v35 = vrot.slane %v5470_v31, %v7986_v53  ;;  %v2089_v36 = vrot.slane %v2082_v32, %v7986_v53  ;;  %v2097_v37 = vrot.slane %v5471_v33, %v7986_v53 }
 0x661   : > { %v2098_v39 = vcombine.low %v2073_v34, %v2081_v35  ;;  %v2114_v40 = vcombine.low %v2089_v36, %v2097_v37  ;;  %v2099_v46 = vcombine.high %v2073_v34, %v2081_v35  ;;  %v2115_v47 = vcombine.high %v2089_v36, %v2097_v37 }
 0x663   : > { %v2106_v41 = vrot.slane %v2098_v39, %v7991_v62  ;;  %v2122_v43 = vrot.slane %v2114_v40, %v7991_v62  ;;  %v2113_v54 = vrot.slane %v2099_v46, %v7991_v62  ;;  %v2129_v55 = vrot.slane %v2115_v47, %v7991_v62  ;;  %v6332_v47 = vld [vmem:[#allocation20 + $0x30] sm:$0xff]  }
 0x664   : > { %v6457_v57 = vpop.eup %6456 }
 0x665   : > { %v2130_v44 = vcombine.low %v2106_v41, %v2122_v43  ;;  %v2131_v45 = vcombine.high %v2106_v41, %v2122_v43  ;;  %v2132_v28 = vcombine.low %v2113_v54, %v2129_v55  ;;  %v2365_v58 = vmul.f32 %v6457_v57, %v8053_v60 }
 0x666   : > { %v2133_v5 = vcombine.high %v2113_v54, %v2129_v55 }
 0x667   : > { %v2134_v50 = vpack.c.bf16 %v2130_v44, %v2130_v44  ;;  %v2135_v52 = vpack.c.bf16 %v2131_v45, %v2131_v45  ;;  %v2136_v61 = vpack.c.bf16 %v2132_v28, %v2132_v28  ;;  %v2369_v63 = vpack.c.bf16 %v2365_v58, %v2365_v58 }
 0x668   : > { %v2359_v4 = vpop.xlane.xlu0 %2358  ;;  %v2137_v8 = vpack.c.bf16 %v2133_v5, %v2133_v5 }
 0x669   : > { %v2377_v51 = vsel %vm2375_vm3, %v2134_v50, 0  ;;  %v2423_v59 = vsel %vm2375_vm3, %v2135_v52, 0  ;;  %v2469_v1 = vsel %vm2375_vm3, %v2136_v61, 0 }
 0x66a   : > { %5851 = vmatpush3.bf16.msra.mxu1 %v2377_v51  ;;  %v2515_v11 = vsel %vm2375_vm3, %v2137_v8, 0 }
 0x66b   : > { %5856 = vmatprep.subr.bf16.mxu1 %v7280_v0 }
 0x66d   : > { %5853 = vmatmul.mubr.msk.bf16.vlgmr.msra.gmra.mrb[20].mxu1 %vm2323_vm2, %v2368_v56 }
 0x66e   : > { %5857 = vmatpush3.bf16.msra.mxu1 %v2423_v59  ;;  %5858 = vmatprep.mubr.msk.bf16.mxu1 %vm7281_vm0, %v7280_v0  ;;  %v6333_v59 = vld [vmem:[#allocation20 + $0x38] sm:$0xff]  }
 0x66f   : > { %5862 = vmatprep.subr.bf16.mxu1 %v7280_v0 }
 0x675   : > { %5859 = vmatmul.mubr.msk.bf16.vlgmr.msra.gmra.mrb[24].mxu1 %vm2323_vm2, %v2369_v63 }
 0x676   : > { %5863 = vmatpush3.bf16.msra.mxu1 %v2469_v1  ;;  %5864 = vmatprep.mubr.msk.bf16.mxu1 %vm7281_vm0, %v7280_v0 }
 0x677   : > { %5868 = vmatprep.subr.bf16.mxu1 %v7280_v0 }
 0x685   : > { %v2356_v2 = vpop.xlane.xlu1 %2355 }
 0x686   : > { %6458 = vrcp.f32 %v2356_v2 }
 0x687   : > { %6460 = vrcp.f32 %v2359_v4 }
 0x690   : > { %v6459_v60 = vpop.eup %6458 }
 0x691   : > { %v2366_v6 = vmul.f32 %v6459_v60, %v8062_v7  ;;  %v6461_v10 = vpop.eup %6460  ;;  %v6326_v7 = vld [vmem:[#allocation20] sm:$0xff]  }
 0x692   : > { %v2367_v12 = vmul.f32 %v6461_v10, %v8058_v3  ;;  %5875 = vmatpush3.bf16.msra.mxu0 %v6326_v7  ;;  %v6330_v3 = vld [vmem:[#allocation20 + $0x20] sm:$0xff]  }
 0x693   : > { %v2370_v9 = vpack.c.bf16 %v2366_v6, %v2366_v6  ;;  %5876 = vmatprep.subr.bf16.mxu0 %v7280_v0 }
 0x694   : > { %v2371_v13 = vpack.c.bf16 %v2367_v12, %v2367_v12 }
 0x695   : > { %5865 = vmatmul.mubr.msk.bf16.vlgmr.msra.gmra.mrb[28].mxu1 %vm2323_vm2, %v2370_v9 }
 0x696   : > { %5869 = vmatpush3.bf16.msra.mxu1 %v2515_v11  ;;  %5870 = vmatprep.mubr.msk.bf16.mxu1 %vm7281_vm0, %v7280_v0 }
 0x697   : > { %5894 = vmatprep.subr.bf16.mxu1 %v7280_v0  ;;  %5877 = vmatpush3.bf16.msra.mxu0 %v6327_v14 }
 0x698   : > { %5878 = vmatprep.subr.bf16.mxu0 %v7280_v0 }
 0x69b   : > { %5879 = vmatpush3.bf16.msra.mxu0 %v6328_v15 }
 0x69c   : > { %5880 = vmatprep.subr.bf16.mxu0 %v7280_v0 }
 0x69d   : > { %5871 = vmatmul.mubr.msk.bf16.vlgmr.msra.gmra.mrb[32].mxu1 %vm2323_vm2, %v2371_v13 }
 0x69e   : > { %5910 = vmatprep.mubr.msk.bf16.mxu1 %vm7281_vm0, %v7280_v0 }
 0x69f   : > { %5881 = vmatpush3.bf16.msra.mxu0 %v6329_v16 }
 0x6a0   : > { %5882 = vmatprep.subr.bf16.mxu0 %v7280_v0 }
 0x6a3   : > { %5883 = vmatpush3.bf16.msra.mxu0 %v6330_v3 }
 0x6a4   : > { %5884 = vmatprep.subr.bf16.mxu0 %v7280_v0 }
 0x6a7   : > { %5885 = vmatpush3.bf16.msra.mxu0 %v6331_v17 }
 0x6a8   : > { %5886 = vmatprep.subr.bf16.mxu0 %v7280_v0 }
 0x6ab   : > { %5887 = vmatpush3.bf16.msra.mxu0 %v6332_v47 }
 0x6ac   : > { %5888 = vmatprep.subr.bf16.mxu0 %v7280_v0 }
 0x6af   : > { %5889 = vmatpush3.bf16.msra.mxu0 %v6333_v59  ;;  %v6354_v59 = vld [vmem:[#allocation31 + $0x20] sm:$0xff]  }
 0x6b0   : > { %5914 = vmatprep.subr.bf16.mxu0 %v7280_v0 }
 0x740   : > { %v2413_v18 = vpop.f32.mrb[20].mxu1 }
 0x741   : > { %v5854_v19 = vpop.f32.mrb[21].mxu1 }
 0x742   : > { %v2416_v20 = vpop.f32.mrb[22].mxu1  ;;  %v5482_v19 = vld [vmem:[#allocation22] ss:$0 sm:$0xff] }
 0x743   : > { %v5855_v21 = vpop.f32.mrb[23].mxu1 }
 0x748   : > { %v2459_v22 = vpop.f32.mrb[24].mxu1 }
 0x749   : > { %v5860_v23 = vpop.f32.mrb[25].mxu1 }
 0x74a   : > { %v2462_v24 = vpop.f32.mrb[26].mxu1 }
 0x74b   : > { %v5861_v25 = vpop.f32.mrb[27].mxu1 }
 0x74c   : > { %v6484_v25 = vld [vmem:[%s1144_s13] sm:$0xff]  ;;  %s8550_s13 = sld [smem:[#allocation71_spill]] }
 0x768   : > { %v2505_v26 = vpop.f32.mrb[28].mxu1 }
 0x769   : > { %v2557_v27 = vcombine.low %v2413_v18, %v2505_v26  ;;  %v2558_v29 = vcombine.high %v2413_v18, %v2505_v26  ;;  %v5866_v30 = vpop.f32.mrb[29].mxu1 }
 0x76a   : > { %v2508_v31 = vpop.f32.mrb[30].mxu1  ;;  %v6342_v30 = vld [vmem:[#allocation26] sm:$0xff]  }
 0x76b   : > { %v5867_v32 = vpop.f32.mrb[31].mxu1  ;;  %v2565_v38 = vrot.slane %v2557_v27, %v7986_v53  ;;  %v2572_v39 = vrot.slane %v2558_v29, %v7986_v53  ;;  %v6334_v27 = vld [vmem:[%s8547_s10] sm:$0xff]   ;;  %v6335_v29 = vld [vmem:[%s8547_s10 + $0x8] sm:$0xff]   ;;  %5895 = vmatpush3.bf16.msra.mxu1 %v6342_v30 }
 0x76c   : > { %v6343_v31 = vld [vmem:[#allocation26 + $0x8] sm:$0xff]   ;;  %v6336_v32 = vld [vmem:[%s8547_s10 + $0x10] sm:$0xff]   ;;  %5896 = vmatprep.subr.bf16.mxu1 %v7280_v0 }
 0x76f   : > { %5897 = vmatpush3.bf16.msra.mxu1 %v6343_v31 }
 0x770   : > { %v2551_v33 = vpop.f32.mrb[32].mxu1  ;;  %5898 = vmatprep.subr.bf16.mxu1 %v7280_v0 }
 0x771   : > { %v2573_v34 = vcombine.low %v2459_v22, %v2551_v33  ;;  %v2574_v35 = vcombine.high %v2459_v22, %v2551_v33  ;;  %v5872_v36 = vpop.f32.mrb[33].mxu1  ;;  %v6344_v33 = vld [vmem:[#allocation26 + $0x10] sm:$0xff]  }
 0x772   : > { %v2554_v37 = vpop.f32.mrb[34].mxu1  ;;  %v6338_v36 = vld [vmem:[%s8547_s10 + $0x20] sm:$0xff]  }
 0x773   : > { %v2581_v40 = vrot.slane %v2573_v34, %v7986_v53  ;;  %v2588_v41 = vrot.slane %v2574_v35, %v7986_v53  ;;  %v5873_v43 = vpop.f32.mrb[35].mxu1  ;;  %v6337_v34 = vld [vmem:[%s8547_s10 + $0x18] sm:$0xff]   ;;  %5899 = vmatpush3.bf16.msra.mxu1 %v6344_v33 }
 0x774   : > { %v6345_v35 = vld [vmem:[#allocation26 + $0x18] sm:$0xff]   ;;  %5900 = vmatprep.subr.bf16.mxu1 %v7280_v0  ;;  %v6346_v37 = vld [vmem:[#allocation26 + $0x20] sm:$0xff]  }
 0x775   : > { %v2589_v42 = vcombine.low %v2565_v38, %v2581_v40  ;;  %v2590_v44 = vcombine.high %v2565_v38, %v2581_v40  ;;  %v2605_v45 = vcombine.low %v2572_v39, %v2588_v41  ;;  %v2606_v46 = vcombine.high %v2572_v39, %v2588_v41  ;;  %v6339_v38 = vld [vmem:[%s8547_s10 + $0x28] sm:$0xff]   ;;  %v6340_v40 = vld [vmem:[%s8547_s10 + $0x30] sm:$0xff]   ;;  %v6341_v43 = vld [vmem:[%s8547_s10 + $0x38] sm:$0xff]  }
 0x776   : > { %v6347_v39 = vld [vmem:[#allocation26 + $0x28] sm:$0xff]   ;;  %v6348_v41 = vld [vmem:[#allocation26 + $0x30] sm:$0xff]  }
 0x777   : > { %v2597_v49 = vrot.slane %v2589_v42, %v7991_v62  ;;  %v2604_v50 = vrot.slane %v2590_v44, %v7991_v62  ;;  %v2613_v51 = vrot.slane %v2605_v45, %v7991_v62  ;;  %v2620_v52 = vrot.slane %v2606_v46, %v7991_v62  ;;  %5901 = vmatpush3.bf16.msra.mxu1 %v6345_v35  ;;  %v1350_v42 = vld [vmem:[%s1162_s17] sm:$0xff]  ;;  %v6349_v45 = vld [vmem:[#allocation26 + $0x38] sm:$0xff]   ;;  %s8554_s17 = sld [smem:[#allocation74_spill]] }
 0x778   : > { %5902 = vmatprep.subr.bf16.mxu1 %v7280_v0  ;;  %v2963_v44 = vpack.c.bf16 %v1350_v42, %v1350_v42  ;;  %v1349_v46 = vld [vmem:[%s1153_s18] sm:$0xff]  ;;  %s8553_s18 = sld [smem:[#allocation73_spill]] }
 0x779   : > { %v2625_v54 = vcombine.low %v2597_v49, %v2604_v50  ;;  %v5480_v55 = vcombine.high %v2597_v49, %v2604_v50  ;;  %v2641_v56 = vcombine.low %v2613_v51, %v2620_v52  ;;  %v5481_v57 = vcombine.high %v2613_v51, %v2620_v52  ;;  %v6350_v49 = vld [vmem:[#allocation31] sm:$0xff]   ;;  %v6351_v50 = vld [vmem:[#allocation31 + $0x8] sm:$0xff]  }
 0x77a   : > { %v2851_v47 = vpack.c.bf16 %v1349_v46, %v1349_v46 }
 0x77b   : > { %v2632_v28 = vrot.slane %v2625_v54, %v7986_v53  ;;  %v2640_v58 = vrot.slane %v5480_v55, %v7986_v53  ;;  %v2648_v61 = vrot.slane %v2641_v56, %v7986_v53  ;;  %v2656_v63 = vrot.slane %v5481_v57, %v7986_v53  ;;  %5903 = vmatpush3.bf16.msra.mxu1 %v6346_v37  ;;  %v6352_v56 = vld [vmem:[#allocation31 + $0x10] sm:$0xff]   ;;  %v6353_v57 = vld [vmem:[#allocation31 + $0x18] sm:$0xff]  }
 0x77c   : > { %5904 = vmatprep.subr.bf16.mxu1 %v7280_v0 }
 0x77d   : > { %v2658_v1 = vcombine.high %v2632_v28, %v2640_v58  ;;  %v2674_v2 = vcombine.high %v2648_v61, %v2656_v63  ;;  %v2657_v4 = vcombine.low %v2632_v28, %v2640_v58  ;;  %v2673_v5 = vcombine.low %v2648_v61, %v2656_v63  ;;  %v6355_v28 = vld [vmem:[#allocation31 + $0x28] sm:$0xff]   ;;  %v6356_v58 = vld [vmem:[#allocation31 + $0x30] sm:$0xff]   ;;  %v6357_v61 = vld [vmem:[#allocation31 + $0x38] sm:$0xff]  }
 0x77e   : > { %v5502_v63 = vld [vmem:[#allocation29] ss:$0 sm:$0xff] }
 0x77f   : > { %v2672_v60 = vrot.slane %v2658_v1, %v7991_v62  ;;  %v2688_v6 = vrot.slane %v2674_v2, %v7991_v62  ;;  %v2665_v8 = vrot.slane %v2657_v4, %v7991_v62  ;;  %v2681_v9 = vrot.slane %v2673_v5, %v7991_v62  ;;  %5905 = vmatpush3.bf16.msra.mxu1 %v6347_v39 }
 0x780   : > { %5906 = vmatprep.subr.bf16.mxu1 %v7280_v0 }
 0x781   : > { %v2691_v10 = vcombine.low %v2672_v60, %v2688_v6  ;;  %v2690_v11 = vcombine.high %v2665_v8, %v2681_v9  ;;  %v2692_v12 = vcombine.high %v2672_v60, %v2688_v6  ;;  %v2689_v13 = vcombine.low %v2665_v8, %v2681_v9 }
 0x783   : > { %2698 = vrot.lane.b32.xlu1 %v2691_v10, %s7284_s16  ;;  %2694 = vrot.lane.b32.xlu0 %v2690_v11, %s7283_s4 }
 0x784   : > { %5907 = vmatpush3.bf16.msra.mxu1 %v6348_v41 }
 0x785   : > { %5908 = vmatprep.subr.bf16.mxu1 %v7280_v0 }
 0x787   : > { %2702 = vrot.lane.b32.xlu1 %v2692_v12, %s7282_s27 }
 0x788   : > { %5909 = vmatpush3.bf16.msra.mxu1 %v6349_v45 }
 0x789   : > { %5934 = vmatprep.subr.bf16.mxu1 %v7280_v0 }
 0x78b   : > { %5911 = vmatmul.mubr.bf16.vlgmr.msra.gmra.mrb[36].mxu1 %v2851_v47 }
 0x78c   : > { %5935 = vmatpush3.bf16.msra.mxu1 %v6350_v49  ;;  %5950 = vmatprep.mubr.msk.bf16.mxu1 %vm7281_vm0, %v7280_v0 }
 0x78d   : > { %5936 = vmatprep.subr.bf16.mxu1 %v7280_v0 }
 0x790   : > { %5937 = vmatpush3.bf16.msra.mxu1 %v6351_v50 }
 0x791   : > { %5938 = vmatprep.subr.bf16.mxu1 %v7280_v0 }
 0x794   : > { %5939 = vmatpush3.bf16.msra.mxu1 %v6352_v56 }
 0x795   : > { %5940 = vmatprep.subr.bf16.mxu1 %v7280_v0 }
 0x798   : > { %5941 = vmatpush3.bf16.msra.mxu1 %v6353_v57 }
 0x799   : > { %5942 = vmatprep.subr.bf16.mxu1 %v7280_v0 }
 0x79c   : > { %5943 = vmatpush3.bf16.msra.mxu1 %v6354_v59 }
 0x79d   : > { %5944 = vmatprep.subr.bf16.mxu1 %v7280_v0 }
 0x7a0   : > { %5945 = vmatpush3.bf16.msra.mxu1 %v6355_v28 }
 0x7a1   : > { %5946 = vmatprep.subr.bf16.mxu1 %v7280_v0 }
 0x7a4   : > { %5947 = vmatpush3.bf16.msra.mxu1 %v6356_v58 }
 0x7a5   : > { %5948 = vmatprep.subr.bf16.mxu1 %v7280_v0 }
 0x7a8   : > { %5949 = vmatpush3.bf16.msra.mxu1 %v6357_v61 }
 0x7a9   : > { %5960 = vmatprep.subr.bf16.mxu1 %v7280_v0 }
 0x7f5   : > { %v2699_v7 = vpop.permute.xlu1 %2698  ;;  %v2695_v14 = vpop.permute.xlu0 %2694 }
 0x7f6   : > { %v2705_v15 = vsel %vm2138_vm1, %v2689_v13, %v2695_v14  ;;  %v5491_v14 = vld [vmem:[#allocation23] ss:$0 sm:$0xff] }
 0x7f7   : > { %v2707_v3 = vsel %vm2706_vm4, %v2705_v15, %v2699_v7 }
 0x7f9   : > { %v2703_v16 = vpop.permute.xlu1 %2702 }
 0x7fa   : > { %v2709_v17 = vsel %vm2708_vm5, %v2707_v3, %v2703_v16  ;;  %v5492_v16 = vld [vmem:[#allocation25] ss:$0 sm:$0xff] }
 0x7fb   : > { %v2710_v18 = vpack.c.bf16 %v2709_v17, %v2709_v17 }
 0x7fd   : > { %5891 = vmatmul.mubr.bf16.vlgmr.msra.gmra.mrb[8].mxu0 %v2710_v18 }
 0x7fe   : > { %5930 = vmatprep.mubr.msk.bf16.mxu0 %vm7281_vm0, %v7280_v0  ;;  %5915 = vmatpush3.bf16.msra.mxu0 %v6334_v27 }
 0x7ff   : > { %5916 = vmatprep.subr.bf16.mxu0 %v7280_v0 }
 0x802   : > { %5917 = vmatpush3.bf16.msra.mxu0 %v6335_v29 }
 0x803   : > { %5918 = vmatprep.subr.bf16.mxu0 %v7280_v0 }
 0x806   : > { %5919 = vmatpush3.bf16.msra.mxu0 %v6336_v32 }
 0x807   : > { %5920 = vmatprep.subr.bf16.mxu0 %v7280_v0 }
 0x80a   : > { %5921 = vmatpush3.bf16.msra.mxu0 %v6337_v34 }
 0x80b   : > { %5922 = vmatprep.subr.bf16.mxu0 %v7280_v0 }
 0x80e   : > { %5923 = vmatpush3.bf16.msra.mxu0 %v6338_v36 }
 0x80f   : > { %5924 = vmatprep.subr.bf16.mxu0 %v7280_v0 }
 0x812   : > { %5925 = vmatpush3.bf16.msra.mxu0 %v6339_v38 }
 0x813   : > { %5926 = vmatprep.subr.bf16.mxu0 %v7280_v0 }
 0x816   : > { %5927 = vmatpush3.bf16.msra.mxu0 %v6340_v40 }
 0x817   : > { %5928 = vmatprep.subr.bf16.mxu0 %v7280_v0 }
 0x81a   : > { %5929 = vmatpush3.bf16.msra.mxu0 %v6341_v43 }
 0x81b   : > { %5954 = vmatprep.subr.bf16.mxu0 %v7280_v0 }
 0x81d   : > { %5931 = vmatmul.mubr.bf16.vlgmr.msra.gmra.mrb[12].mxu0 %v2963_v44 }
 0x81e   : > { %5956 = vmatprep.mubr.msk.bf16.mxu0 %vm7281_vm0, %v7280_v0 }
 0x85e   : > { %v8185_v60 = vpop.f32.mrb[36].mxu1 }
 0x85f   : > { %v5912_v8 = vpop.f32.mrb[37].mxu1 }
 0x860   : > { %v2960_v9 = vpop.f32.mrb[38].mxu1 }
 0x861   : > { %v5913_v10 = vpop.f32.mrb[39].mxu1 }
 0x8d0   : > { %v2816_v20 = vpop.f32.mrb[8].mxu0 }
 0x8d1   : > { %v2817_v21 = vadd.f32 %v5482_v19, %v2816_v20  ;;  %v5892_v22 = vpop.f32.mrb[9].mxu0 }
 0x8d2   : > { %v2819_v23 = vpop.f32.mrb[10].mxu0 }
 0x8d3   : > { %v5893_v24 = vpop.f32.mrb[11].mxu0  ;;  %v8139_v26 = vadd.f32 %v6484_v25, %v2817_v21 }
 0x8d5   : > { %2823 = vadd.xlane.f32.xlu0 %v8139_v26 }
 0x8f0   : > { %v3069_v1 = vpop.f32.mrb[12].mxu0 }
 0x8f1   : > { %v3070_v2 = vadd.f32 %v5502_v63, %v3069_v1  ;;  %v5932_v4 = vpop.f32.mrb[13].mxu0 }
 0x8f2   : > { %v3072_v5 = vpop.f32.mrb[14].mxu0  ;;  %v5511_v4 = vld [vmem:[%s8548_s21] ss:$0 sm:$0xff] }
 0x8f3   : > { %3339 = vrot.lane.b32.xlu0 %v3070_v2, %s7282_s27  ;;  %v5933_v6 = vpop.f32.mrb[15].mxu0 }
 0x8f7   : > { %3345 = vrot.lane.b32.xlu0 %v3070_v2, %s7283_s4 }
 0x962   : > { %v2824_v51 = vpop.xlane.xlu0 %2823 }
 0x963   : > { %v2826_v52 = vmul.f32 0.0078125, %v2824_v51 }
 0x965   : > { %v2827_v54 = vsub.f32 %v8139_v26, %v2826_v52 }
 0x966   : > { %v3340_v19 = vpop.permute.xlu0 %3339 }
 0x967   : > { %v2828_v55 = vmul.f32 %v2827_v54, %v2827_v54 }
 0x969   : > { %2829 = vadd.xlane.f32.xlu1 %v2828_v55 }
 0x96a   : > { %v3346_v23 = vpop.permute.xlu0 %3345 }
 0x96b   : > { %v3364_v26 = vcombine.low %v3340_v19, %v3346_v23  ;;  %v3365_v27 = vcombine.high %v3340_v19, %v3346_v23 }
 0x96d   : > { %v3372_v29 = vrot.slane %v3364_v26, %v7986_v53  ;;  %v3379_v30 = vrot.slane %v3365_v27, %v7986_v53 }
 0x97a   : > { %3342 = vrot.lane.b32.xlu1 %v3070_v2, %s7284_s16 }
 0x9f6   : > { %v2830_v11 = vpop.xlane.xlu1 %2829 }
 0x9f7   : > { %v2831_v12 = vmul.f32 0.0078125, %v2830_v11 }
 0x9f9   : > { %v2832_v13 = vadd.f32 1e-05, %v2831_v12 }
 0x9fa   : > { %v3343_v20 = vpop.permute.xlu1 %3342 }
 0x9fb   : > { %6462 = vrsqrt.f32 %v2832_v13  ;;  %v3348_v21 = vcombine.low %v3070_v2, %v3343_v20  ;;  %v3349_v22 = vcombine.high %v3070_v2, %v3343_v20 }
 0x9fd   : > { %v3356_v24 = vrot.slane %v3348_v21, %v7986_v53  ;;  %v3363_v25 = vrot.slane %v3349_v22, %v7986_v53 }
 0x9ff   : > { %v3380_v31 = vcombine.low %v3356_v24, %v3372_v29  ;;  %v3381_v32 = vcombine.high %v3356_v24, %v3372_v29  ;;  %v3396_v33 = vcombine.low %v3363_v25, %v3379_v30  ;;  %v3397_v34 = vcombine.high %v3363_v25, %v3379_v30 }
 0xa01   : > { %v3388_v35 = vrot.slane %v3380_v31, %v7991_v62  ;;  %v3395_v36 = vrot.slane %v3381_v32, %v7991_v62  ;;  %v3404_v37 = vrot.slane %v3396_v33, %v7991_v62  ;;  %v3411_v38 = vrot.slane %v3397_v34, %v7991_v62 }
 0xa03   : > { %v3416_v39 = vcombine.low %v3388_v35, %v3395_v36  ;;  %v5522_v40 = vcombine.high %v3388_v35, %v3395_v36  ;;  %v3432_v41 = vcombine.low %v3404_v37, %v3411_v38  ;;  %v5523_v43 = vcombine.high %v3404_v37, %v3411_v38 }
 0xa05   : > { %v6463_v7 = vpop.eup %6462  ;;  %v3423_v42 = vrot.slane %v3416_v39, %v7986_v53  ;;  %v3431_v44 = vrot.slane %v5522_v40, %v7986_v53  ;;  %v3439_v45 = vrot.slane %v3432_v41, %v7986_v53  ;;  %v3447_v46 = vrot.slane %v5523_v43, %v7986_v53 }
 0xa06   : > { %v2834_v15 = vmul.f32 %v6463_v7, %v2827_v54 }
 0xa07   : > { %v3448_v47 = vcombine.low %v3423_v42, %v3431_v44  ;;  %v3464_v49 = vcombine.low %v3439_v45, %v3447_v46  ;;  %v3449_v50 = vcombine.high %v3423_v42, %v3431_v44  ;;  %v3465_v51 = vcombine.high %v3439_v45, %v3447_v46 }
 0xa08   : > { %v2842_v3 = vmul.f32 %v5491_v14, %v2834_v15 }
 0xa09   : > { %v3456_v52 = vrot.slane %v3448_v47, %v7991_v62  ;;  %v3472_v54 = vrot.slane %v3464_v49, %v7991_v62  ;;  %v3463_v55 = vrot.slane %v3449_v50, %v7991_v62  ;;  %v3479_v56 = vrot.slane %v3465_v51, %v7991_v62 }
 0xa0a   : > { %v8188_v17 = vadd.f32 %v5492_v16, %v2842_v3 }
 0xa0b   : > { %v3480_v57 = vcombine.low %v3456_v52, %v3472_v54  ;;  %v3481_v59 = vcombine.high %v3456_v52, %v3472_v54  ;;  %v8210_v28 = vcombine.low %v3463_v55, %v3479_v56  ;;  %v8212_v58 = vcombine.high %v3463_v55, %v3479_v56 }
 0xa0c   : > { %v3075_v18 = vpack.c.bf16 %v8188_v17, %v8188_v17 }
 0xa0d   : > { %v3484_v61 = vpack.c.bf16 %v3480_v57, %v3480_v57  ;;  %v3485_v63 = vpack.c.bf16 %v3481_v59, %v3481_v59  ;;  %v3486_v47 = vpack.c.bf16 %v8210_v28, %v8210_v28  ;;  %v3487_v49 = vpack.c.bf16 %v8212_v58, %v8212_v58 }
 0xa0e   : > { %5951 = vmatmul.mubr.bf16.vlgmr.msra.gmra.mrb[40].mxu1 %v3075_v18 }
 0xa0f   : > { %5962 = vmatprep.mubr.msk.bf16.mxu1 %vm7281_vm0, %v7280_v0  ;;  %v3642_v1 = vsel %vm2138_vm1, %v3484_v61, 0  ;;  %v3688_v2 = vsel %vm2138_vm1, %v3485_v63, 0  ;;  %v3734_v55 = vsel %vm2138_vm1, %v3486_v47, 0  ;;  %v3780_v56 = vsel %vm2138_vm1, %v3487_v49, 0  ;;  %v1351_v61 = vld [vmem:[%s1171_s22] sm:$0xff]  ;;  %s5615_s22 = sshll.u32 %s7475_s2, 7 }
 0xa10   : > { %5955 = vmatpush3.bf16.xpose.msra.mxu0 %v3642_v1  ;;  %5961 = vmatpush3.bf16.xpose.msra.mxu1 %v3688_v2 }
 0xa11   : > { %5966 = vmatprep.subr.bf16.mxu0 %v7280_v0  ;;  %5972 = vmatprep.subr.bf16.mxu1 %v7280_v0 }
 0xae1   : > { %v3181_v5 = vpop.f32.mrb[40].mxu1 }
 0xae2   : > { %v3182_v6 = vadd.f32 %v5511_v4, %v3181_v5  ;;  %v5952_v8 = vpop.f32.mrb[41].mxu1 }
 0xae3   : > { %v3184_v9 = vpop.f32.mrb[42].mxu1 }
 0xae4   : > { %v3187_v10 = vmul.f32 0.088388346, %v3182_v6  ;;  %v5953_v11 = vpop.f32.mrb[43].mxu1 }
 0xae6   : > { %3189 = vrot.lane.b32.xlu1 %v3187_v10, %s7282_s27  ;;  %3192 = vrot.lane.b32.xlu0 %v3187_v10, %s7284_s16 }
 0xaea   : > { %3195 = vrot.lane.b32.xlu1 %v3187_v10, %s7283_s4 }
 0xb58   : > { %v3190_v12 = vpop.permute.xlu1 %3189  ;;  %v3193_v13 = vpop.permute.xlu0 %3192 }
 0xb59   : > { %v3198_v7 = vcombine.low %v3187_v10, %v3193_v13  ;;  %v3199_v14 = vcombine.high %v3187_v10, %v3193_v13 }
 0xb5b   : > { %v3206_v18 = vrot.slane %v3198_v7, %v7986_v53  ;;  %v3213_v19 = vrot.slane %v3199_v14, %v7986_v53 }
 0xb5c   : > { %v3196_v15 = vpop.permute.xlu1 %3195 }
 0xb5d   : > { %v3214_v16 = vcombine.low %v3190_v12, %v3196_v15  ;;  %v3215_v3 = vcombine.high %v3190_v12, %v3196_v15 }
 0xb5f   : > { %v3222_v20 = vrot.slane %v3214_v16, %v7986_v53  ;;  %v3229_v21 = vrot.slane %v3215_v3, %v7986_v53 }
 0xb61   : > { %v3230_v22 = vcombine.low %v3206_v18, %v3222_v20  ;;  %v3231_v23 = vcombine.high %v3206_v18, %v3222_v20  ;;  %v3246_v24 = vcombine.low %v3213_v19, %v3229_v21  ;;  %v3247_v25 = vcombine.high %v3213_v19, %v3229_v21 }
 0xb63   : > { %v3238_v26 = vrot.slane %v3230_v22, %v7991_v62  ;;  %v3245_v27 = vrot.slane %v3231_v23, %v7991_v62  ;;  %v3254_v29 = vrot.slane %v3246_v24, %v7991_v62  ;;  %v3261_v30 = vrot.slane %v3247_v25, %v7991_v62  ;;  %v5493_v25 = vld [vmem:[#allocation28] ss:$0 sm:$0xff] }
 0xb65   : > { %v3266_v31 = vcombine.low %v3238_v26, %v3245_v27  ;;  %v5520_v32 = vcombine.high %v3238_v26, %v3245_v27  ;;  %v3282_v33 = vcombine.low %v3254_v29, %v3261_v30  ;;  %v5521_v34 = vcombine.high %v3254_v29, %v3261_v30 }
 0xb66   : > { %v2958_v26 = vadd.f32 %v5493_v25, %v8185_v60 }
 0xb67   : > { %v3273_v35 = vrot.slane %v3266_v31, %v7986_v53  ;;  %v3281_v36 = vrot.slane %v5520_v32, %v7986_v53  ;;  %v3289_v37 = vrot.slane %v3282_v33, %v7986_v53  ;;  %v3297_v38 = vrot.slane %v5521_v34, %v7986_v53 }
 0xb69   : > { %v3298_v39 = vcombine.low %v3273_v35, %v3281_v36  ;;  %v3314_v40 = vcombine.low %v3289_v37, %v3297_v38  ;;  %v3299_v41 = vcombine.high %v3273_v35, %v3281_v36  ;;  %v3315_v43 = vcombine.high %v3289_v37, %v3297_v38 }
 0xb6b   : > { %v3306_v42 = vrot.slane %v3298_v39, %v7991_v62  ;;  %v3322_v44 = vrot.slane %v3314_v40, %v7991_v62  ;;  %v3313_v52 = vrot.slane %v3299_v41, %v7991_v62  ;;  %v3329_v54 = vrot.slane %v3315_v43, %v7991_v62 }
 0xb6d   : > { %v3330_v45 = vcombine.low %v3306_v42, %v3322_v44  ;;  %v3331_v46 = vcombine.high %v3306_v42, %v3322_v44  ;;  %v3332_v57 = vcombine.low %v3313_v52, %v3329_v54  ;;  %v3333_v59 = vcombine.high %v3313_v52, %v3329_v54 }
 0xb6f   : > { %v3334_v50 = vpack.c.bf16 %v3330_v45, %v3330_v45  ;;  %v3335_v51 = vpack.c.bf16 %v3331_v46, %v3331_v46  ;;  %v3336_v28 = vpack.c.bf16 %v3332_v57, %v3332_v57  ;;  %v3337_v58 = vpack.c.bf16 %v3333_v59, %v3333_v59 }
 0xb71   : > { %5957 = vmatmul.mubr.msk.bf16.vlgmr.msra.gmra.mrb[16].mxu0 %vm2138_vm1, %v3334_v50  ;;  %5963 = vmatmul.mubr.msk.bf16.vlgmr.msra.gmra.mrb[44].mxu1 %vm2138_vm1, %v3335_v51 }
 0xb72   : > { %5967 = vmatpush3.bf16.xpose.msra.mxu0 %v3734_v55  ;;  %5973 = vmatpush3.bf16.xpose.msra.mxu1 %v3780_v56 }
 0xb73   : > { %5968 = vmatprep.mubr.msk.bf16.mxu0 %vm7281_vm0, %v7280_v0  ;;  %5974 = vmatprep.mubr.msk.bf16.mxu1 %vm7281_vm0, %v7280_v0 }
 0xb74   : > { %5978 = vmatprep.subr.bf16.mxu0 %v7280_v0  ;;  %5984 = vmatprep.subr.bf16.mxu1 %v7280_v0 }
 0xb79   : > { %5969 = vmatmul.mubr.msk.bf16.vlgmr.msra.gmra.mrb[20].mxu0 %vm2138_vm1, %v3336_v28  ;;  %5975 = vmatmul.mubr.msk.bf16.vlgmr.msra.gmra.mrb[48].mxu1 %vm2138_vm1, %v3337_v58 }
 0xb7a   : > { %5980 = vmatprep.mubr.msk.bf16.mxu0 %vm7281_vm0, %v7280_v0  ;;  %5986 = vmatprep.mubr.msk.bf16.mxu1 %vm7281_vm0, %v7280_v0 }
 0xc44   : > { %v3678_v63 = vpop.f32.mrb[16].mxu0  ;;  %v3724_v1 = vpop.f32.mrb[44].mxu1 }
 0xc45   : > { %v3679_v2 = vadd.f32 %v3678_v63, %v1351_v61  ;;  %v3725_v4 = vadd.f32 %v3724_v1, %v1351_v61  ;;  %v5958_v5 = vpop.f32.mrb[17].mxu0  ;;  %v5964_v6 = vpop.f32.mrb[45].mxu1 }
 0xc46   : > { %v3681_v8 = vpop.f32.mrb[18].mxu0  ;;  %v3727_v9 = vpop.f32.mrb[46].mxu1 }
 0xc47   : > { %v5959_v10 = vpop.f32.mrb[19].mxu0  ;;  %v5965_v11 = vpop.f32.mrb[47].mxu1  ;;  %v3825_v12 = vsel %vm2323_vm2, %v3725_v4, -inf  ;;  %v3822_v13 = vsel %vm2323_vm2, %v3679_v2, -inf }
 0xc48   : > { %3826 = vmax.xlane.f32.xlu1 %v3825_v12  ;;  %3823 = vmax.xlane.f32.xlu0 %v3822_v13 }
 0xc4c   : > { %v3770_v7 = vpop.f32.mrb[20].mxu0  ;;  %v3816_v14 = vpop.f32.mrb[48].mxu1 }
 0xc4d   : > { %v3771_v15 = vadd.f32 %v3770_v7, %v1351_v61  ;;  %v5970_v16 = vpop.f32.mrb[21].mxu0  ;;  %v5976_v3 = vpop.f32.mrb[49].mxu1  ;;  %v3817_v20 = vadd.f32 %v3816_v14, %v1351_v61 }
 0xc4e   : > { %v3773_v18 = vpop.f32.mrb[22].mxu0  ;;  %v3819_v19 = vpop.f32.mrb[50].mxu1 }
 0xc4f   : > { %v5971_v21 = vpop.f32.mrb[23].mxu0  ;;  %v5977_v22 = vpop.f32.mrb[51].mxu1  ;;  %v3828_v23 = vsel %vm2323_vm2, %v3771_v15, -inf  ;;  %v3831_v24 = vsel %vm2323_vm2, %v3817_v20, -inf }
 0xc50   : > { %3829 = vmax.xlane.f32.xlu0 %v3828_v23 }
 0xc54   : > { %3832 = vmax.xlane.f32.xlu0 %v3831_v24 }
 0xc59   : > { %3489 = vrot.lane.b32.xlu1 %v2958_v26, %s7282_s27 }
 0xcd5   : > { %v3827_v27 = vpop.xlane.xlu1 %3826  ;;  %v3824_v29 = vpop.xlane.xlu0 %3823 }
 0xcd6   : > { %v3835_v30 = vsub.f32 %v3725_v4, %v3827_v27  ;;  %v3834_v31 = vsub.f32 %v3679_v2, %v3824_v29 }
 0xcd8   : > { %v3840_v32 = vmul.f32 1.442695, %v3835_v30  ;;  %v3838_v33 = vmul.f32 1.442695, %v3834_v31 }
 0xcd9   : > { %v3490_v47 = vpop.permute.xlu1 %3489 }
 0xcda   : > { %6464 = vpow2.f32 %v3840_v32 }
 0xcdb   : > { %6466 = vpow2.f32 %v3838_v33 }
 0xcdd   : > { %v3830_v37 = vpop.xlane.xlu0 %3829 }
 0xcde   : > { %v3836_v40 = vsub.f32 %v3771_v15, %v3830_v37 }
 0xce0   : > { %v3842_v43 = vmul.f32 1.442695, %v3836_v40 }
 0xce1   : > { %v3833_v38 = vpop.xlane.xlu0 %3832 }
 0xce2   : > { %v3837_v39 = vsub.f32 %v3817_v20, %v3833_v38 }
 0xce4   : > { %v8266_v34 = vpop.eup %6464  ;;  %v3844_v41 = vmul.f32 1.442695, %v3837_v39 }
 0xce5   : > { %v8268_v35 = vpop.eup %6466  ;;  %v3849_v36 = vsel %vm2323_vm2, %v8266_v34, 0.0 }
 0xce6   : > { %v3846_v60 = vsel %vm2323_vm2, %v8268_v35, 0.0  ;;  %3850 = vadd.xlane.f32.xlu0 %v3849_v36  ;;  %6468 = vpow2.f32 %v3844_v41 }
 0xce7   : > { %3847 = vadd.xlane.f32.xlu1 %v3846_v60  ;;  %6470 = vpow2.f32 %v3842_v43 }
 0xcf0   : > { %v8276_v42 = vpop.eup %6468 }
 0xcf1   : > { %v8278_v44 = vpop.eup %6470  ;;  %v3855_v45 = vsel %vm2323_vm2, %v8276_v42, 0.0 }
 0xcf2   : > { %v3852_v46 = vsel %vm2323_vm2, %v8278_v44, 0.0 }
 0xcf8   : > { %3495 = vrot.lane.b32.xlu1 %v2958_v26, %s7283_s4 }
 0xcfc   : > { %3492 = vrot.lane.b32.xlu0 %v2958_v26, %s7284_s16 }
 0xd1b   : > { %3856 = vadd.xlane.f32.xlu0 %v3855_v45 }
 0xd1c   : > { %3853 = vadd.xlane.f32.xlu1 %v3852_v46 }
 0xd73   : > { %v3851_v49 = vpop.xlane.xlu0 %3850 }
 0xd74   : > { %v3848_v50 = vpop.xlane.xlu1 %3847  ;;  %6472 = vrcp.f32 %v3851_v49 }
 0xd75   : > { %6474 = vrcp.f32 %v3848_v50 }
 0xd77   : > { %v3493_v51 = vpop.permute.xlu0 %3492 }
 0xd78   : > { %v3496_v52 = vpop.permute.xlu1 %3495  ;;  %v3498_v54 = vcombine.low %v2958_v26, %v3493_v51  ;;  %v3499_v55 = vcombine.high %v2958_v26, %v3493_v51 }
 0xd79   : > { %v3514_v56 = vcombine.low %v3490_v47, %v3496_v52  ;;  %v3515_v57 = vcombine.high %v3490_v47, %v3496_v52 }
 0xd7a   : > { %v3506_v59 = vrot.slane %v3498_v54, %v7986_v53  ;;  %v3513_v28 = vrot.slane %v3499_v55, %v7986_v53  ;;  %v6358_v55 = vld [vmem:[#allocation32] sm:$0xff]  }
 0xd7b   : > { %v3522_v58 = vrot.slane %v3514_v56, %v7986_v53  ;;  %v3529_v61 = vrot.slane %v3515_v57, %v7986_v53  ;;  %v6359_v56 = vld [vmem:[#allocation32 + $0x8] sm:$0xff]   ;;  %v6360_v57 = vld [vmem:[#allocation32 + $0x10] sm:$0xff]  }
 0xd7d   : > { %v3530_v63 = vcombine.low %v3506_v59, %v3522_v58  ;;  %v3531_v1 = vcombine.high %v3506_v59, %v3522_v58  ;;  %v3546_v2 = vcombine.low %v3513_v28, %v3529_v61  ;;  %v3547_v4 = vcombine.high %v3513_v28, %v3529_v61  ;;  %v6363_v59 = vld [vmem:[#allocation32 + $0x28] sm:$0xff]  }
 0xd7e   : > { %v6473_v23 = vpop.eup %6472 }
 0xd7f   : > { %v3538_v5 = vrot.slane %v3530_v63, %v7991_v62  ;;  %v3545_v6 = vrot.slane %v3531_v1, %v7991_v62  ;;  %v3554_v8 = vrot.slane %v3546_v2, %v7991_v62  ;;  %v3561_v9 = vrot.slane %v3547_v4, %v7991_v62  ;;  %v6475_v26 = vpop.eup %6474 }
 0xd80   : > { %v3862_v32 = vmul.f32 %v6475_v26, %v8268_v35  ;;  %v3863_v33 = vmul.f32 %v6473_v23, %v8266_v34  ;;  %v6364_v26 = vld [vmem:[#allocation32 + $0x30] sm:$0xff]  }
 0xd81   : > { %v3566_v10 = vcombine.low %v3538_v5, %v3545_v6  ;;  %v5524_v11 = vcombine.high %v3538_v5, %v3545_v6  ;;  %v3582_v12 = vcombine.low %v3554_v8, %v3561_v9  ;;  %v5525_v13 = vcombine.high %v3554_v8, %v3561_v9 }
 0xd82   : > { %v3866_v41 = vpack.c.bf16 %v3862_v32, %v3862_v32  ;;  %v3867_v43 = vpack.c.bf16 %v3863_v33, %v3863_v33 }
 0xd83   : > { %v3573_v7 = vrot.slane %v3566_v10, %v7986_v53  ;;  %v3581_v14 = vrot.slane %v5524_v11, %v7986_v53  ;;  %v3589_v15 = vrot.slane %v3582_v12, %v7986_v53  ;;  %v3597_v16 = vrot.slane %v5525_v13, %v7986_v53 }
 0xd85   : > { %v3598_v3 = vcombine.low %v3573_v7, %v3581_v14  ;;  %v3599_v18 = vcombine.high %v3573_v7, %v3581_v14  ;;  %v3614_v19 = vcombine.low %v3589_v15, %v3597_v16  ;;  %v3615_v20 = vcombine.high %v3589_v15, %v3597_v16 }
 0xd87   : > { %v3606_v21 = vrot.slane %v3598_v3, %v7991_v62  ;;  %v3613_v22 = vrot.slane %v3599_v18, %v7991_v62  ;;  %v3622_v24 = vrot.slane %v3614_v19, %v7991_v62  ;;  %v3629_v25 = vrot.slane %v3615_v20, %v7991_v62 }
 0xd89   : > { %v3630_v27 = vcombine.low %v3606_v21, %v3622_v24  ;;  %v3631_v29 = vcombine.high %v3606_v21, %v3622_v24  ;;  %v3632_v30 = vcombine.low %v3613_v22, %v3629_v25  ;;  %v3633_v31 = vcombine.high %v3613_v22, %v3629_v25 }
 0xd8b   : > { %v3634_v36 = vpack.c.bf16 %v3630_v27, %v3630_v27  ;;  %v3635_v60 = vpack.c.bf16 %v3631_v29, %v3631_v29  ;;  %v3636_v39 = vpack.c.bf16 %v3632_v30, %v3632_v30  ;;  %v3637_v40 = vpack.c.bf16 %v3633_v31, %v3633_v31 }
 0xd8d   : > { %v3874_v37 = vsel %vm2375_vm3, %v3634_v36, 0  ;;  %v3920_v38 = vsel %vm2375_vm3, %v3635_v60, 0  ;;  %v3966_v34 = vsel %vm2375_vm3, %v3636_v39, 0  ;;  %v4012_v35 = vsel %vm2375_vm3, %v3637_v40, 0 }
 0xd8e   : > { %5979 = vmatpush3.bf16.msra.mxu0 %v3874_v37  ;;  %5985 = vmatpush3.bf16.msra.mxu1 %v3920_v38  ;;  %v6365_v37 = vld [vmem:[#allocation32 + $0x38] sm:$0xff]  }
 0xd8f   : > { %5990 = vmatprep.subr.bf16.mxu0 %v7280_v0  ;;  %5996 = vmatprep.subr.bf16.mxu1 %v7280_v0 }
 0xd91   : > { %5981 = vmatmul.mubr.msk.bf16.vlgmr.msra.gmra.mrb[24].mxu0 %vm2323_vm2, %v3866_v41  ;;  %5987 = vmatmul.mubr.msk.bf16.vlgmr.msra.gmra.mrb[52].mxu1 %vm2323_vm2, %v3867_v43 }
 0xd92   : > { %5991 = vmatpush3.bf16.msra.mxu0 %v3966_v34  ;;  %5997 = vmatpush3.bf16.msra.mxu1 %v4012_v35 }
 0xd93   : > { %5992 = vmatprep.mubr.msk.bf16.mxu0 %vm7281_vm0, %v7280_v0  ;;  %5998 = vmatprep.mubr.msk.bf16.mxu1 %vm7281_vm0, %v7280_v0 }
 0xd94   : > { %6002 = vmatprep.subr.bf16.mxu0 %v7280_v0 }
 0xda8   : > { %v3857_v45 = vpop.xlane.xlu0 %3856 }
 0xda9   : > { %v3854_v46 = vpop.xlane.xlu1 %3853  ;;  %6476 = vrcp.f32 %v3857_v45 }
 0xdaa   : > { %6478 = vrcp.f32 %v3854_v46 }
 0xdb3   : > { %v6477_v47 = vpop.eup %6476 }
 0xdb4   : > { %v6479_v49 = vpop.eup %6478  ;;  %v3865_v50 = vmul.f32 %v6477_v47, %v8276_v42  ;;  %v6361_v42 = vld [vmem:[#allocation32 + $0x18] sm:$0xff]  }
 0xdb5   : > { %v3864_v51 = vmul.f32 %v6479_v49, %v8278_v44  ;;  %v6362_v44 = vld [vmem:[#allocation32 + $0x20] sm:$0xff]  }
 0xdb6   : > { %v3869_v52 = vpack.c.bf16 %v3865_v50, %v3865_v50 }
 0xdb7   : > { %v3868_v54 = vpack.c.bf16 %v3864_v51, %v3864_v51 }
 0xdb8   : > { %5999 = vmatmul.mubr.msk.bf16.vlgmr.msra.gmra.mrb[56].mxu1 %vm2323_vm2, %v3869_v52 }
 0xdb9   : > { %5993 = vmatmul.mubr.msk.bf16.vlgmr.msra.gmra.mrb[28].mxu0 %vm2323_vm2, %v3868_v54 }
 0xdba   : > { %6018 = vmatprep.mubr.msk.bf16.mxu0 %vm7281_vm0, %v7280_v0  ;;  %6003 = vmatpush3.bf16.msra.mxu0 %v6358_v55 }
 0xdbb   : > { %6004 = vmatprep.subr.bf16.mxu0 %v7280_v0 }
 0xdbe   : > { %6005 = vmatpush3.bf16.msra.mxu0 %v6359_v56 }
 0xdbf   : > { %6006 = vmatprep.subr.bf16.mxu0 %v7280_v0 }
 0xdc2   : > { %6007 = vmatpush3.bf16.msra.mxu0 %v6360_v57 }
 0xdc3   : > { %6008 = vmatprep.subr.bf16.mxu0 %v7280_v0 }
 0xdc6   : > { %6009 = vmatpush3.bf16.msra.mxu0 %v6361_v42 }
 0xdc7   : > { %6010 = vmatprep.subr.bf16.mxu0 %v7280_v0 }
 0xdca   : > { %6011 = vmatpush3.bf16.msra.mxu0 %v6362_v44 }
 0xdcb   : > { %6012 = vmatprep.subr.bf16.mxu0 %v7280_v0 }
 0xdce   : > { %6013 = vmatpush3.bf16.msra.mxu0 %v6363_v59  ;;  %v5536_v59 = vld [vmem:[%s8549_s26] ss:$0 sm:$0xff]  ;;  %s7288_s26 = smov [#allocation37]  }
 0xdcf   : > { %6014 = vmatprep.subr.bf16.mxu0 %v7280_v0  ;;  %s7115_s2 = sshll.u32 %s7288_s26, 4  ;;  %s7116_s2 = int_to_ptr.vmem [resolvable:$false] %s7115_s2 }
 0xdd0   : > { %s7117_s1 = scalar_lea.vmem %s7116_s2, 256 }
 0xdd2   : > { %6015 = vmatpush3.bf16.msra.mxu0 %v6364_v26  ;;  %v6393_v26 = vld [vmem:[#allocation34 + $0x88] ss:$16 sps:$4 sm:$0xff]  }
 0xdd3   : > { %6016 = vmatprep.subr.bf16.mxu0 %v7280_v0 }
 0xdd6   : > { %6017 = vmatpush3.bf16.msra.mxu0 %v6365_v37  ;;  %v6410_v37 = vld [vmem:[#allocation34 + $0xe4] ss:$16 sps:$4 sm:$0xff]  }
 0xe64   : > { %v3910_v28 = vpop.f32.mrb[24].mxu0  ;;  %v3956_v58 = vpop.f32.mrb[52].mxu1 }
 0xe65   : > { %v5982_v61 = vpop.f32.mrb[25].mxu0  ;;  %v5988_v63 = vpop.f32.mrb[53].mxu1 }
 0xe66   : > { %v3913_v1 = vpop.f32.mrb[26].mxu0  ;;  %v3959_v2 = vpop.f32.mrb[54].mxu1 }
 0xe67   : > { %v5983_v4 = vpop.f32.mrb[27].mxu0  ;;  %v5989_v5 = vpop.f32.mrb[55].mxu1 }
 0xe68   : > { %v6366_v4 = vld [vmem:[#allocation34] ss:$16 sps:$4 sm:$0xff]   ;;  %v6368_v5 = vld [vmem:[#allocation34 + $0x4] ss:$16 sps:$4 sm:$0xff]  }
 0xe69   : > { %4560 = vmatprep.subr.bf16.mxu1 %v6368_v5  ;;  %v6431_v5 = vld [vmem:[#allocation35 + $0xe0] sm:$0xff]  }
 0xe6a   : > { %4561 = vmatpush1.bf16.msra.mxu1 %v6366_v4  ;;  %v6430_v4 = vld [vmem:[#allocation35 + $0x60] sm:$0xff]  }
 0xe8b   : > { %v4048_v6 = vpop.f32.mrb[56].mxu1 }
 0xe8c   : > { %v4002_v8 = vpop.f32.mrb[28].mxu0  ;;  %v4070_v9 = vcombine.low %v3956_v58, %v4048_v6  ;;  %v4071_v10 = vcombine.high %v3956_v58, %v4048_v6  ;;  %v6000_v11 = vpop.f32.mrb[57].mxu1  ;;  %v6369_v6 = vld [vmem:[#allocation34 + $0x8] ss:$16 sps:$4 sm:$0xff]  }
 0xe8d   : > { %v4054_v12 = vcombine.low %v3910_v28, %v4002_v8  ;;  %v4055_v13 = vcombine.high %v3910_v28, %v4002_v8  ;;  %v5994_v7 = vpop.f32.mrb[29].mxu0  ;;  %v4051_v14 = vpop.f32.mrb[58].mxu1  ;;  %v6371_v8 = vld [vmem:[#allocation34 + $0xc] ss:$16 sps:$4 sm:$0xff]   ;;  %v6372_v11 = vld [vmem:[#allocation34 + $0x20] ss:$16 sps:$4 sm:$0xff]  }
 0xe8e   : > { %v4078_v15 = vrot.slane %v4070_v9, %v7986_v53  ;;  %v4085_v16 = vrot.slane %v4071_v10, %v7986_v53  ;;  %v4005_v3 = vpop.f32.mrb[30].mxu0  ;;  %v6001_v18 = vpop.f32.mrb[59].mxu1  ;;  %v6374_v9 = vld [vmem:[#allocation34 + $0x24] ss:$16 sps:$4 sm:$0xff]   ;;  %v6377_v10 = vld [vmem:[#allocation34 + $0x2c] ss:$16 sps:$4 sm:$0xff]   ;;  %4601 = vmatprep.subr.bf16.mxu0 %v6371_v8 }
 0xe8f   : > { %v4062_v19 = vrot.slane %v4054_v12, %v7986_v53  ;;  %v4069_v20 = vrot.slane %v4055_v13, %v7986_v53  ;;  %v5995_v21 = vpop.f32.mrb[31].mxu0  ;;  %4562 = vmatprep.subr.bf16.mxu1 %v6374_v9  ;;  %v6375_v12 = vld [vmem:[#allocation34 + $0x28] ss:$16 sps:$4 sm:$0xff]   ;;  %v6380_v13 = vld [vmem:[#allocation34 + $0x44] ss:$16 sps:$4 sm:$0xff]  }
 0xe90   : > { %v6383_v7 = vld [vmem:[#allocation34 + $0x4c] ss:$16 sps:$4 sm:$0xff]   ;;  %4563 = vmatpush1.bf16.msra.mxu1 %v6372_v11  ;;  %v6378_v14 = vld [vmem:[#allocation34 + $0x40] ss:$16 sps:$4 sm:$0xff]  }
 0xe91   : > { %v4086_v22 = vcombine.low %v4062_v19, %v4078_v15  ;;  %v4087_v23 = vcombine.high %v4062_v19, %v4078_v15  ;;  %v4102_v24 = vcombine.low %v4069_v20, %v4085_v16  ;;  %v4103_v25 = vcombine.high %v4069_v20, %v4085_v16  ;;  %4564 = vmatprep.subr.bf16.mxu1 %v6380_v13  ;;  %v6386_v19 = vld [vmem:[#allocation34 + $0x64] ss:$16 sps:$4 sm:$0xff]   ;;  %v6389_v20 = vld [vmem:[#allocation34 + $0x6c] ss:$16 sps:$4 sm:$0xff]   ;;  %v6384_v21 = vld [vmem:[#allocation34 + $0x60] ss:$16 sps:$4 sm:$0xff]  }
 0xe92   : > { %v6433_v8 = vld [vmem:[#allocation35 + $0xa0] sm:$0xff]   ;;  %v6434_v9 = vld [vmem:[#allocation35 + $0x68] sm:$0xff]   ;;  %v6438_v13 = vld [vmem:[#allocation35 + $0x70] sm:$0xff]  }
 0xe93   : > { %v4094_v27 = vrot.slane %v4086_v22, %v7991_v62  ;;  %v4101_v29 = vrot.slane %v4087_v23, %v7991_v62  ;;  %v4110_v30 = vrot.slane %v4102_v24, %v7991_v62  ;;  %v4117_v31 = vrot.slane %v4103_v25, %v7991_v62  ;;  %v6387_v22 = vld [vmem:[#allocation34 + $0x68] ss:$16 sps:$4 sm:$0xff]   ;;  %v6392_v23 = vld [vmem:[#allocation34 + $0x84] ss:$16 sps:$4 sm:$0xff]   ;;  %v6395_v24 = vld [vmem:[#allocation34 + $0x8c] ss:$16 sps:$4 sm:$0xff]  }
 0xe94   : > { %4565 = vmatpush1.bf16.msra.mxu1 %v6378_v14  ;;  %v6390_v25 = vld [vmem:[#allocation34 + $0x80] ss:$16 sps:$4 sm:$0xff]   ;;  %v6436_v11 = vld [vmem:[#allocation35 + $0x28] sm:$0xff]  }
 0xe95   : > { %v4122_v32 = vcombine.low %v4094_v27, %v4101_v29  ;;  %v5534_v33 = vcombine.high %v4094_v27, %v4101_v29  ;;  %v4138_v36 = vcombine.low %v4110_v30, %v4117_v31  ;;  %v5535_v60 = vcombine.high %v4110_v30, %v4117_v31  ;;  %4566 = vmatprep.subr.bf16.mxu1 %v6386_v19  ;;  %v6398_v27 = vld [vmem:[#allocation34 + $0xa4] ss:$16 sps:$4 sm:$0xff]   ;;  %v6401_v29 = vld [vmem:[#allocation34 + $0xac] ss:$16 sps:$4 sm:$0xff]   ;;  %v6396_v30 = vld [vmem:[#allocation34 + $0xa0] ss:$16 sps:$4 sm:$0xff]  }
 0xe96   : > { %v6399_v31 = vld [vmem:[#allocation34 + $0xa8] ss:$16 sps:$4 sm:$0xff]   ;;  %v6440_v14 = vld [vmem:[#allocation35 + $0x30] sm:$0xff]   ;;  %v4382_v19 = vsub.s32 0, %v7983_v48 }
 0xe97   : > { %v4129_v38 = vrot.slane %v4122_v32, %v7986_v53  ;;  %v4137_v39 = vrot.slane %v5534_v33, %v7986_v53  ;;  %v4145_v40 = vrot.slane %v4138_v36, %v7986_v53  ;;  %v4153_v41 = vrot.slane %v5535_v60, %v7986_v53  ;;  %v6404_v32 = vld [vmem:[#allocation34 + $0xc4] ss:$16 sps:$4 sm:$0xff]   ;;  %v6407_v33 = vld [vmem:[#allocation34 + $0xcc] ss:$16 sps:$4 sm:$0xff]   ;;  %v6402_v36 = vld [vmem:[#allocation34 + $0xc0] ss:$16 sps:$4 sm:$0xff]  }
 0xe98   : > { %4567 = vmatpush1.bf16.msra.mxu1 %v6384_v21  ;;  %v6405_v60 = vld [vmem:[#allocation34 + $0xc8] ss:$16 sps:$4 sm:$0xff]   ;;  %v4378_v21 = vld [vmem:[%s7437_s5] sm:$0xf] }
 0xe99   : > { %v4155_v43 = vcombine.high %v4129_v38, %v4137_v39  ;;  %v4171_v34 = vcombine.high %v4145_v40, %v4153_v41  ;;  %v4154_v35 = vcombine.low %v4129_v38, %v4137_v39  ;;  %v4170_v45 = vcombine.low %v4145_v40, %v4153_v41  ;;  %4568 = vmatprep.subr.bf16.mxu1 %v6392_v23  ;;  %v6413_v38 = vld [vmem:[#allocation34 + $0xec] ss:$16 sps:$4 sm:$0xff]   ;;  %v6408_v39 = vld [vmem:[#allocation34 + $0xe0] ss:$16 sps:$4 sm:$0xff]   ;;  %v6411_v40 = vld [vmem:[#allocation34 + $0xe8] ss:$16 sps:$4 sm:$0xff]  }
 0xe9a   : > { %v7287_v41 = vmov 0   ;;  %v4394_v23 = vsub.s32 3, %v7983_v48 }
 0xe9b   : > { %v4169_v0 = vrot.slane %v4155_v43, %v7991_v62  ;;  %v4185_v46 = vrot.slane %v4171_v34, %v7991_v62  ;;  %v4162_v47 = vrot.slane %v4154_v35, %v7991_v62  ;;  %v4178_v49 = vrot.slane %v4170_v45, %v7991_v62  ;;  %4592 = vmatprep.mubr.bf16.mxu1 %v7287_v41  ;;  %v6414_v43 = vld [vmem:[#allocation35 + $0x40] sm:$0xff]  }
 0xe9c   : > { %4569 = vmatpush1.bf16.msra.mxu1 %v6390_v25  ;;  %v6415_v34 = vld [vmem:[#allocation35 + $0xc0] sm:$0xff]  }
 0xe9d   : > { %v4188_v50 = vcombine.low %v4169_v0, %v4185_v46  ;;  %v4187_v51 = vcombine.high %v4162_v47, %v4178_v49  ;;  %v4189_v52 = vcombine.high %v4169_v0, %v4185_v46  ;;  %v4186_v54 = vcombine.low %v4162_v47, %v4178_v49  ;;  %4570 = vmatprep.subr.bf16.mxu1 %v6398_v27  ;;  %v5545_v47 = vld [vmem:[%s8550_s13] ss:$0 sm:$0xff] }
 0xe9e   : > { %v4395_v27 = vrot.slane %v4378_v21, %v4394_v23 }
 0xe9f   : > { %4195 = vrot.lane.b32.xlu1 %v4188_v50, %s7284_s16  ;;  %4191 = vrot.lane.b32.xlu0 %v4187_v51, %s7283_s4  ;;  %v5546_v50 = vld [vmem:[%s8551_s7] ss:$0 sm:$0xff]  ;;  %s8370_s4 = scalar_lea.hbm %s8555_s15, %s5615_s22  ;;  %s5023_s16 = scalar_lea.sflag [#allocation4], %s7877_s25 }
 0xea0   : > { %4571 = vmatpush1.bf16.msra.mxu1 %v6396_v30 }
 0xea1   : > { %4572 = vmatprep.subr.bf16.mxu1 %v6404_v32 }
 0xea3   : > { %4199 = vrot.lane.b32.xlu1 %v4189_v52, %s7282_s27  ;;  %s5036_s27 = sshll.u32 %s1346_s9, 4  ;;  %s8372_s27 = int_to_ptr.vmem [resolvable:$true] %s5036_s27 }
 0xea4   : > { %4573 = vmatpush1.bf16.msra.mxu1 %v6402_v36  ;;  %s7111_s21 = scalar_lea.vmem %s8372_s27, 128  ;;  %p7118_p4 = scmp.lt.s32.totalorder %s8372_s27, %s7116_s2 }
 0xea5   : > { %4574 = vmatprep.subr.bf16.mxu1 %v6410_v37  ;;  %p7112_p0 = scmp.ne.s32.totalorder %s8372_s27, %s7111_s21  ;;  %p7119_p5 = scmp.lt.s32.totalorder %s7117_s1, %s7111_s21 }
 0xea7   : > { %p7113_p1 = pnand %p7112_p0, %p8556_p7  ;;  %p7120_p6 = por %p7119_p5, %p7118_p4 }
 0xea8   : > { %4575 = vmatpush1.bf16.msra.mxu1 %v6408_v39 }
 0xea9   : > { %5722 = vmatprep.subr.bf16.mxu1 %v6414_v43  ;;  %p7114_p3 = pneg %p7113_p1 }
 0xeab   : > { %p7121_p8 = pnand %p7120_p6, %p7114_p3 }
 0xf11   : > { %v4196_v53 = vpop.permute.xlu1 %4195  ;;  %v4192_v55 = vpop.permute.xlu0 %4191 }
 0xf12   : > { %v4202_v56 = vsel %vm2138_vm1, %v4186_v54, %v4192_v55  ;;  %v6416_v54 = vld [vmem:[#allocation35] sm:$0xff]  }
 0xf13   : > { %v4203_v42 = vsel %vm2706_vm4, %v4202_v56, %v4196_v53  ;;  %v6417_v53 = vld [vmem:[#allocation35 + $0x80] sm:$0xff]   ;;  %v6418_v56 = vld [vmem:[#allocation35 + $0x48] sm:$0xff]  }
 0xf15   : > { %v4200_v57 = vpop.permute.xlu1 %4199 }
 0xf16   : > { %v4204_v62 = vsel %vm2708_vm5, %v4203_v42, %v4200_v57  ;;  %v6419_v57 = vld [vmem:[#allocation35 + $0xc8] sm:$0xff]  }
 0xf17   : > { %v4205_v44 = vpack.c.bf16 %v4204_v62, %v4204_v62  ;;  %v6420_v42 = vld [vmem:[#allocation35 + $0x8] sm:$0xff]  }
 0xf18   : > { %v6421_v62 = vld [vmem:[#allocation35 + $0x88] sm:$0xff]  }
 0xf19   : > { %6019 = vmatmul.mubr.bf16.vlgmr.msra.gmra.mrb[32].mxu0 %v4205_v44  ;;  %v6422_v44 = vld [vmem:[#allocation35 + $0x50] sm:$0xff]  }
 0xf1a   : > { %4602 = vmatpush1.bf16.msra.mxu0 %v6369_v6  ;;  %4633 = vmatprep.mubr.bf16.mxu0 %v7287_v41  ;;  %v6432_v6 = vld [vmem:[#allocation35 + $0x20] sm:$0xff]  }
 0xf1b   : > { %4603 = vmatprep.subr.bf16.mxu0 %v6377_v10  ;;  %v6435_v10 = vld [vmem:[#allocation35 + $0xe8] sm:$0xff]  }
 0xf1e   : > { %4604 = vmatpush1.bf16.msra.mxu0 %v6375_v12  ;;  %v6437_v12 = vld [vmem:[#allocation35 + $0xa8] sm:$0xff]  }
 0xf1f   : > { %4605 = vmatprep.subr.bf16.mxu0 %v6383_v7  ;;  %v6439_v7 = vld [vmem:[#allocation35 + $0xf0] sm:$0xff]  }
 0xfec   : > { %v4311_v28 = vpop.f32.mrb[32].mxu0 }
 0xfed   : > { %v4312_v58 = vadd.f32 %v5536_v59, %v4311_v28  ;;  %v6020_v61 = vpop.f32.mrb[33].mxu0  ;;  %v6423_v59 = vld [vmem:[#allocation35 + $0xd0] sm:$0xff]  }
 0xfee   : > { %v4314_v63 = vpop.f32.mrb[34].mxu0  ;;  %v6424_v28 = vld [vmem:[#allocation35 + $0x10] sm:$0xff]   ;;  %v6426_v61 = vld [vmem:[#allocation35 + $0x58] sm:$0xff]  }
 0xfef   : > { %v6021_v1 = vpop.f32.mrb[35].mxu0  ;;  %v4317_v2 = vadd.f32 %v4312_v58, %v8188_v17  ;;  %v6381_v17 = vld [vmem:[#allocation34 + $0x48] ss:$16 sps:$4 sm:$0xff]   ;;  %v6425_v58 = vld [vmem:[#allocation35 + $0x90] sm:$0xff]  }
 0xff0   : > { %4606 = vmatpush1.bf16.msra.mxu0 %v6381_v17  ;;  %v6427_v63 = vld [vmem:[#allocation35 + $0xd8] sm:$0xff]   ;;  %v6441_v17 = vld [vmem:[#allocation35 + $0xb0] sm:$0xff]  }
 0xff1   : > { %4318 = vadd.xlane.f32.xlu0 %v4317_v2  ;;  %4607 = vmatprep.subr.bf16.mxu0 %v6389_v20  ;;  %v6428_v1 = vld [vmem:[#allocation35 + $0x18] sm:$0xff]   ;;  %v4390_v20 = vsub.s32 2, %v7983_v48 }
 0xff3   : > { %v4391_v25 = vrot.slane %v4378_v21, %v4390_v20 }
 0xff4   : > { %4608 = vmatpush1.bf16.msra.mxu0 %v6387_v22  ;;  %v4386_v22 = vsub.s32 1, %v7983_v48 }
 0xff5   : > { %4609 = vmatprep.subr.bf16.mxu0 %v6395_v24  ;;  %v4383_v24 = vrot.slane %v4378_v21, %v4382_v19 }
 0xff8   : > { %4610 = vmatpush1.bf16.msra.mxu0 %v6393_v26  ;;  %v4387_v26 = vrot.slane %v4378_v21, %v4386_v22 }
 0xff9   : > { %4611 = vmatprep.subr.bf16.mxu0 %v6401_v29 }
 0xffc   : > { %4612 = vmatpush1.bf16.msra.mxu0 %v6399_v31 }
 0xffd   : > { %4613 = vmatprep.subr.bf16.mxu0 %v6407_v33 }
0x1000   : > { %4614 = vmatpush1.bf16.msra.mxu0 %v6405_v60 }
0x1001   : > { %4615 = vmatprep.subr.bf16.mxu0 %v6413_v38 }
0x1004   : > { %4616 = vmatpush1.bf16.msra.mxu0 %v6411_v40 }
0x1005   : > { %5744 = vmatprep.subr.bf16.mxu0 %v6415_v34 }
0x107e   : > { %v4319_v15 = vpop.xlane.xlu0 %4318 }
0x107f   : > { %v4320_v16 = vmul.f32 0.0078125, %v4319_v15  ;;  %v6442_v15 = vld [vmem:[#allocation35 + $0x78] sm:$0xff]  }
0x1081   : > { %v4321_v3 = vsub.f32 %v4317_v2, %v4320_v16  ;;  %v6429_v2 = vld [vmem:[#allocation35 + $0x98] sm:$0xff]  }
0x1082   : > { %v6443_v16 = vld [vmem:[#allocation35 + $0xf8] sm:$0xff]  }
0x1083   : > { %v4322_v18 = vmul.f32 %v4321_v3, %v4321_v3 }
0x1085   : > { %4323 = vadd.xlane.f32.xlu1 %v4322_v18  ;;  %v6445_v18 = vld [vmem:[#allocation35 + $0xb8] sm:$0xff]  }
0x1112   : > { %v4324_v35 = vpop.xlane.xlu1 %4323 }
0x1113   : > { %v4325_v45 = vmul.f32 0.0078125, %v4324_v35 }
0x1115   : > { %v4326_v0 = vadd.f32 1e-05, %v4325_v45 }
0x1117   : > { %6480 = vrsqrt.f32 %v4326_v0 }
0x1121   : > { %v6481_v46 = vpop.eup %6480 }
0x1122   : > { %v4328_v49 = vmul.f32 %v6481_v46, %v4321_v3  ;;  %v6444_v3 = vld [vmem:[#allocation35 + $0x38] sm:$0xff]  }
0x1124   : > { %v4336_v51 = vmul.f32 %v5545_v47, %v4328_v49 }
0x1126   : > { %v8354_v52 = vadd.f32 %v5546_v50, %v4336_v51  ;;  %v5579_v51 = vld [vmem:[%s8552_s3] ss:$0 sm:$0xff] }
0x1128   : > { %v4345_v55 = vpack.c.bf16 %v8354_v52, %v8354_v52 }
0x112a   : > { %4593 = vmatmul.mubr.bf16.vlgmr.msra.gmra.mrb[60].mxu1 %v4345_v55  ;;  %4634 = vmatmul.mubr.bf16.vlgmr.msra.gmra.mrb[36].mxu0 %v4345_v55 }
0x112b   : > { %5723 = vmatpush3.bf16.msra.mxu1 %v6416_v54  ;;  %5745 = vmatpush3.bf16.msra.mxu0 %v6417_v53 }
0x112c   : > { %5724 = vmatprep.subr.bf16.mxu1 %v6418_v56  ;;  %5746 = vmatprep.subr.bf16.mxu0 %v6419_v57 }
0x112f   : > { %5725 = vmatpush3.bf16.msra.mxu1 %v6420_v42  ;;  %5747 = vmatpush3.bf16.msra.mxu0 %v6421_v62 }
0x1130   : > { %5726 = vmatprep.subr.bf16.mxu1 %v6422_v44  ;;  %5748 = vmatprep.subr.bf16.mxu0 %v6423_v59 }
0x1133   : > { %5727 = vmatpush3.bf16.msra.mxu1 %v6424_v28  ;;  %5749 = vmatpush3.bf16.msra.mxu0 %v6425_v58 }
0x1134   : > { %5728 = vmatprep.subr.bf16.mxu1 %v6426_v61  ;;  %5750 = vmatprep.subr.bf16.mxu0 %v6427_v63 }
0x1137   : > { %5729 = vmatpush3.bf16.msra.mxu1 %v6428_v1  ;;  %5751 = vmatpush3.bf16.msra.mxu0 %v6429_v2 }
0x1138   : > { %5730 = vmatprep.subr.bf16.mxu1 %v6430_v4  ;;  %5752 = vmatprep.subr.bf16.mxu0 %v6431_v5 }
0x113b   : > { %5731 = vmatpush3.bf16.msra.mxu1 %v6432_v6  ;;  %5753 = vmatpush3.bf16.msra.mxu0 %v6433_v8 }
0x113c   : > { %5732 = vmatprep.subr.bf16.mxu1 %v6434_v9  ;;  %5754 = vmatprep.subr.bf16.mxu0 %v6435_v10  ;;  %v5612_v9 = vld [vmem:[%s8553_s18] ss:$0 sm:$0xff] }
0x113f   : > { %5733 = vmatpush3.bf16.msra.mxu1 %v6436_v11  ;;  %5755 = vmatpush3.bf16.msra.mxu0 %v6437_v12  ;;  %v5613_v11 = vld [vmem:[%s8554_s17] ss:$0 sm:$0xff] }
0x1140   : > { %5734 = vmatprep.subr.bf16.mxu1 %v6438_v13  ;;  %5756 = vmatprep.subr.bf16.mxu0 %v6439_v7 }
0x1143   : > { %5735 = vmatpush3.bf16.msra.mxu1 %v6440_v14  ;;  %5757 = vmatpush3.bf16.msra.mxu0 %v6441_v17 }
0x1144   : > { %5736 = vmatprep.subr.bf16.mxu1 %v6442_v15  ;;  %5758 = vmatprep.subr.bf16.mxu0 %v6443_v16 }
0x1147   : > { %5737 = vmatpush3.bf16.msra.mxu1 %v6444_v3  ;;  %5759 = vmatpush3.bf16.msra.mxu0 %v6445_v18 }
0x11fd   : > { %v4594_v29 = vpop.f32.mrb[60].mxu1  ;;  %v4635_v30 = vpop.f32.mrb[36].mxu0 }
0x11fe   : > { %v4595_v31 = vadd.f32 %v4594_v29, %v4383_v24  ;;  %v4636_v32 = vadd.f32 %v4635_v30, %v4391_v25  ;;  %v4596_v33 = vpop.f32.mrb[61].mxu1  ;;  %v4637_v36 = vpop.f32.mrb[37].mxu0 }
0x11ff   : > { %v4597_v60 = vadd.f32 %v4596_v33, %v4387_v26  ;;  %v4638_v37 = vadd.f32 %v4637_v36, %v4395_v27  ;;  %v4598_v38 = vpop.f32.mrb[62].mxu1  ;;  %v4639_v39 = vpop.f32.mrb[38].mxu0 }
0x1200   : > { %v4642_v40 = vmax.f32 %v4595_v31, 0.0  ;;  %v4644_v41 = vmax.f32 %v4636_v32, 0.0  ;;  %v4599_v43 = vpop.f32.mrb[63].mxu1  ;;  %v4640_v34 = vpop.f32.mrb[39].mxu0 }
0x1201   : > { %v4643_v48 = vmax.f32 %v4597_v60, 0.0  ;;  %v4645_v35 = vmax.f32 %v4638_v37, 0.0 }
0x1202   : > { %v4646_v46 = vpack.c.bf16 %v4642_v40, %v4642_v40  ;;  %v4648_v47 = vpack.c.bf16 %v4644_v41, %v4644_v41 }
0x1203   : > { %v4647_v45 = vpack.c.bf16 %v4643_v48, %v4643_v48  ;;  %v4649_v0 = vpack.c.bf16 %v4645_v35, %v4645_v35 }
0x1205   : > { %4945 = vmatprep.mubr.bf16.mxu1 %v4647_v45  ;;  %4985 = vmatprep.mubr.bf16.mxu0 %v4649_v0 }
0x1206   : > { %4946 = vmatmul.mubr.bf16.vlgmr.msra.gmra.mrb[64].mxu1 %v4646_v46  ;;  %4986 = vmatmul.mubr.bf16.vlgmr.msra.gmra.mrb[40].mxu0 %v4648_v47 }
0x12d9   : > { %v5738_v49 = vpop.f32.mrb[64].mxu1  ;;  %v5760_v50 = vpop.f32.mrb[40].mxu0 }
0x12da   : > { %v5739_v54 = vpop.f32.mrb[65].mxu1  ;;  %v5761_v53 = vpop.f32.mrb[41].mxu0 }
0x12db   : > { %v5740_v55 = vadd.f32 %v5739_v54, %v5738_v49  ;;  %v5762_v56 = vadd.f32 %v5761_v53, %v5760_v50  ;;  %v5741_v57 = vpop.f32.mrb[66].mxu1  ;;  %v5763_v42 = vpop.f32.mrb[42].mxu0 }
0x12dc   : > { %v5742_v62 = vpop.f32.mrb[67].mxu1  ;;  %v5764_v44 = vpop.f32.mrb[43].mxu0 }
0x12dd   : > { %v4948_v59 = vadd.f32 %v5740_v55, %v5579_v51 }
0x12df   : > { %v4988_v28 = vadd.f32 %v5762_v56, %v4948_v59 }
0x12e1   : > { %v4993_v58 = vadd.f32 %v4988_v28, %v8354_v52 }
0x12e3   : > { %4994 = vadd.xlane.f32.xlu0 %v4993_v58 }
0x1370   : > { %v4995_v61 = vpop.xlane.xlu0 %4994 }
0x1371   : > { %v4996_v63 = vmul.f32 0.0078125, %v4995_v61 }
0x1373   : > { %v4997_v1 = vsub.f32 %v4993_v58, %v4996_v63 }
0x1375   : > { %v4998_v2 = vmul.f32 %v4997_v1, %v4997_v1 }
0x1377   : > { %4999 = vadd.xlane.f32.xlu0 %v4998_v2 }
0x1404   : > { %v5000_v4 = vpop.xlane.xlu0 %4999 }
0x1405   : > { %v5001_v5 = vmul.f32 0.0078125, %v5000_v4 }
0x1407   : > { %v5002_v6 = vadd.f32 1e-05, %v5001_v5 }
0x1409   : > { %6482 = vrsqrt.f32 %v5002_v6 }
0x1413   : > { %v6483_v8 = vpop.eup %6482 }
0x1414   : > { %v5004_v10 = vmul.f32 %v6483_v8, %v4997_v1 }
0x1416   : > { %v5012_v52 = vmul.f32 %v5612_v9, %v5004_v10 }
0x1418   : > { %v5020_v12 = vadd.f32 %v5613_v11, %v5012_v52 }
0x141a   : > { %5021 = vst [vmem:[%s1346_s9] sm:$0xff] %v5020_v12 }
0x141b   : > { %7124 = shalt.err (!%p7121_p8)
}
0x141c   : > { %s7125_s25 = scalar_lea.hbm %s8370_s4, 128  ;;  %s7129_s13 = scalar_lea.hbm %s8555_s15, 256 }
0x141d   : > { %p7126_p12 = scmp.ne.s32.totalorder %s8370_s4, %s7125_s25  ;;  %p7130_p2 = scmp.lt.u32.totalorder %s8370_s4, %s8555_s15 }
0x141e   : > { %p7131_p9 = scmp.lt.u32.totalorder %s7129_s13, %s7125_s25  ;;  %p7133_p0 = scmp.lt.u32.totalorder %s7125_s25, %s8370_s4 }
0x141f   : > { %p7127_p11 = pnand %p7126_p12, %p8556_p7 }
0x1420   : > { %p7132_p13 = por %p7131_p9, %p7130_p2 }
0x1421   : > { %p7128_p10 = pneg %p7127_p11 }
0x1422   : > { %p7134_p1 = por %p7133_p0, %p7132_p13 }
0x1424   : > { %p7135_p3 = pnand %p7134_p1, %p7128_p10 }
0x1426   : > { %7138 = shalt.err (!%p7135_p3)
}
0x1427   : > { %6100 = dma.vmem_to_hbm [thread:$0]  (%p8556_p7), %s8372_s27, 128, %s8370_s4, %s5023_s16  }
0x1428 PF: > { %s8557_s7 = sld [smem:[#allocation78_spill]]  ;;  %s8558_s3 = sld [smem:[#allocation82_spill]] }
0x1429   : > { %s8559_s18 = sld [smem:[#allocation79_spill]] }
0x142e   : > { %s5048_s17 = sand.u32 1, %s8557_s7   ;;  %p8560_p4 = scmp.ne.s32.totalorder %s8558_s3, 0 }
0x142f   : > { %p8561_p5 = scmp.ge.s32.totalorder %s8559_s18, 2  ;;  %s5049_s22 = scalar_lea.sflag [#allocation4], %s5048_s17 }
0x1431   : > { %p6171_p6 = pnand %p8561_p5, %p8560_p4 }
0x1433   : > { %7204 = dma.done.wait (!%p6171_p6), %s5049_s22, 128  }
0x1434   : > { %7206 = vsyncadd (!%p6171_p6), %s5049_s22, 4294967168  ;;  %s8562_s26 = sld [smem:[#allocation80_spill]]  ;;  %s8563_s9 = sld [smem:[#allocation81_spill]] }
0x1435   : > { %s8564_s22 = smov %s7213_s0  ;;  %s8565_s0 = smov %s7217_s23 }
0x143a   : > { %p91_p8 = scmp.ge.s32.totalorder %s8562_s26, 4   ;;  %s8566_s23 = smov %s8563_s9 }
0x143c   :  { %93 = sbr.rel (!%p91_p8) target bundleno = 83 (0x53), region = 336 }
0x1443   :  { %5054 = vsyncpa [#allocation3], 1 }
0x1444   :  { %5056 = vsyncpa [#allocation3 + $0x1], 1 }
0x1445   :  { %5057 = vsyncpa [#allocation6], 1 }
0x1446   :  { %5059 = vsyncpa [#allocation6 + $0x1], 1 }
0x1447   :  { %5060 = vsyncpa [#allocation9], 1 }
0x1448   :  { %5062 = vsyncpa [#allocation9 + $0x1], 1 }
0x1449   :  { %5063 = vsyncpa [#allocation12], 1 }
0x144a   :  { %5064 = vsyncpa [#allocation15], 1 }
0x144b   :  { %5065 = vsyncpa [#allocation18], 1 }
0x144c   :  { %5066 = vsyncpa [#allocation21], 1 }
0x144d   :  { %5067 = vsyncpa [#allocation24], 1 }
0x144e   :  { %5068 = vsyncpa [#allocation27], 1 }
0x144f   :  { %5069 = vsyncpa [#allocation30], 1 }
0x1450   :  { %5070 = vsyncpa [#allocation33], 1 }
0x1451   :  { %5071 = vsyncpa [#allocation36], 1 }
0x1452   :  { %5072 = vsyncpa [#allocation4], 1 }
0x1453   :  { %5074 = vsyncpa [#allocation4 + $0x1], 1 }

</bundles_post_ra>
